<compile_context>
chip_gen: v7x
topology: tpu7x:2x2x1
jax: 0.10.0
libtpu: 0.0.40
codegen_flags: <defaults>
</compile_context>

<pallas_src>
import jax
import jax.numpy as jnp
from jax import lax
from jax.experimental import pallas as pl
from jax.experimental.pallas import tpu as pltpu


# ----------------------------------------------------------------- tiling helper

def _pick_tile(n, target, align):
    """Largest multiple of `align` that divides n and is <= target (fallback: n)."""
    t = min(target, n)
    t -= t % align
    while t >= align:
        if n % t == 0:
            return t
        t -= align
    return n


# ------------------------------------------------- input projection (x @ W_ih^T + b)

def _input_proj_kernel(x_ref, wf_ref, wb_ref, bf_ref, bb_ref, yf_ref, yb_ref):
    # x: (tm, E) bf16 ; w*: (E, 4H) bf16 ; b*: (1, 4H) f32 ; y*: (tm, 4H) f32
    x = x_ref[...]
    yf_ref[...] = jnp.dot(x, wf_ref[...], preferred_element_type=jnp.float32) + bf_ref[...]
    yb_ref[...] = jnp.dot(x, wb_ref[...], preferred_element_type=jnp.float32) + bb_ref[...]


def input_projection(x_bf16, w_f, w_b, b_f, b_b, *, block_m=512):
    M, E = x_bf16.shape
    G = w_f.shape[1]                                  # 4H
    tm = _pick_tile(M, block_m, 16)                   # bf16 sublane packing -> align 16
    return pl.pallas_call(
        _input_proj_kernel,
        out_shape=(jax.ShapeDtypeStruct((M, G), jnp.float32),
                   jax.ShapeDtypeStruct((M, G), jnp.float32)),
        grid_spec=pltpu.PrefetchScalarGridSpec(
            num_scalar_prefetch=0,
            grid=(M // tm,),
            in_specs=[pl.BlockSpec((tm, E), lambda m: (m, 0)),
                      pl.BlockSpec((E, G), lambda m: (0, 0)),
                      pl.BlockSpec((E, G), lambda m: (0, 0)),
                      pl.BlockSpec((1, G), lambda m: (0, 0)),
                      pl.BlockSpec((1, G), lambda m: (0, 0))],
            out_specs=(pl.BlockSpec((tm, G), lambda m: (m, 0)),
                       pl.BlockSpec((tm, G), lambda m: (m, 0)))),
        compiler_params=pltpu.CompilerParams(dimension_semantics=("parallel",)),
    )(x_bf16, w_f, w_b, b_f, b_b)


# --------------------------------------------- fused bidirectional LSTM recurrence

def _bilstm_kernel(xpf_ref, xpb_ref, whhf_ref, whhb_ref, outf_ref, outb_ref,
                   hf_sc, cf_sc, hb_sc, cb_sc):
    # xp*: (tl, R, 4H) f32 pre-activations; forward gets chunk l, backward gets chunk
    #      nl-1-l via its index_map (reversal without HBM copies).
    # whh*: (H, 4H) bf16 ; out*: (R, tl, H) f32 batch-major ; scratch carries: (R, H) f32.
    l = pl.program_id(0)

    @pl.when(l == 0)
    def _():                                   # nn.LSTM default zero initial state
        hf_sc[...] = jnp.zeros_like(hf_sc)
        cf_sc[...] = jnp.zeros_like(cf_sc)
        hb_sc[...] = jnp.zeros_like(hb_sc)
        cb_sc[...] = jnp.zeros_like(cb_sc)

    tl = xpf_ref.shape[0]
    H = hf_sc.shape[-1]
    whh_f = whhf_ref[...]
    whh_b = whhb_ref[...]

    def cell(xp, h, c, whh_t):
        # bf16 MXU operands, f32 accumulation; gate element-wise math in f32.
        gates = xp + jnp.dot(h.astype(jnp.bfloat16), whh_t,
                             preferred_element_type=jnp.float32)        # (R, 4H)
        i = jax.nn.sigmoid(gates[:, 0 * H:1 * H])       # PyTorch gate order i, f, g, o
        f = jax.nn.sigmoid(gates[:, 1 * H:2 * H])
        g = jnp.tanh(gates[:, 2 * H:3 * H])
        o = jax.nn.sigmoid(gates[:, 3 * H:4 * H])
        c_new = f * c + i * g
        h_new = o * jnp.tanh(c_new)
        return h_new, c_new

    h_f, c_f = hf_sc[...], cf_sc[...]
    h_b, c_b = hb_sc[...], cb_sc[...]
    # Static unrolled recurrence inside the chunk: carries stay in vregs, all ref
    # indices are static; one grid step == tl time steps.
    for j in range(tl):
        h_f, c_f = cell(xpf_ref[j], h_f, c_f, whh_f)
        outf_ref[:, j, :] = h_f
        jj = tl - 1 - j                         # backward walks its chunk in reverse
        h_b, c_b = cell(xpb_ref[jj], h_b, c_b, whh_b)
        outb_ref[:, jj, :] = h_b
    hf_sc[...], cf_sc[...] = h_f, c_f
    hb_sc[...], cb_sc[...] = h_b, c_b


def fused_bilstm(xp_f, xp_b, whh_f_t, whh_b_t, *, time_chunk=8):
    L, R, G = xp_f.shape
    H = G // 4
    tl = time_chunk if (time_chunk % 8 == 0 and L % time_chunk == 0) else L
    nl = L // tl
    return pl.pallas_call(
        _bilstm_kernel,
        out_shape=(jax.ShapeDtypeStruct((R, L, H), jnp.float32),
                   jax.ShapeDtypeStruct((R, L, H), jnp.float32)),
        grid_spec=pltpu.PrefetchScalarGridSpec(
            num_scalar_prefetch=0,
            grid=(nl,),
            in_specs=[pl.BlockSpec((tl, R, G), lambda l: (l, 0, 0)),
                      pl.BlockSpec((tl, R, G), lambda l: (nl - 1 - l, 0, 0)),
                      pl.BlockSpec((H, G), lambda l: (0, 0)),
                      pl.BlockSpec((H, G), lambda l: (0, 0))],
            out_specs=(pl.BlockSpec((R, tl, H), lambda l: (0, l, 0)),
                       pl.BlockSpec((R, tl, H), lambda l: (0, nl - 1 - l, 0))),
            scratch_shapes=[pltpu.VMEM((R, H), jnp.float32)] * 4),
        compiler_params=pltpu.CompilerParams(dimension_semantics=("arbitrary",)),
    )(xp_f, xp_b, whh_f_t, whh_b_t)


# ------------------------------------------ ESIM attention + submul + avg/max pooling

def _esim_kernel(s1f_ref, s1b_ref, s2f_ref, s2b_ref, feat_ref):
    # s*: (bt, L, H) f32 halves of the BiLSTM output for sentence 1 / sentence 2.
    # feat: (bt, 32H) = cat([v1, v2]), written lane-dense in a single store.
    x1 = jnp.concatenate([s1f_ref[...], s1b_ref[...]], axis=-1)      # (bt, L, D), D = 2H
    x2 = jnp.concatenate([s2f_ref[...], s2b_ref[...]], axis=-1)
    bt = x1.shape[0]

    def pooled(x, al):
        # submul pieces kept separate: no (L, 4D) concat temporaries, just 8 reductions.
        parts = (x, al, x - al, x * al)
        means = [jnp.mean(p, axis=0, keepdims=True) for p in parts]
        maxes = [jnp.max(p, axis=0, keepdims=True) for p in parts]
        return means + maxes                                         # 8 x (1, D)

    rows = []
    for r in range(bt):                          # static unroll over rows in this tile
        a = x1[r]                                # (L, D) f32
        b = x2[r]
        a16, b16 = a.astype(jnp.bfloat16), b.astype(jnp.bfloat16)
        # score = a @ b^T  (NT matmul, bf16 operands, f32 accumulation)
        score = lax.dot_general(a16, b16, (((1,), (1,)), ((), ())),
                                preferred_element_type=jnp.float32)  # (L1, L2)
        w1 = jax.nn.softmax(score, axis=1)
        w2 = jax.nn.softmax(score, axis=0)       # == softmax(score.T, -1).T, no transpose
        align1 = jnp.dot(w1.astype(jnp.bfloat16), b16,
                         preferred_element_type=jnp.float32)         # (L1, D)
        # align2: contract the L1 axis directly (TN matmul) instead of materializing score.T
        align2 = lax.dot_general(w2.astype(jnp.bfloat16), a16, (((0,), (0,)), ((), ())),
                                 preferred_element_type=jnp.float32)  # (L2, D)
        rows.append(jnp.concatenate(pooled(a, align1) + pooled(b, align2), axis=-1))
    feat_ref[...] = jnp.concatenate(rows, axis=0)                    # (bt, 16D)


def esim_attention_pool(out_f, out_b, batch):
    R, L, H = out_f.shape
    D = 2 * H
    bt = batch if batch <= 8 else _pick_tile(batch, 8, 8)
    nb = batch // bt                             # sentence-2 rows start at block index nb
    return pl.pallas_call(
        _esim_kernel,
        out_shape=jax.ShapeDtypeStruct((batch, 16 * D), jnp.float32),
        grid_spec=pltpu.PrefetchScalarGridSpec(
            num_scalar_prefetch=0,
            grid=(nb,),
            in_specs=[pl.BlockSpec((bt, L, H), lambda b: (b, 0, 0)),        # sent 1 fwd
                      pl.BlockSpec((bt, L, H), lambda b: (b, 0, 0)),        # sent 1 bwd
                      pl.BlockSpec((bt, L, H), lambda b: (nb + b, 0, 0)),   # sent 2 fwd
                      pl.BlockSpec((bt, L, H), lambda b: (nb + b, 0, 0))],  # sent 2 bwd
            out_specs=pl.BlockSpec((bt, 16 * D), lambda b: (b, 0))),
        compiler_params=pltpu.CompilerParams(dimension_semantics=("parallel",)),
    )(out_f, out_b, out_f, out_b)


# --------------------------------------------- FC head: Linear -> ReLU -> Linear

def _fc_head_kernel(x_ref, w1_ref, b1_ref, w2_ref, b2_ref, o_ref, acc_ref):
    k = pl.program_id(0)

    @pl.when(k == 0)
    def _():
        acc_ref[...] = jnp.zeros_like(acc_ref)

    acc_ref[...] += jnp.dot(x_ref[...].astype(jnp.bfloat16), w1_ref[...],
                            preferred_element_type=jnp.float32)

    @pl.when(k == pl.num_programs(0) - 1)
    def _():
        h = jnp.maximum(acc_ref[...] + b1_ref[...], 0.0)
        # TODO(synk): nn.Dropout(p=0.2) is identity at inference; training parity would need
        # a pltpu.prng_* based mask here.
        o_ref[...] = jnp.dot(h.astype(jnp.bfloat16), w2_ref[...],
                             preferred_element_type=jnp.float32) + b2_ref[...]


def fc_head(x, w1, b1, w2, b2, *, block_k=256):
    B, K = x.shape
    Hh = w1.shape[1]
    O = w2.shape[1]
    tk = _pick_tile(K, block_k, 128)             # K-tiling keeps fc1_w blocks VMEM-bounded
    return pl.pallas_call(
        _fc_head_kernel,
        out_shape=jax.ShapeDtypeStruct((B, O), jnp.float32),
        grid_spec=pltpu.PrefetchScalarGridSpec(
            num_scalar_prefetch=0,
            grid=(K // tk,),
            in_specs=[pl.BlockSpec((B, tk), lambda k: (0, k)),
                      pl.BlockSpec((tk, Hh), lambda k: (k, 0)),
                      pl.BlockSpec((1, Hh), lambda k: (0, 0)),
                      pl.BlockSpec((Hh, O), lambda k: (0, 0)),
                      pl.BlockSpec((1, O), lambda k: (0, 0))],
            out_specs=pl.BlockSpec((B, O), lambda k: (0, 0)),
            scratch_shapes=[pltpu.VMEM((B, Hh), jnp.float32)]),
        compiler_params=pltpu.CompilerParams(dimension_semantics=("arbitrary",)),
    )(x, w1, b1, w2, b2)


# ----------------------------------------------------------------- full forward pass

@jax.jit
def sentence_pair_classifier(params, seq1, seq2):
    B, L = seq1.shape
    H = params["w_hh_f"].shape[1]
    R = 2 * B                                    # rows 0..B-1 = sentence 1, B..2B-1 = sentence 2

    # Embedding lookup (plain-JAX glue) emitted directly in TIME-MAJOR order so the
    # projection output reshapes to (L, R, 4H) for free — no wrapper transposes anywhere.
    seq_all = jnp.concatenate([seq1, seq2], axis=0)          # (R, L)
    tok_tm = jnp.transpose(seq_all).reshape(-1)              # (L*R,) time-major token ids
    x = jnp.take(params["embedding"], tok_tm, axis=0).astype(jnp.bfloat16)   # (L*R, E)

    bf16 = lambda a: a.astype(jnp.bfloat16)
    xp_f, xp_b = input_projection(
        x,
        bf16(params["w_ih_f"].T), bf16(params["w_ih_b"].T),
        (params["b_ih_f"] + params["b_hh_f"]).reshape(1, -1),
        (params["b_ih_b"] + params["b_hh_b"]).reshape(1, -1))
    xp_f = xp_f.reshape(L, R, 4 * H)
    xp_b = xp_b.reshape(L, R, 4 * H)

    out_f, out_b = fused_bilstm(xp_f, xp_b,
                                bf16(params["w_hh_f"].T), bf16(params["w_hh_b"].T),
                                time_chunk=8)                # (R, L, H) each, batch-major

    feat = esim_attention_pool(out_f, out_b, B)              # (B, 32H)

    return fc_head(feat,
                   bf16(params["fc1_w"].T), params["fc1_b"].reshape(1, -1),
                   bf16(params["fc2_w"].T), params["fc2_b"].reshape(1, -1))


def init_params(key, vocab_size, embedding_dim, hidden_dim, output_dim):
    E, H, O = embedding_dim, hidden_dim, output_dim
    ks = jax.random.split(key, 13)
    u = lambda k, shape, s: jax.random.uniform(k, shape, jnp.float32, -s, s)
    kH = (1.0 / H) ** 0.5
    kF = (1.0 / (32 * H)) ** 0.5
    # TODO(synk): the original __init__ declares nn.Linear(hidden_dim * 8, hidden_dim), which is
    # inconsistent with its own forward (cat([v1, v2]) has 32*hidden_dim features); fc1 is sized
    # 32H -> H here so the declared forward pass actually runs.
    return {
        "embedding": jax.random.normal(ks[0], (vocab_size, E), jnp.float32),
        "w_ih_f": u(ks[1], (4 * H, E), kH), "w_hh_f": u(ks[2], (4 * H, H), kH),
        "b_ih_f": u(ks[3], (4 * H,), kH),   "b_hh_f": u(ks[4], (4 * H,), kH),
        "w_ih_b": u(ks[5], (4 * H, E), kH), "w_hh_b": u(ks[6], (4 * H, H), kH),
        "b_ih_b": u(ks[7], (4 * H,), kH),   "b_hh_b": u(ks[8], (4 * H,), kH),
        "fc1_w": u(ks[9], (H, 32 * H), kF), "fc1_b": u(ks[10], (H,), kF),
        "fc2_w": u(ks[11], (O, H), kH),     "fc2_b": u(ks[12], (O,), kH),
    }


def _reference_forward(params, seq1, seq2):
    """Pure-JAX (f32) mirror of the PyTorch module, used as a loose numerical check."""
    emb = params["embedding"]
    H = params["w_hh_f"].shape[1]

    def lstm_dir(x, w_ih, w_hh, b_ih, b_hh, reverse):
        if reverse:
            x = x[:, ::-1, :]
        Bb = x.shape[0]

        def step(carry, xt):
            h, c = carry
            gates = xt @ w_ih.T + b_ih + h @ w_hh.T + b_hh
            i = jax.nn.sigmoid(gates[:, 0 * H:1 * H])
            f = jax.nn.sigmoid(gates[:, 1 * H:2 * H])
            g = jnp.tanh(gates[:, 2 * H:3 * H])
            o = jax.nn.sigmoid(gates[:, 3 * H:4 * H])
            c = f * c + i * g
            h = o * jnp.tanh(c)
            return (h, c), h

        h0 = jnp.zeros((Bb, H), jnp.float32)
        _, hs = lax.scan(step, (h0, h0), jnp.transpose(x, (1, 0, 2)))
        hs = jnp.transpose(hs, (1, 0, 2))
        return hs[:, ::-1, :] if reverse else hs

    def encode(seq):
        x = emb[seq]
        hf = lstm_dir(x, params["w_ih_f"], params["w_hh_f"],
                      params["b_ih_f"], params["b_hh_f"], False)
        hb = lstm_dir(x, params["w_ih_b"], params["w_hh_b"],
                      params["b_ih_b"], params["b_hh_b"], True)
        return jnp.concatenate([hf, hb], axis=-1)

    o1, o2 = encode(seq1), encode(seq2)
    score = jnp.einsum("bld,bmd->blm", o1, o2)
    w1 = jax.nn.softmax(score, axis=2)
    w2 = jax.nn.softmax(jnp.swapaxes(score, 1, 2), axis=2)
    a1 = jnp.einsum("blm,bmd->bld", w1, o2)
    a2 = jnp.einsum("bml,bld->bmd", w2, o1)
    submul = lambda x, a: jnp.concatenate([x, a, x - a, x * a], axis=-1)
    pool = lambda m: jnp.concatenate([jnp.mean(m, axis=1), jnp.max(m, axis=1)], axis=-1)
    feat = jnp.concatenate([pool(submul(o1, a1)), pool(submul(o2, a2))], axis=-1)
    h = jax.nn.relu(feat @ params["fc1_w"].T + params["fc1_b"])
    return h @ params["fc2_w"].T + params["fc2_b"]


if __name__ == "__main__":
    VOCAB, E, H, O = 64, 32, 16, 3
    B, L = 2, 16
    key = jax.random.PRNGKey(0)
    kp, k1, k2 = jax.random.split(key, 3)
    params = init_params(kp, VOCAB, E, H, O)
    seq1 = jax.random.randint(k1, (B, L), 0, VOCAB, dtype=jnp.int32)
    seq2 = jax.random.randint(k2, (B, L), 0, VOCAB, dtype=jnp.int32)

    out = sentence_pair_classifier(params, seq1, seq2)
    jax.block_until_ready(out)
    assert out.shape == (B, O), out.shape
    assert bool(jnp.all(jnp.isfinite(out)))

    # Loose tolerance: kernel uses bf16 MXU operands (f32 accumulation), reference is f32.
    ref = _reference_forward(params, seq1, seq2)
    assert bool(jnp.allclose(out, ref, rtol=0.1, atol=0.05)), (out, ref)
    print("KERNEL_OK")
</pallas_src>

<mosaic_0001>
module attributes {stable_mosaic.version = 11 : i64} {
  func.func @_input_proj_kernel(%arg0: i32, %arg1: memref<64x32xbf16, #tpu.memory_space<vmem>>, %arg2: memref<32x64xbf16, #tpu.memory_space<vmem>>, %arg3: memref<32x64xbf16, #tpu.memory_space<vmem>>, %arg4: memref<1x64xf32, #tpu.memory_space<vmem>>, %arg5: memref<1x64xf32, #tpu.memory_space<vmem>>, %arg6: memref<64x64xf32, #tpu.memory_space<vmem>>, %arg7: memref<64x64xf32, #tpu.memory_space<vmem>>) attributes {dimension_semantics = [#tpu.dimension_semantics<parallel>], iteration_bounds = array<i64: 1>, scalar_prefetch = 0 : i64, scratch_operands = 0 : i64, tpu.core_type = #tpu.core_type<tc>, window_params = [{transform_indices = @transform_0, window_bounds = array<i64: 64, 32>}, {pipeline_mode = #tpu.pipeline_mode<synchronous>, transform_indices = @transform_1, window_bounds = array<i64: 32, 64>}, {pipeline_mode = #tpu.pipeline_mode<synchronous>, transform_indices = @transform_2, window_bounds = array<i64: 32, 64>}, {pipeline_mode = #tpu.pipeline_mode<synchronous>, transform_indices = @transform_3, window_bounds = array<i64: 1, 64>}, {pipeline_mode = #tpu.pipeline_mode<synchronous>, transform_indices = @transform_4, window_bounds = array<i64: 1, 64>}, {transform_indices = @transform_5, window_bounds = array<i64: 64, 64>}, {transform_indices = @transform_6, window_bounds = array<i64: 64, 64>}]} {
    %c0 = arith.constant 0 : index
    %c0_0 = arith.constant 0 : index
    %0 = vector.load %arg1[%c0, %c0_0] : memref<64x32xbf16, #tpu.memory_space<vmem>>, vector<64x32xbf16>
    %c0_1 = arith.constant 0 : index
    %c0_2 = arith.constant 0 : index
    %1 = vector.load %arg2[%c0_1, %c0_2] : memref<32x64xbf16, #tpu.memory_space<vmem>>, vector<32x64xbf16>
    %cst = arith.constant dense<0.000000e+00> : vector<64x64xf32>
    %2 = tpu.matmul %0, %1, %cst {dimension_numbers = #tpu.dot_dimension_numbers<[1], [0], [0], [1], [0, 0, 1, 1], [], []>} : vector<64x32xbf16>, vector<32x64xbf16>, vector<64x64xf32> -> vector<64x64xf32>
    %c0_3 = arith.constant 0 : index
    %c0_4 = arith.constant 0 : index
    %3 = vector.load %arg4[%c0_3, %c0_4] : memref<1x64xf32, #tpu.memory_space<vmem>>, vector<1x64xf32>
    %4 = vector.broadcast %3 : vector<1x64xf32> to vector<64x64xf32>
    %5 = arith.addf %2, %4 : vector<64x64xf32>
    %c0_5 = arith.constant 0 : index
    %c0_6 = arith.constant 0 : index
    %6 = vector.load %arg6[%c0_5, %c0_6] : memref<64x64xf32, #tpu.memory_space<vmem>>, vector<64x64xf32>
    tpu.vector_store %arg6[%c0_5, %c0_6], %5 {strides = array<i32>} : memref<64x64xf32, #tpu.memory_space<vmem>>, vector<64x64xf32>,
    %c0_7 = arith.constant 0 : index
    %c0_8 = arith.constant 0 : index
    %7 = vector.load %arg3[%c0_7, %c0_8] : memref<32x64xbf16, #tpu.memory_space<vmem>>, vector<32x64xbf16>
    %cst_9 = arith.constant dense<0.000000e+00> : vector<64x64xf32>
    %8 = tpu.matmul %0, %7, %cst_9 {dimension_numbers = #tpu.dot_dimension_numbers<[1], [0], [0], [1], [0, 0, 1, 1], [], []>} : vector<64x32xbf16>, vector<32x64xbf16>, vector<64x64xf32> -> vector<64x64xf32>
    %c0_10 = arith.constant 0 : index
    %c0_11 = arith.constant 0 : index
    %9 = vector.load %arg5[%c0_10, %c0_11] : memref<1x64xf32, #tpu.memory_space<vmem>>, vector<1x64xf32>
    %10 = vector.broadcast %9 : vector<1x64xf32> to vector<64x64xf32>
    %11 = arith.addf %8, %10 : vector<64x64xf32>
    %c0_12 = arith.constant 0 : index
    %c0_13 = arith.constant 0 : index
    %12 = vector.load %arg7[%c0_12, %c0_13] : memref<64x64xf32, #tpu.memory_space<vmem>>, vector<64x64xf32>
    tpu.vector_store %arg7[%c0_12, %c0_13], %11 {strides = array<i32>} : memref<64x64xf32, #tpu.memory_space<vmem>>, vector<64x64xf32>,
    return
  }
  func.func @transform_0(%arg0: i32) -> (i32, i32) {
    %c0_i32 = arith.constant 0 : i32
    %c0_i32_0 = arith.constant 0 : i32
    return %arg0, %c0_i32 : i32, i32
  }
  func.func @transform_1(%arg0: i32) -> (i32, i32) {
    %c0_i32 = arith.constant 0 : i32
    %c0_i32_0 = arith.constant 0 : i32
    %c0_i32_1 = arith.constant 0 : i32
    return %c0_i32, %c0_i32_0 : i32, i32
  }
  func.func @transform_2(%arg0: i32) -> (i32, i32) {
    %c0_i32 = arith.constant 0 : i32
    %c0_i32_0 = arith.constant 0 : i32
    %c0_i32_1 = arith.constant 0 : i32
    return %c0_i32, %c0_i32_0 : i32, i32
  }
  func.func @transform_3(%arg0: i32) -> (i32, i32) {
    %c0_i32 = arith.constant 0 : i32
    %c0_i32_0 = arith.constant 0 : i32
    %c0_i32_1 = arith.constant 0 : i32
    return %c0_i32, %c0_i32_0 : i32, i32
  }
  func.func @transform_4(%arg0: i32) -> (i32, i32) {
    %c0_i32 = arith.constant 0 : i32
    %c0_i32_0 = arith.constant 0 : i32
    %c0_i32_1 = arith.constant 0 : i32
    return %c0_i32, %c0_i32_0 : i32, i32
  }
  func.func @transform_5(%arg0: i32) -> (i32, i32) {
    %c0_i32 = arith.constant 0 : i32
    %c0_i32_0 = arith.constant 0 : i32
    return %arg0, %c0_i32 : i32, i32
  }
  func.func @transform_6(%arg0: i32) -> (i32, i32) {
    %c0_i32 = arith.constant 0 : i32
    %c0_i32_0 = arith.constant 0 : i32
    return %arg0, %c0_i32 : i32, i32
  }
}

module attributes {stable_mosaic.version = 11 : i64} {
  func.func @_bilstm_kernel(%arg0: i32, %arg1: memref<8x4x64xf32, #tpu.memory_space<vmem>>, %arg2: memref<8x4x64xf32, #tpu.memory_space<vmem>>, %arg3: memref<16x64xbf16, #tpu.memory_space<vmem>>, %arg4: memref<16x64xbf16, #tpu.memory_space<vmem>>, %arg5: memref<4x8x16xf32, #tpu.memory_space<vmem>>, %arg6: memref<4x8x16xf32, #tpu.memory_space<vmem>>, %arg7: memref<4x16xf32, #tpu.memory_space<vmem>>, %arg8: memref<4x16xf32, #tpu.memory_space<vmem>>, %arg9: memref<4x16xf32, #tpu.memory_space<vmem>>, %arg10: memref<4x16xf32, #tpu.memory_space<vmem>>) attributes {dimension_semantics = [#tpu.dimension_semantics<arbitrary>], iteration_bounds = array<i64: 2>, scalar_prefetch = 0 : i64, scratch_operands = 4 : i64, tpu.core_type = #tpu.core_type<tc>, window_params = [{transform_indices = @transform_0, window_bounds = array<i64: 8, 4, 64>}, {transform_indices = @transform_1, window_bounds = array<i64: 8, 4, 64>}, {pipeline_mode = #tpu.pipeline_mode<synchronous>, transform_indices = @transform_2, window_bounds = array<i64: 16, 64>}, {pipeline_mode = #tpu.pipeline_mode<synchronous>, transform_indices = @transform_3, window_bounds = array<i64: 16, 64>}, {transform_indices = @transform_4, window_bounds = array<i64: 4, 8, 16>}, {transform_indices = @transform_5, window_bounds = array<i64: 4, 8, 16>}]} {
    %c0_i32 = arith.constant 0 : i32
    %0 = arith.cmpi eq, %arg0, %c0_i32 : i32
    %1 = arith.extui %0 : i1 to i32
    %c0_i32_0 = arith.constant 0 : i32
    %2 = arith.cmpi ne, %1, %c0_i32_0 : i32
    scf.if %2 {
      %cst_172 = arith.constant 0.000000e+00 : f32
      %541 = vector.broadcast %cst_172 : f32 to vector<4x16xf32>
      %c0_173 = arith.constant 0 : index
      %c0_174 = arith.constant 0 : index
      %542 = vector.load %arg7[%c0_173, %c0_174] : memref<4x16xf32, #tpu.memory_space<vmem>>, vector<4x16xf32>
      tpu.vector_store %arg7[%c0_173, %c0_174], %541 {strides = array<i32>} : memref<4x16xf32, #tpu.memory_space<vmem>>, vector<4x16xf32>,
      %cst_175 = arith.constant 0.000000e+00 : f32
      %543 = vector.broadcast %cst_175 : f32 to vector<4x16xf32>
      %c0_176 = arith.constant 0 : index
      %c0_177 = arith.constant 0 : index
      %544 = vector.load %arg8[%c0_176, %c0_177] : memref<4x16xf32, #tpu.memory_space<vmem>>, vector<4x16xf32>
      tpu.vector_store %arg8[%c0_176, %c0_177], %543 {strides = array<i32>} : memref<4x16xf32, #tpu.memory_space<vmem>>, vector<4x16xf32>,
      %cst_178 = arith.constant 0.000000e+00 : f32
      %545 = vector.broadcast %cst_178 : f32 to vector<4x16xf32>
      %c0_179 = arith.constant 0 : index
      %c0_180 = arith.constant 0 : index
      %546 = vector.load %arg9[%c0_179, %c0_180] : memref<4x16xf32, #tpu.memory_space<vmem>>, vector<4x16xf32>
      tpu.vector_store %arg9[%c0_179, %c0_180], %545 {strides = array<i32>} : memref<4x16xf32, #tpu.memory_space<vmem>>, vector<4x16xf32>,
      %cst_181 = arith.constant 0.000000e+00 : f32
      %547 = vector.broadcast %cst_181 : f32 to vector<4x16xf32>
      %c0_182 = arith.constant 0 : index
      %c0_183 = arith.constant 0 : index
      %548 = vector.load %arg10[%c0_182, %c0_183] : memref<4x16xf32, #tpu.memory_space<vmem>>, vector<4x16xf32>
      tpu.vector_store %arg10[%c0_182, %c0_183], %547 {strides = array<i32>} : memref<4x16xf32, #tpu.memory_space<vmem>>, vector<4x16xf32>,
    } else {
    }
    %c0 = arith.constant 0 : index
    %c0_1 = arith.constant 0 : index
    %3 = vector.load %arg3[%c0, %c0_1] : memref<16x64xbf16, #tpu.memory_space<vmem>>, vector<16x64xbf16>
    %c0_2 = arith.constant 0 : index
    %c0_3 = arith.constant 0 : index
    %4 = vector.load %arg4[%c0_2, %c0_3] : memref<16x64xbf16, #tpu.memory_space<vmem>>, vector<16x64xbf16>
    %c0_4 = arith.constant 0 : index
    %c0_5 = arith.constant 0 : index
    %5 = vector.load %arg7[%c0_4, %c0_5] : memref<4x16xf32, #tpu.memory_space<vmem>>, vector<4x16xf32>
    %c0_6 = arith.constant 0 : index
    %c0_7 = arith.constant 0 : index
    %6 = vector.load %arg8[%c0_6, %c0_7] : memref<4x16xf32, #tpu.memory_space<vmem>>, vector<4x16xf32>
    %c0_8 = arith.constant 0 : index
    %c0_9 = arith.constant 0 : index
    %7 = vector.load %arg9[%c0_8, %c0_9] : memref<4x16xf32, #tpu.memory_space<vmem>>, vector<4x16xf32>
    %c0_10 = arith.constant 0 : index
    %c0_11 = arith.constant 0 : index
    %8 = vector.load %arg10[%c0_10, %c0_11] : memref<4x16xf32, #tpu.memory_space<vmem>>, vector<4x16xf32>
    %c0_12 = arith.constant 0 : index
    %c0_13 = arith.constant 0 : index
    %c0_14 = arith.constant 0 : index
    %9 = vector.load %arg1[%c0_12, %c0_13, %c0_14] : memref<8x4x64xf32, #tpu.memory_space<vmem>>, vector<1x4x64xf32>
    %10 = vector.shape_cast %9 : vector<1x4x64xf32> to vector<4x64xf32>
    %11 = arith.truncf %5 : vector<4x16xf32> to vector<4x16xbf16>
    %cst = arith.constant dense<0.000000e+00> : vector<4x64xf32>
    %12 = tpu.matmul %11, %3, %cst {dimension_numbers = #tpu.dot_dimension_numbers<[1], [0], [0], [1], [0, 0, 1, 1], [], []>} : vector<4x16xbf16>, vector<16x64xbf16>, vector<4x64xf32> -> vector<4x64xf32>
    %13 = arith.addf %10, %12 : vector<4x64xf32>
    %14 = vector.extract_strided_slice %13 {offsets = [0, 0], sizes = [4, 16], strides = [1, 1]} : vector<4x64xf32> to vector<4x16xf32>
    %15 = arith.negf %14 : vector<4x16xf32>
    %16 = math.exp %15 : vector<4x16xf32>
    %cst_15 = arith.constant 1.000000e+00 : f32
    %17 = vector.broadcast %cst_15 : f32 to vector<4x16xf32>
    %18 = arith.addf %17, %16 : vector<4x16xf32>
    %19 = arith.divf %17, %18 : vector<4x16xf32>
    %20 = vector.extract_strided_slice %13 {offsets = [0, 16], sizes = [4, 16], strides = [1, 1]} : vector<4x64xf32> to vector<4x16xf32>
    %21 = arith.negf %20 : vector<4x16xf32>
    %22 = math.exp %21 : vector<4x16xf32>
    %cst_16 = arith.constant 1.000000e+00 : f32
    %23 = vector.broadcast %cst_16 : f32 to vector<4x16xf32>
    %24 = arith.addf %23, %22 : vector<4x16xf32>
    %25 = arith.divf %23, %24 : vector<4x16xf32>
    %26 = vector.extract_strided_slice %13 {offsets = [0, 32], sizes = [4, 16], strides = [1, 1]} : vector<4x64xf32> to vector<4x16xf32>
    %27 = math.tanh %26 : vector<4x16xf32>
    %28 = vector.extract_strided_slice %13 {offsets = [0, 48], sizes = [4, 16], strides = [1, 1]} : vector<4x64xf32> to vector<4x16xf32>
    %29 = arith.negf %28 : vector<4x16xf32>
    %30 = math.exp %29 : vector<4x16xf32>
    %cst_17 = arith.constant 1.000000e+00 : f32
    %31 = vector.broadcast %cst_17 : f32 to vector<4x16xf32>
    %32 = arith.addf %31, %30 : vector<4x16xf32>
    %33 = arith.divf %31, %32 : vector<4x16xf32>
    %34 = arith.mulf %25, %6 : vector<4x16xf32>
    %35 = arith.mulf %19, %27 : vector<4x16xf32>
    %36 = arith.addf %34, %35 : vector<4x16xf32>
    %37 = math.tanh %36 : vector<4x16xf32>
    %38 = arith.mulf %33, %37 : vector<4x16xf32>
    %c0_18 = arith.constant 0 : index
    %c0_19 = arith.constant 0 : index
    %c0_20 = arith.constant 0 : index
    %39 = vector.load %arg5[%c0_18, %c0_19, %c0_20] : memref<4x8x16xf32, #tpu.memory_space<vmem>>, vector<4x1x16xf32>
    %40 = vector.shape_cast %39 : vector<4x1x16xf32> to vector<4x16xf32>
    %41 = vector.shape_cast %38 : vector<4x16xf32> to vector<4x1x16xf32>
    tpu.vector_store %arg5[%c0_18, %c0_19, %c0_20], %41 {strides = array<i32>} : memref<4x8x16xf32, #tpu.memory_space<vmem>>, vector<4x1x16xf32>,
    %c7 = arith.constant 7 : index
    %c0_21 = arith.constant 0 : index
    %c0_22 = arith.constant 0 : index
    %42 = vector.load %arg2[%c7, %c0_21, %c0_22] : memref<8x4x64xf32, #tpu.memory_space<vmem>>, vector<1x4x64xf32>
    %43 = vector.shape_cast %42 : vector<1x4x64xf32> to vector<4x64xf32>
    %44 = arith.truncf %7 : vector<4x16xf32> to vector<4x16xbf16>
    %cst_23 = arith.constant dense<0.000000e+00> : vector<4x64xf32>
    %45 = tpu.matmul %44, %4, %cst_23 {dimension_numbers = #tpu.dot_dimension_numbers<[1], [0], [0], [1], [0, 0, 1, 1], [], []>} : vector<4x16xbf16>, vector<16x64xbf16>, vector<4x64xf32> -> vector<4x64xf32>
    %46 = arith.addf %43, %45 : vector<4x64xf32>
    %47 = vector.extract_strided_slice %46 {offsets = [0, 0], sizes = [4, 16], strides = [1, 1]} : vector<4x64xf32> to vector<4x16xf32>
    %48 = arith.negf %47 : vector<4x16xf32>
    %49 = math.exp %48 : vector<4x16xf32>
    %cst_24 = arith.constant 1.000000e+00 : f32
    %50 = vector.broadcast %cst_24 : f32 to vector<4x16xf32>
    %51 = arith.addf %50, %49 : vector<4x16xf32>
    %52 = arith.divf %50, %51 : vector<4x16xf32>
    %53 = vector.extract_strided_slice %46 {offsets = [0, 16], sizes = [4, 16], strides = [1, 1]} : vector<4x64xf32> to vector<4x16xf32>
    %54 = arith.negf %53 : vector<4x16xf32>
    %55 = math.exp %54 : vector<4x16xf32>
    %cst_25 = arith.constant 1.000000e+00 : f32
    %56 = vector.broadcast %cst_25 : f32 to vector<4x16xf32>
    %57 = arith.addf %56, %55 : vector<4x16xf32>
    %58 = arith.divf %56, %57 : vector<4x16xf32>
    %59 = vector.extract_strided_slice %46 {offsets = [0, 32], sizes = [4, 16], strides = [1, 1]} : vector<4x64xf32> to vector<4x16xf32>
    %60 = math.tanh %59 : vector<4x16xf32>
    %61 = vector.extract_strided_slice %46 {offsets = [0, 48], sizes = [4, 16], strides = [1, 1]} : vector<4x64xf32> to vector<4x16xf32>
    %62 = arith.negf %61 : vector<4x16xf32>
    %63 = math.exp %62 : vector<4x16xf32>
    %cst_26 = arith.constant 1.000000e+00 : f32
    %64 = vector.broadcast %cst_26 : f32 to vector<4x16xf32>
    %65 = arith.addf %64, %63 : vector<4x16xf32>
    %66 = arith.divf %64, %65 : vector<4x16xf32>
    %67 = arith.mulf %58, %8 : vector<4x16xf32>
    %68 = arith.mulf %52, %60 : vector<4x16xf32>
    %69 = arith.addf %67, %68 : vector<4x16xf32>
    %70 = math.tanh %69 : vector<4x16xf32>
    %71 = arith.mulf %66, %70 : vector<4x16xf32>
    %c0_27 = arith.constant 0 : index
    %c7_28 = arith.constant 7 : index
    %c0_29 = arith.constant 0 : index
    %72 = vector.load %arg6[%c0_27, %c7_28, %c0_29] : memref<4x8x16xf32, #tpu.memory_space<vmem>>, vector<4x1x16xf32>
    %73 = vector.shape_cast %72 : vector<4x1x16xf32> to vector<4x16xf32>
    %74 = vector.shape_cast %71 : vector<4x16xf32> to vector<4x1x16xf32>
    tpu.vector_store %arg6[%c0_27, %c7_28, %c0_29], %74 {strides = array<i32>} : memref<4x8x16xf32, #tpu.memory_space<vmem>>, vector<4x1x16xf32>,
    %c1 = arith.constant 1 : index
    %c0_30 = arith.constant 0 : index
    %c0_31 = arith.constant 0 : index
    %75 = vector.load %arg1[%c1, %c0_30, %c0_31] : memref<8x4x64xf32, #tpu.memory_space<vmem>>, vector<1x4x64xf32>
    %76 = vector.shape_cast %75 : vector<1x4x64xf32> to vector<4x64xf32>
    %77 = arith.truncf %38 : vector<4x16xf32> to vector<4x16xbf16>
    %cst_32 = arith.constant dense<0.000000e+00> : vector<4x64xf32>
    %78 = tpu.matmul %77, %3, %cst_32 {dimension_numbers = #tpu.dot_dimension_numbers<[1], [0], [0], [1], [0, 0, 1, 1], [], []>} : vector<4x16xbf16>, vector<16x64xbf16>, vector<4x64xf32> -> vector<4x64xf32>
    %79 = arith.addf %76, %78 : vector<4x64xf32>
    %80 = vector.extract_strided_slice %79 {offsets = [0, 0], sizes = [4, 16], strides = [1, 1]} : vector<4x64xf32> to vector<4x16xf32>
    %81 = arith.negf %80 : vector<4x16xf32>
    %82 = math.exp %81 : vector<4x16xf32>
    %cst_33 = arith.constant 1.000000e+00 : f32
    %83 = vector.broadcast %cst_33 : f32 to vector<4x16xf32>
    %84 = arith.addf %83, %82 : vector<4x16xf32>
    %85 = arith.divf %83, %84 : vector<4x16xf32>
    %86 = vector.extract_strided_slice %79 {offsets = [0, 16], sizes = [4, 16], strides = [1, 1]} : vector<4x64xf32> to vector<4x16xf32>
    %87 = arith.negf %86 : vector<4x16xf32>
    %88 = math.exp %87 : vector<4x16xf32>
    %cst_34 = arith.constant 1.000000e+00 : f32
    %89 = vector.broadcast %cst_34 : f32 to vector<4x16xf32>
    %90 = arith.addf %89, %88 : vector<4x16xf32>
    %91 = arith.divf %89, %90 : vector<4x16xf32>
    %92 = vector.extract_strided_slice %79 {offsets = [0, 32], sizes = [4, 16], strides = [1, 1]} : vector<4x64xf32> to vector<4x16xf32>
    %93 = math.tanh %92 : vector<4x16xf32>
    %94 = vector.extract_strided_slice %79 {offsets = [0, 48], sizes = [4, 16], strides = [1, 1]} : vector<4x64xf32> to vector<4x16xf32>
    %95 = arith.negf %94 : vector<4x16xf32>
    %96 = math.exp %95 : vector<4x16xf32>
    %cst_35 = arith.constant 1.000000e+00 : f32
    %97 = vector.broadcast %cst_35 : f32 to vector<4x16xf32>
    %98 = arith.addf %97, %96 : vector<4x16xf32>
    %99 = arith.divf %97, %98 : vector<4x16xf32>
    %100 = arith.mulf %91, %36 : vector<4x16xf32>
    %101 = arith.mulf %85, %93 : vector<4x16xf32>
    %102 = arith.addf %100, %101 : vector<4x16xf32>
    %103 = math.tanh %102 : vector<4x16xf32>
    %104 = arith.mulf %99, %103 : vector<4x16xf32>
    %c0_36 = arith.constant 0 : index
    %c1_37 = arith.constant 1 : index
    %c0_38 = arith.constant 0 : index
    %105 = vector.load %arg5[%c0_36, %c1_37, %c0_38] : memref<4x8x16xf32, #tpu.memory_space<vmem>>, vector<4x1x16xf32>
    %106 = vector.shape_cast %105 : vector<4x1x16xf32> to vector<4x16xf32>
    %107 = vector.shape_cast %104 : vector<4x16xf32> to vector<4x1x16xf32>
    tpu.vector_store %arg5[%c0_36, %c1_37, %c0_38], %107 {strides = array<i32>} : memref<4x8x16xf32, #tpu.memory_space<vmem>>, vector<4x1x16xf32>,
    %c6 = arith.constant 6 : index
    %c0_39 = arith.constant 0 : index
    %c0_40 = arith.constant 0 : index
    %108 = vector.load %arg2[%c6, %c0_39, %c0_40] : memref<8x4x64xf32, #tpu.memory_space<vmem>>, vector<1x4x64xf32>
    %109 = vector.shape_cast %108 : vector<1x4x64xf32> to vector<4x64xf32>
    %110 = arith.truncf %71 : vector<4x16xf32> to vector<4x16xbf16>
    %cst_41 = arith.constant dense<0.000000e+00> : vector<4x64xf32>
    %111 = tpu.matmul %110, %4, %cst_41 {dimension_numbers = #tpu.dot_dimension_numbers<[1], [0], [0], [1], [0, 0, 1, 1], [], []>} : vector<4x16xbf16>, vector<16x64xbf16>, vector<4x64xf32> -> vector<4x64xf32>
    %112 = arith.addf %109, %111 : vector<4x64xf32>
    %113 = vector.extract_strided_slice %112 {offsets = [0, 0], sizes = [4, 16], strides = [1, 1]} : vector<4x64xf32> to vector<4x16xf32>
    %114 = arith.negf %113 : vector<4x16xf32>
    %115 = math.exp %114 : vector<4x16xf32>
    %cst_42 = arith.constant 1.000000e+00 : f32
    %116 = vector.broadcast %cst_42 : f32 to vector<4x16xf32>
    %117 = arith.addf %116, %115 : vector<4x16xf32>
    %118 = arith.divf %116, %117 : vector<4x16xf32>
    %119 = vector.extract_strided_slice %112 {offsets = [0, 16], sizes = [4, 16], strides = [1, 1]} : vector<4x64xf32> to vector<4x16xf32>
    %120 = arith.negf %119 : vector<4x16xf32>
    %121 = math.exp %120 : vector<4x16xf32>
    %cst_43 = arith.constant 1.000000e+00 : f32
    %122 = vector.broadcast %cst_43 : f32 to vector<4x16xf32>
    %123 = arith.addf %122, %121 : vector<4x16xf32>
    %124 = arith.divf %122, %123 : vector<4x16xf32>
    %125 = vector.extract_strided_slice %112 {offsets = [0, 32], sizes = [4, 16], strides = [1, 1]} : vector<4x64xf32> to vector<4x16xf32>
    %126 = math.tanh %125 : vector<4x16xf32>
    %127 = vector.extract_strided_slice %112 {offsets = [0, 48], sizes = [4, 16], strides = [1, 1]} : vector<4x64xf32> to vector<4x16xf32>
    %128 = arith.negf %127 : vector<4x16xf32>
    %129 = math.exp %128 : vector<4x16xf32>
    %cst_44 = arith.constant 1.000000e+00 : f32
    %130 = vector.broadcast %cst_44 : f32 to vector<4x16xf32>
    %131 = arith.addf %130, %129 : vector<4x16xf32>
    %132 = arith.divf %130, %131 : vector<4x16xf32>
    %133 = arith.mulf %124, %69 : vector<4x16xf32>
    %134 = arith.mulf %118, %126 : vector<4x16xf32>
    %135 = arith.addf %133, %134 : vector<4x16xf32>
    %136 = math.tanh %135 : vector<4x16xf32>
    %137 = arith.mulf %132, %136 : vector<4x16xf32>
    %c0_45 = arith.constant 0 : index
    %c6_46 = arith.constant 6 : index
    %c0_47 = arith.constant 0 : index
    %138 = vector.load %arg6[%c0_45, %c6_46, %c0_47] : memref<4x8x16xf32, #tpu.memory_space<vmem>>, vector<4x1x16xf32>
    %139 = vector.shape_cast %138 : vector<4x1x16xf32> to vector<4x16xf32>
    %140 = vector.shape_cast %137 : vector<4x16xf32> to vector<4x1x16xf32>
    tpu.vector_store %arg6[%c0_45, %c6_46, %c0_47], %140 {strides = array<i32>} : memref<4x8x16xf32, #tpu.memory_space<vmem>>, vector<4x1x16xf32>,
    %c2 = arith.constant 2 : index
    %c0_48 = arith.constant 0 : index
    %c0_49 = arith.constant 0 : index
    %141 = vector.load %arg1[%c2, %c0_48, %c0_49] : memref<8x4x64xf32, #tpu.memory_space<vmem>>, vector<1x4x64xf32>
    %142 = vector.shape_cast %141 : vector<1x4x64xf32> to vector<4x64xf32>
    %143 = arith.truncf %104 : vector<4x16xf32> to vector<4x16xbf16>
    %cst_50 = arith.constant dense<0.000000e+00> : vector<4x64xf32>
    %144 = tpu.matmul %143, %3, %cst_50 {dimension_numbers = #tpu.dot_dimension_numbers<[1], [0], [0], [1], [0, 0, 1, 1], [], []>} : vector<4x16xbf16>, vector<16x64xbf16>, vector<4x64xf32> -> vector<4x64xf32>
    %145 = arith.addf %142, %144 : vector<4x64xf32>
    %146 = vector.extract_strided_slice %145 {offsets = [0, 0], sizes = [4, 16], strides = [1, 1]} : vector<4x64xf32> to vector<4x16xf32>
    %147 = arith.negf %146 : vector<4x16xf32>
    %148 = math.exp %147 : vector<4x16xf32>
    %cst_51 = arith.constant 1.000000e+00 : f32
    %149 = vector.broadcast %cst_51 : f32 to vector<4x16xf32>
    %150 = arith.addf %149, %148 : vector<4x16xf32>
    %151 = arith.divf %149, %150 : vector<4x16xf32>
    %152 = vector.extract_strided_slice %145 {offsets = [0, 16], sizes = [4, 16], strides = [1, 1]} : vector<4x64xf32> to vector<4x16xf32>
    %153 = arith.negf %152 : vector<4x16xf32>
    %154 = math.exp %153 : vector<4x16xf32>
    %cst_52 = arith.constant 1.000000e+00 : f32
    %155 = vector.broadcast %cst_52 : f32 to vector<4x16xf32>
    %156 = arith.addf %155, %154 : vector<4x16xf32>
    %157 = arith.divf %155, %156 : vector<4x16xf32>
    %158 = vector.extract_strided_slice %145 {offsets = [0, 32], sizes = [4, 16], strides = [1, 1]} : vector<4x64xf32> to vector<4x16xf32>
    %159 = math.tanh %158 : vector<4x16xf32>
    %160 = vector.extract_strided_slice %145 {offsets = [0, 48], sizes = [4, 16], strides = [1, 1]} : vector<4x64xf32> to vector<4x16xf32>
    %161 = arith.negf %160 : vector<4x16xf32>
    %162 = math.exp %161 : vector<4x16xf32>
    %cst_53 = arith.constant 1.000000e+00 : f32
    %163 = vector.broadcast %cst_53 : f32 to vector<4x16xf32>
    %164 = arith.addf %163, %162 : vector<4x16xf32>
    %165 = arith.divf %163, %164 : vector<4x16xf32>
    %166 = arith.mulf %157, %102 : vector<4x16xf32>
    %167 = arith.mulf %151, %159 : vector<4x16xf32>
    %168 = arith.addf %166, %167 : vector<4x16xf32>
    %169 = math.tanh %168 : vector<4x16xf32>
    %170 = arith.mulf %165, %169 : vector<4x16xf32>
    %c0_54 = arith.constant 0 : index
    %c2_55 = arith.constant 2 : index
    %c0_56 = arith.constant 0 : index
    %171 = vector.load %arg5[%c0_54, %c2_55, %c0_56] : memref<4x8x16xf32, #tpu.memory_space<vmem>>, vector<4x1x16xf32>
    %172 = vector.shape_cast %171 : vector<4x1x16xf32> to vector<4x16xf32>
    %173 = vector.shape_cast %170 : vector<4x16xf32> to vector<4x1x16xf32>
    tpu.vector_store %arg5[%c0_54, %c2_55, %c0_56], %173 {strides = array<i32>} : memref<4x8x16xf32, #tpu.memory_space<vmem>>, vector<4x1x16xf32>,
    %c5 = arith.constant 5 : index
    %c0_57 = arith.constant 0 : index
    %c0_58 = arith.constant 0 : index
    %174 = vector.load %arg2[%c5, %c0_57, %c0_58] : memref<8x4x64xf32, #tpu.memory_space<vmem>>, vector<1x4x64xf32>
    %175 = vector.shape_cast %174 : vector<1x4x64xf32> to vector<4x64xf32>
    %176 = arith.truncf %137 : vector<4x16xf32> to vector<4x16xbf16>
    %cst_59 = arith.constant dense<0.000000e+00> : vector<4x64xf32>
    %177 = tpu.matmul %176, %4, %cst_59 {dimension_numbers = #tpu.dot_dimension_numbers<[1], [0], [0], [1], [0, 0, 1, 1], [], []>} : vector<4x16xbf16>, vector<16x64xbf16>, vector<4x64xf32> -> vector<4x64xf32>
    %178 = arith.addf %175, %177 : vector<4x64xf32>
    %179 = vector.extract_strided_slice %178 {offsets = [0, 0], sizes = [4, 16], strides = [1, 1]} : vector<4x64xf32> to vector<4x16xf32>
    %180 = arith.negf %179 : vector<4x16xf32>
    %181 = math.exp %180 : vector<4x16xf32>
    %cst_60 = arith.constant 1.000000e+00 : f32
    %182 = vector.broadcast %cst_60 : f32 to vector<4x16xf32>
    %183 = arith.addf %182, %181 : vector<4x16xf32>
    %184 = arith.divf %182, %183 : vector<4x16xf32>
    %185 = vector.extract_strided_slice %178 {offsets = [0, 16], sizes = [4, 16], strides = [1, 1]} : vector<4x64xf32> to vector<4x16xf32>
    %186 = arith.negf %185 : vector<4x16xf32>
    %187 = math.exp %186 : vector<4x16xf32>
    %cst_61 = arith.constant 1.000000e+00 : f32
    %188 = vector.broadcast %cst_61 : f32 to vector<4x16xf32>
    %189 = arith.addf %188, %187 : vector<4x16xf32>
    %190 = arith.divf %188, %189 : vector<4x16xf32>
    %191 = vector.extract_strided_slice %178 {offsets = [0, 32], sizes = [4, 16], strides = [1, 1]} : vector<4x64xf32> to vector<4x16xf32>
    %192 = math.tanh %191 : vector<4x16xf32>
    %193 = vector.extract_strided_slice %178 {offsets = [0, 48], sizes = [4, 16], strides = [1, 1]} : vector<4x64xf32> to vector<4x16xf32>
    %194 = arith.negf %193 : vector<4x16xf32>
    %195 = math.exp %194 : vector<4x16xf32>
    %cst_62 = arith.constant 1.000000e+00 : f32
    %196 = vector.broadcast %cst_62 : f32 to vector<4x16xf32>
    %197 = arith.addf %196, %195 : vector<4x16xf32>
    %198 = arith.divf %196, %197 : vector<4x16xf32>
    %199 = arith.mulf %190, %135 : vector<4x16xf32>
    %200 = arith.mulf %184, %192 : vector<4x16xf32>
    %201 = arith.addf %199, %200 : vector<4x16xf32>
    %202 = math.tanh %201 : vector<4x16xf32>
    %203 = arith.mulf %198, %202 : vector<4x16xf32>
    %c0_63 = arith.constant 0 : index
    %c5_64 = arith.constant 5 : index
    %c0_65 = arith.constant 0 : index
    %204 = vector.load %arg6[%c0_63, %c5_64, %c0_65] : memref<4x8x16xf32, #tpu.memory_space<vmem>>, vector<4x1x16xf32>
    %205 = vector.shape_cast %204 : vector<4x1x16xf32> to vector<4x16xf32>
    %206 = vector.shape_cast %203 : vector<4x16xf32> to vector<4x1x16xf32>
    tpu.vector_store %arg6[%c0_63, %c5_64, %c0_65], %206 {strides = array<i32>} : memref<4x8x16xf32, #tpu.memory_space<vmem>>, vector<4x1x16xf32>,
    %c3 = arith.constant 3 : index
    %c0_66 = arith.constant 0 : index
    %c0_67 = arith.constant 0 : index
    %207 = vector.load %arg1[%c3, %c0_66, %c0_67] : memref<8x4x64xf32, #tpu.memory_space<vmem>>, vector<1x4x64xf32>
    %208 = vector.shape_cast %207 : vector<1x4x64xf32> to vector<4x64xf32>
    %209 = arith.truncf %170 : vector<4x16xf32> to vector<4x16xbf16>
    %cst_68 = arith.constant dense<0.000000e+00> : vector<4x64xf32>
    %210 = tpu.matmul %209, %3, %cst_68 {dimension_numbers = #tpu.dot_dimension_numbers<[1], [0], [0], [1], [0, 0, 1, 1], [], []>} : vector<4x16xbf16>, vector<16x64xbf16>, vector<4x64xf32> -> vector<4x64xf32>
    %211 = arith.addf %208, %210 : vector<4x64xf32>
    %212 = vector.extract_strided_slice %211 {offsets = [0, 0], sizes = [4, 16], strides = [1, 1]} : vector<4x64xf32> to vector<4x16xf32>
    %213 = arith.negf %212 : vector<4x16xf32>
    %214 = math.exp %213 : vector<4x16xf32>
    %cst_69 = arith.constant 1.000000e+00 : f32
    %215 = vector.broadcast %cst_69 : f32 to vector<4x16xf32>
    %216 = arith.addf %215, %214 : vector<4x16xf32>
    %217 = arith.divf %215, %216 : vector<4x16xf32>
    %218 = vector.extract_strided_slice %211 {offsets = [0, 16], sizes = [4, 16], strides = [1, 1]} : vector<4x64xf32> to vector<4x16xf32>
    %219 = arith.negf %218 : vector<4x16xf32>
    %220 = math.exp %219 : vector<4x16xf32>
    %cst_70 = arith.constant 1.000000e+00 : f32
    %221 = vector.broadcast %cst_70 : f32 to vector<4x16xf32>
    %222 = arith.addf %221, %220 : vector<4x16xf32>
    %223 = arith.divf %221, %222 : vector<4x16xf32>
    %224 = vector.extract_strided_slice %211 {offsets = [0, 32], sizes = [4, 16], strides = [1, 1]} : vector<4x64xf32> to vector<4x16xf32>
    %225 = math.tanh %224 : vector<4x16xf32>
    %226 = vector.extract_strided_slice %211 {offsets = [0, 48], sizes = [4, 16], strides = [1, 1]} : vector<4x64xf32> to vector<4x16xf32>
    %227 = arith.negf %226 : vector<4x16xf32>
    %228 = math.exp %227 : vector<4x16xf32>
    %cst_71 = arith.constant 1.000000e+00 : f32
    %229 = vector.broadcast %cst_71 : f32 to vector<4x16xf32>
    %230 = arith.addf %229, %228 : vector<4x16xf32>
    %231 = arith.divf %229, %230 : vector<4x16xf32>
    %232 = arith.mulf %223, %168 : vector<4x16xf32>
    %233 = arith.mulf %217, %225 : vector<4x16xf32>
    %234 = arith.addf %232, %233 : vector<4x16xf32>
    %235 = math.tanh %234 : vector<4x16xf32>
    %236 = arith.mulf %231, %235 : vector<4x16xf32>
    %c0_72 = arith.constant 0 : index
    %c3_73 = arith.constant 3 : index
    %c0_74 = arith.constant 0 : index
    %237 = vector.load %arg5[%c0_72, %c3_73, %c0_74] : memref<4x8x16xf32, #tpu.memory_space<vmem>>, vector<4x1x16xf32>
    %238 = vector.shape_cast %237 : vector<4x1x16xf32> to vector<4x16xf32>
    %239 = vector.shape_cast %236 : vector<4x16xf32> to vector<4x1x16xf32>
    tpu.vector_store %arg5[%c0_72, %c3_73, %c0_74], %239 {strides = array<i32>} : memref<4x8x16xf32, #tpu.memory_space<vmem>>, vector<4x1x16xf32>,
    %c4 = arith.constant 4 : index
    %c0_75 = arith.constant 0 : index
    %c0_76 = arith.constant 0 : index
    %240 = vector.load %arg2[%c4, %c0_75, %c0_76] : memref<8x4x64xf32, #tpu.memory_space<vmem>>, vector<1x4x64xf32>
    %241 = vector.shape_cast %240 : vector<1x4x64xf32> to vector<4x64xf32>
    %242 = arith.truncf %203 : vector<4x16xf32> to vector<4x16xbf16>
    %cst_77 = arith.constant dense<0.000000e+00> : vector<4x64xf32>
    %243 = tpu.matmul %242, %4, %cst_77 {dimension_numbers = #tpu.dot_dimension_numbers<[1], [0], [0], [1], [0, 0, 1, 1], [], []>} : vector<4x16xbf16>, vector<16x64xbf16>, vector<4x64xf32> -> vector<4x64xf32>
    %244 = arith.addf %241, %243 : vector<4x64xf32>
    %245 = vector.extract_strided_slice %244 {offsets = [0, 0], sizes = [4, 16], strides = [1, 1]} : vector<4x64xf32> to vector<4x16xf32>
    %246 = arith.negf %245 : vector<4x16xf32>
    %247 = math.exp %246 : vector<4x16xf32>
    %cst_78 = arith.constant 1.000000e+00 : f32
    %248 = vector.broadcast %cst_78 : f32 to vector<4x16xf32>
    %249 = arith.addf %248, %247 : vector<4x16xf32>
    %250 = arith.divf %248, %249 : vector<4x16xf32>
    %251 = vector.extract_strided_slice %244 {offsets = [0, 16], sizes = [4, 16], strides = [1, 1]} : vector<4x64xf32> to vector<4x16xf32>
    %252 = arith.negf %251 : vector<4x16xf32>
    %253 = math.exp %252 : vector<4x16xf32>
    %cst_79 = arith.constant 1.000000e+00 : f32
    %254 = vector.broadcast %cst_79 : f32 to vector<4x16xf32>
    %255 = arith.addf %254, %253 : vector<4x16xf32>
    %256 = arith.divf %254, %255 : vector<4x16xf32>
    %257 = vector.extract_strided_slice %244 {offsets = [0, 32], sizes = [4, 16], strides = [1, 1]} : vector<4x64xf32> to vector<4x16xf32>
    %258 = math.tanh %257 : vector<4x16xf32>
    %259 = vector.extract_strided_slice %244 {offsets = [0, 48], sizes = [4, 16], strides = [1, 1]} : vector<4x64xf32> to vector<4x16xf32>
    %260 = arith.negf %259 : vector<4x16xf32>
    %261 = math.exp %260 : vector<4x16xf32>
    %cst_80 = arith.constant 1.000000e+00 : f32
    %262 = vector.broadcast %cst_80 : f32 to vector<4x16xf32>
    %263 = arith.addf %262, %261 : vector<4x16xf32>
    %264 = arith.divf %262, %263 : vector<4x16xf32>
    %265 = arith.mulf %256, %201 : vector<4x16xf32>
    %266 = arith.mulf %250, %258 : vector<4x16xf32>
    %267 = arith.addf %265, %266 : vector<4x16xf32>
    %268 = math.tanh %267 : vector<4x16xf32>
    %269 = arith.mulf %264, %268 : vector<4x16xf32>
    %c0_81 = arith.constant 0 : index
    %c4_82 = arith.constant 4 : index
    %c0_83 = arith.constant 0 : index
    %270 = vector.load %arg6[%c0_81, %c4_82, %c0_83] : memref<4x8x16xf32, #tpu.memory_space<vmem>>, vector<4x1x16xf32>
    %271 = vector.shape_cast %270 : vector<4x1x16xf32> to vector<4x16xf32>
    %272 = vector.shape_cast %269 : vector<4x16xf32> to vector<4x1x16xf32>
    tpu.vector_store %arg6[%c0_81, %c4_82, %c0_83], %272 {strides = array<i32>} : memref<4x8x16xf32, #tpu.memory_space<vmem>>, vector<4x1x16xf32>,
    %c4_84 = arith.constant 4 : index
    %c0_85 = arith.constant 0 : index
    %c0_86 = arith.constant 0 : index
    %273 = vector.load %arg1[%c4_84, %c0_85, %c0_86] : memref<8x4x64xf32, #tpu.memory_space<vmem>>, vector<1x4x64xf32>
    %274 = vector.shape_cast %273 : vector<1x4x64xf32> to vector<4x64xf32>
    %275 = arith.truncf %236 : vector<4x16xf32> to vector<4x16xbf16>
    %cst_87 = arith.constant dense<0.000000e+00> : vector<4x64xf32>
    %276 = tpu.matmul %275, %3, %cst_87 {dimension_numbers = #tpu.dot_dimension_numbers<[1], [0], [0], [1], [0, 0, 1, 1], [], []>} : vector<4x16xbf16>, vector<16x64xbf16>, vector<4x64xf32> -> vector<4x64xf32>
    %277 = arith.addf %274, %276 : vector<4x64xf32>
    %278 = vector.extract_strided_slice %277 {offsets = [0, 0], sizes = [4, 16], strides = [1, 1]} : vector<4x64xf32> to vector<4x16xf32>
    %279 = arith.negf %278 : vector<4x16xf32>
    %280 = math.exp %279 : vector<4x16xf32>
    %cst_88 = arith.constant 1.000000e+00 : f32
    %281 = vector.broadcast %cst_88 : f32 to vector<4x16xf32>
    %282 = arith.addf %281, %280 : vector<4x16xf32>
    %283 = arith.divf %281, %282 : vector<4x16xf32>
    %284 = vector.extract_strided_slice %277 {offsets = [0, 16], sizes = [4, 16], strides = [1, 1]} : vector<4x64xf32> to vector<4x16xf32>
    %285 = arith.negf %284 : vector<4x16xf32>
    %286 = math.exp %285 : vector<4x16xf32>
    %cst_89 = arith.constant 1.000000e+00 : f32
    %287 = vector.broadcast %cst_89 : f32 to vector<4x16xf32>
    %288 = arith.addf %287, %286 : vector<4x16xf32>
    %289 = arith.divf %287, %288 : vector<4x16xf32>
    %290 = vector.extract_strided_slice %277 {offsets = [0, 32], sizes = [4, 16], strides = [1, 1]} : vector<4x64xf32> to vector<4x16xf32>
    %291 = math.tanh %290 : vector<4x16xf32>
    %292 = vector.extract_strided_slice %277 {offsets = [0, 48], sizes = [4, 16], strides = [1, 1]} : vector<4x64xf32> to vector<4x16xf32>
    %293 = arith.negf %292 : vector<4x16xf32>
    %294 = math.exp %293 : vector<4x16xf32>
    %cst_90 = arith.constant 1.000000e+00 : f32
    %295 = vector.broadcast %cst_90 : f32 to vector<4x16xf32>
    %296 = arith.addf %295, %294 : vector<4x16xf32>
    %297 = arith.divf %295, %296 : vector<4x16xf32>
    %298 = arith.mulf %289, %234 : vector<4x16xf32>
    %299 = arith.mulf %283, %291 : vector<4x16xf32>
    %300 = arith.addf %298, %299 : vector<4x16xf32>
    %301 = math.tanh %300 : vector<4x16xf32>
    %302 = arith.mulf %297, %301 : vector<4x16xf32>
    %c0_91 = arith.constant 0 : index
    %c4_92 = arith.constant 4 : index
    %c0_93 = arith.constant 0 : index
    %303 = vector.load %arg5[%c0_91, %c4_92, %c0_93] : memref<4x8x16xf32, #tpu.memory_space<vmem>>, vector<4x1x16xf32>
    %304 = vector.shape_cast %303 : vector<4x1x16xf32> to vector<4x16xf32>
    %305 = vector.shape_cast %302 : vector<4x16xf32> to vector<4x1x16xf32>
    tpu.vector_store %arg5[%c0_91, %c4_92, %c0_93], %305 {strides = array<i32>} : memref<4x8x16xf32, #tpu.memory_space<vmem>>, vector<4x1x16xf32>,
    %c3_94 = arith.constant 3 : index
    %c0_95 = arith.constant 0 : index
    %c0_96 = arith.constant 0 : index
    %306 = vector.load %arg2[%c3_94, %c0_95, %c0_96] : memref<8x4x64xf32, #tpu.memory_space<vmem>>, vector<1x4x64xf32>
    %307 = vector.shape_cast %306 : vector<1x4x64xf32> to vector<4x64xf32>
    %308 = arith.truncf %269 : vector<4x16xf32> to vector<4x16xbf16>
    %cst_97 = arith.constant dense<0.000000e+00> : vector<4x64xf32>
    %309 = tpu.matmul %308, %4, %cst_97 {dimension_numbers = #tpu.dot_dimension_numbers<[1], [0], [0], [1], [0, 0, 1, 1], [], []>} : vector<4x16xbf16>, vector<16x64xbf16>, vector<4x64xf32> -> vector<4x64xf32>
    %310 = arith.addf %307, %309 : vector<4x64xf32>
    %311 = vector.extract_strided_slice %310 {offsets = [0, 0], sizes = [4, 16], strides = [1, 1]} : vector<4x64xf32> to vector<4x16xf32>
    %312 = arith.negf %311 : vector<4x16xf32>
    %313 = math.exp %312 : vector<4x16xf32>
    %cst_98 = arith.constant 1.000000e+00 : f32
    %314 = vector.broadcast %cst_98 : f32 to vector<4x16xf32>
    %315 = arith.addf %314, %313 : vector<4x16xf32>
    %316 = arith.divf %314, %315 : vector<4x16xf32>
    %317 = vector.extract_strided_slice %310 {offsets = [0, 16], sizes = [4, 16], strides = [1, 1]} : vector<4x64xf32> to vector<4x16xf32>
    %318 = arith.negf %317 : vector<4x16xf32>
    %319 = math.exp %318 : vector<4x16xf32>
    %cst_99 = arith.constant 1.000000e+00 : f32
    %320 = vector.broadcast %cst_99 : f32 to vector<4x16xf32>
    %321 = arith.addf %320, %319 : vector<4x16xf32>
    %322 = arith.divf %320, %321 : vector<4x16xf32>
    %323 = vector.extract_strided_slice %310 {offsets = [0, 32], sizes = [4, 16], strides = [1, 1]} : vector<4x64xf32> to vector<4x16xf32>
    %324 = math.tanh %323 : vector<4x16xf32>
    %325 = vector.extract_strided_slice %310 {offsets = [0, 48], sizes = [4, 16], strides = [1, 1]} : vector<4x64xf32> to vector<4x16xf32>
    %326 = arith.negf %325 : vector<4x16xf32>
    %327 = math.exp %326 : vector<4x16xf32>
    %cst_100 = arith.constant 1.000000e+00 : f32
    %328 = vector.broadcast %cst_100 : f32 to vector<4x16xf32>
    %329 = arith.addf %328, %327 : vector<4x16xf32>
    %330 = arith.divf %328, %329 : vector<4x16xf32>
    %331 = arith.mulf %322, %267 : vector<4x16xf32>
    %332 = arith.mulf %316, %324 : vector<4x16xf32>
    %333 = arith.addf %331, %332 : vector<4x16xf32>
    %334 = math.tanh %333 : vector<4x16xf32>
    %335 = arith.mulf %330, %334 : vector<4x16xf32>
    %c0_101 = arith.constant 0 : index
    %c3_102 = arith.constant 3 : index
    %c0_103 = arith.constant 0 : index
    %336 = vector.load %arg6[%c0_101, %c3_102, %c0_103] : memref<4x8x16xf32, #tpu.memory_space<vmem>>, vector<4x1x16xf32>
    %337 = vector.shape_cast %336 : vector<4x1x16xf32> to vector<4x16xf32>
    %338 = vector.shape_cast %335 : vector<4x16xf32> to vector<4x1x16xf32>
    tpu.vector_store %arg6[%c0_101, %c3_102, %c0_103], %338 {strides = array<i32>} : memref<4x8x16xf32, #tpu.memory_space<vmem>>, vector<4x1x16xf32>,
    %c5_104 = arith.constant 5 : index
    %c0_105 = arith.constant 0 : index
    %c0_106 = arith.constant 0 : index
    %339 = vector.load %arg1[%c5_104, %c0_105, %c0_106] : memref<8x4x64xf32, #tpu.memory_space<vmem>>, vector<1x4x64xf32>
    %340 = vector.shape_cast %339 : vector<1x4x64xf32> to vector<4x64xf32>
    %341 = arith.truncf %302 : vector<4x16xf32> to vector<4x16xbf16>
    %cst_107 = arith.constant dense<0.000000e+00> : vector<4x64xf32>
    %342 = tpu.matmul %341, %3, %cst_107 {dimension_numbers = #tpu.dot_dimension_numbers<[1], [0], [0], [1], [0, 0, 1, 1], [], []>} : vector<4x16xbf16>, vector<16x64xbf16>, vector<4x64xf32> -> vector<4x64xf32>
    %343 = arith.addf %340, %342 : vector<4x64xf32>
    %344 = vector.extract_strided_slice %343 {offsets = [0, 0], sizes = [4, 16], strides = [1, 1]} : vector<4x64xf32> to vector<4x16xf32>
    %345 = arith.negf %344 : vector<4x16xf32>
    %346 = math.exp %345 : vector<4x16xf32>
    %cst_108 = arith.constant 1.000000e+00 : f32
    %347 = vector.broadcast %cst_108 : f32 to vector<4x16xf32>
    %348 = arith.addf %347, %346 : vector<4x16xf32>
    %349 = arith.divf %347, %348 : vector<4x16xf32>
    %350 = vector.extract_strided_slice %343 {offsets = [0, 16], sizes = [4, 16], strides = [1, 1]} : vector<4x64xf32> to vector<4x16xf32>
    %351 = arith.negf %350 : vector<4x16xf32>
    %352 = math.exp %351 : vector<4x16xf32>
    %cst_109 = arith.constant 1.000000e+00 : f32
    %353 = vector.broadcast %cst_109 : f32 to vector<4x16xf32>
    %354 = arith.addf %353, %352 : vector<4x16xf32>
    %355 = arith.divf %353, %354 : vector<4x16xf32>
    %356 = vector.extract_strided_slice %343 {offsets = [0, 32], sizes = [4, 16], strides = [1, 1]} : vector<4x64xf32> to vector<4x16xf32>
    %357 = math.tanh %356 : vector<4x16xf32>
    %358 = vector.extract_strided_slice %343 {offsets = [0, 48], sizes = [4, 16], strides = [1, 1]} : vector<4x64xf32> to vector<4x16xf32>
    %359 = arith.negf %358 : vector<4x16xf32>
    %360 = math.exp %359 : vector<4x16xf32>
    %cst_110 = arith.constant 1.000000e+00 : f32
    %361 = vector.broadcast %cst_110 : f32 to vector<4x16xf32>
    %362 = arith.addf %361, %360 : vector<4x16xf32>
    %363 = arith.divf %361, %362 : vector<4x16xf32>
    %364 = arith.mulf %355, %300 : vector<4x16xf32>
    %365 = arith.mulf %349, %357 : vector<4x16xf32>
    %366 = arith.addf %364, %365 : vector<4x16xf32>
    %367 = math.tanh %366 : vector<4x16xf32>
    %368 = arith.mulf %363, %367 : vector<4x16xf32>
    %c0_111 = arith.constant 0 : index
    %c5_112 = arith.constant 5 : index
    %c0_113 = arith.constant 0 : index
    %369 = vector.load %arg5[%c0_111, %c5_112, %c0_113] : memref<4x8x16xf32, #tpu.memory_space<vmem>>, vector<4x1x16xf32>
    %370 = vector.shape_cast %369 : vector<4x1x16xf32> to vector<4x16xf32>
    %371 = vector.shape_cast %368 : vector<4x16xf32> to vector<4x1x16xf32>
    tpu.vector_store %arg5[%c0_111, %c5_112, %c0_113], %371 {strides = array<i32>} : memref<4x8x16xf32, #tpu.memory_space<vmem>>, vector<4x1x16xf32>,
    %c2_114 = arith.constant 2 : index
    %c0_115 = arith.constant 0 : index
    %c0_116 = arith.constant 0 : index
    %372 = vector.load %arg2[%c2_114, %c0_115, %c0_116] : memref<8x4x64xf32, #tpu.memory_space<vmem>>, vector<1x4x64xf32>
    %373 = vector.shape_cast %372 : vector<1x4x64xf32> to vector<4x64xf32>
    %374 = arith.truncf %335 : vector<4x16xf32> to vector<4x16xbf16>
    %cst_117 = arith.constant dense<0.000000e+00> : vector<4x64xf32>
    %375 = tpu.matmul %374, %4, %cst_117 {dimension_numbers = #tpu.dot_dimension_numbers<[1], [0], [0], [1], [0, 0, 1, 1], [], []>} : vector<4x16xbf16>, vector<16x64xbf16>, vector<4x64xf32> -> vector<4x64xf32>
    %376 = arith.addf %373, %375 : vector<4x64xf32>
    %377 = vector.extract_strided_slice %376 {offsets = [0, 0], sizes = [4, 16], strides = [1, 1]} : vector<4x64xf32> to vector<4x16xf32>
    %378 = arith.negf %377 : vector<4x16xf32>
    %379 = math.exp %378 : vector<4x16xf32>
    %cst_118 = arith.constant 1.000000e+00 : f32
    %380 = vector.broadcast %cst_118 : f32 to vector<4x16xf32>
    %381 = arith.addf %380, %379 : vector<4x16xf32>
    %382 = arith.divf %380, %381 : vector<4x16xf32>
    %383 = vector.extract_strided_slice %376 {offsets = [0, 16], sizes = [4, 16], strides = [1, 1]} : vector<4x64xf32> to vector<4x16xf32>
    %384 = arith.negf %383 : vector<4x16xf32>
    %385 = math.exp %384 : vector<4x16xf32>
    %cst_119 = arith.constant 1.000000e+00 : f32
    %386 = vector.broadcast %cst_119 : f32 to vector<4x16xf32>
    %387 = arith.addf %386, %385 : vector<4x16xf32>
    %388 = arith.divf %386, %387 : vector<4x16xf32>
    %389 = vector.extract_strided_slice %376 {offsets = [0, 32], sizes = [4, 16], strides = [1, 1]} : vector<4x64xf32> to vector<4x16xf32>
    %390 = math.tanh %389 : vector<4x16xf32>
    %391 = vector.extract_strided_slice %376 {offsets = [0, 48], sizes = [4, 16], strides = [1, 1]} : vector<4x64xf32> to vector<4x16xf32>
    %392 = arith.negf %391 : vector<4x16xf32>
    %393 = math.exp %392 : vector<4x16xf32>
    %cst_120 = arith.constant 1.000000e+00 : f32
    %394 = vector.broadcast %cst_120 : f32 to vector<4x16xf32>
    %395 = arith.addf %394, %393 : vector<4x16xf32>
    %396 = arith.divf %394, %395 : vector<4x16xf32>
    %397 = arith.mulf %388, %333 : vector<4x16xf32>
    %398 = arith.mulf %382, %390 : vector<4x16xf32>
    %399 = arith.addf %397, %398 : vector<4x16xf32>
    %400 = math.tanh %399 : vector<4x16xf32>
    %401 = arith.mulf %396, %400 : vector<4x16xf32>
    %c0_121 = arith.constant 0 : index
    %c2_122 = arith.constant 2 : index
    %c0_123 = arith.constant 0 : index
    %402 = vector.load %arg6[%c0_121, %c2_122, %c0_123] : memref<4x8x16xf32, #tpu.memory_space<vmem>>, vector<4x1x16xf32>
    %403 = vector.shape_cast %402 : vector<4x1x16xf32> to vector<4x16xf32>
    %404 = vector.shape_cast %401 : vector<4x16xf32> to vector<4x1x16xf32>
    tpu.vector_store %arg6[%c0_121, %c2_122, %c0_123], %404 {strides = array<i32>} : memref<4x8x16xf32, #tpu.memory_space<vmem>>, vector<4x1x16xf32>,
    %c6_124 = arith.constant 6 : index
    %c0_125 = arith.constant 0 : index
    %c0_126 = arith.constant 0 : index
    %405 = vector.load %arg1[%c6_124, %c0_125, %c0_126] : memref<8x4x64xf32, #tpu.memory_space<vmem>>, vector<1x4x64xf32>
    %406 = vector.shape_cast %405 : vector<1x4x64xf32> to vector<4x64xf32>
    %407 = arith.truncf %368 : vector<4x16xf32> to vector<4x16xbf16>
    %cst_127 = arith.constant dense<0.000000e+00> : vector<4x64xf32>
    %408 = tpu.matmul %407, %3, %cst_127 {dimension_numbers = #tpu.dot_dimension_numbers<[1], [0], [0], [1], [0, 0, 1, 1], [], []>} : vector<4x16xbf16>, vector<16x64xbf16>, vector<4x64xf32> -> vector<4x64xf32>
    %409 = arith.addf %406, %408 : vector<4x64xf32>
    %410 = vector.extract_strided_slice %409 {offsets = [0, 0], sizes = [4, 16], strides = [1, 1]} : vector<4x64xf32> to vector<4x16xf32>
    %411 = arith.negf %410 : vector<4x16xf32>
    %412 = math.exp %411 : vector<4x16xf32>
    %cst_128 = arith.constant 1.000000e+00 : f32
    %413 = vector.broadcast %cst_128 : f32 to vector<4x16xf32>
    %414 = arith.addf %413, %412 : vector<4x16xf32>
    %415 = arith.divf %413, %414 : vector<4x16xf32>
    %416 = vector.extract_strided_slice %409 {offsets = [0, 16], sizes = [4, 16], strides = [1, 1]} : vector<4x64xf32> to vector<4x16xf32>
    %417 = arith.negf %416 : vector<4x16xf32>
    %418 = math.exp %417 : vector<4x16xf32>
    %cst_129 = arith.constant 1.000000e+00 : f32
    %419 = vector.broadcast %cst_129 : f32 to vector<4x16xf32>
    %420 = arith.addf %419, %418 : vector<4x16xf32>
    %421 = arith.divf %419, %420 : vector<4x16xf32>
    %422 = vector.extract_strided_slice %409 {offsets = [0, 32], sizes = [4, 16], strides = [1, 1]} : vector<4x64xf32> to vector<4x16xf32>
    %423 = math.tanh %422 : vector<4x16xf32>
    %424 = vector.extract_strided_slice %409 {offsets = [0, 48], sizes = [4, 16], strides = [1, 1]} : vector<4x64xf32> to vector<4x16xf32>
    %425 = arith.negf %424 : vector<4x16xf32>
    %426 = math.exp %425 : vector<4x16xf32>
    %cst_130 = arith.constant 1.000000e+00 : f32
    %427 = vector.broadcast %cst_130 : f32 to vector<4x16xf32>
    %428 = arith.addf %427, %426 : vector<4x16xf32>
    %429 = arith.divf %427, %428 : vector<4x16xf32>
    %430 = arith.mulf %421, %366 : vector<4x16xf32>
    %431 = arith.mulf %415, %423 : vector<4x16xf32>
    %432 = arith.addf %430, %431 : vector<4x16xf32>
    %433 = math.tanh %432 : vector<4x16xf32>
    %434 = arith.mulf %429, %433 : vector<4x16xf32>
    %c0_131 = arith.constant 0 : index
    %c6_132 = arith.constant 6 : index
    %c0_133 = arith.constant 0 : index
    %435 = vector.load %arg5[%c0_131, %c6_132, %c0_133] : memref<4x8x16xf32, #tpu.memory_space<vmem>>, vector<4x1x16xf32>
    %436 = vector.shape_cast %435 : vector<4x1x16xf32> to vector<4x16xf32>
    %437 = vector.shape_cast %434 : vector<4x16xf32> to vector<4x1x16xf32>
    tpu.vector_store %arg5[%c0_131, %c6_132, %c0_133], %437 {strides = array<i32>} : memref<4x8x16xf32, #tpu.memory_space<vmem>>, vector<4x1x16xf32>,
    %c1_134 = arith.constant 1 : index
    %c0_135 = arith.constant 0 : index
    %c0_136 = arith.constant 0 : index
    %438 = vector.load %arg2[%c1_134, %c0_135, %c0_136] : memref<8x4x64xf32, #tpu.memory_space<vmem>>, vector<1x4x64xf32>
    %439 = vector.shape_cast %438 : vector<1x4x64xf32> to vector<4x64xf32>
    %440 = arith.truncf %401 : vector<4x16xf32> to vector<4x16xbf16>
    %cst_137 = arith.constant dense<0.000000e+00> : vector<4x64xf32>
    %441 = tpu.matmul %440, %4, %cst_137 {dimension_numbers = #tpu.dot_dimension_numbers<[1], [0], [0], [1], [0, 0, 1, 1], [], []>} : vector<4x16xbf16>, vector<16x64xbf16>, vector<4x64xf32> -> vector<4x64xf32>
    %442 = arith.addf %439, %441 : vector<4x64xf32>
    %443 = vector.extract_strided_slice %442 {offsets = [0, 0], sizes = [4, 16], strides = [1, 1]} : vector<4x64xf32> to vector<4x16xf32>
    %444 = arith.negf %443 : vector<4x16xf32>
    %445 = math.exp %444 : vector<4x16xf32>
    %cst_138 = arith.constant 1.000000e+00 : f32
    %446 = vector.broadcast %cst_138 : f32 to vector<4x16xf32>
    %447 = arith.addf %446, %445 : vector<4x16xf32>
    %448 = arith.divf %446, %447 : vector<4x16xf32>
    %449 = vector.extract_strided_slice %442 {offsets = [0, 16], sizes = [4, 16], strides = [1, 1]} : vector<4x64xf32> to vector<4x16xf32>
    %450 = arith.negf %449 : vector<4x16xf32>
    %451 = math.exp %450 : vector<4x16xf32>
    %cst_139 = arith.constant 1.000000e+00 : f32
    %452 = vector.broadcast %cst_139 : f32 to vector<4x16xf32>
    %453 = arith.addf %452, %451 : vector<4x16xf32>
    %454 = arith.divf %452, %453 : vector<4x16xf32>
    %455 = vector.extract_strided_slice %442 {offsets = [0, 32], sizes = [4, 16], strides = [1, 1]} : vector<4x64xf32> to vector<4x16xf32>
    %456 = math.tanh %455 : vector<4x16xf32>
    %457 = vector.extract_strided_slice %442 {offsets = [0, 48], sizes = [4, 16], strides = [1, 1]} : vector<4x64xf32> to vector<4x16xf32>
    %458 = arith.negf %457 : vector<4x16xf32>
    %459 = math.exp %458 : vector<4x16xf32>
    %cst_140 = arith.constant 1.000000e+00 : f32
    %460 = vector.broadcast %cst_140 : f32 to vector<4x16xf32>
    %461 = arith.addf %460, %459 : vector<4x16xf32>
    %462 = arith.divf %460, %461 : vector<4x16xf32>
    %463 = arith.mulf %454, %399 : vector<4x16xf32>
    %464 = arith.mulf %448, %456 : vector<4x16xf32>
    %465 = arith.addf %463, %464 : vector<4x16xf32>
    %466 = math.tanh %465 : vector<4x16xf32>
    %467 = arith.mulf %462, %466 : vector<4x16xf32>
    %c0_141 = arith.constant 0 : index
    %c1_142 = arith.constant 1 : index
    %c0_143 = arith.constant 0 : index
    %468 = vector.load %arg6[%c0_141, %c1_142, %c0_143] : memref<4x8x16xf32, #tpu.memory_space<vmem>>, vector<4x1x16xf32>
    %469 = vector.shape_cast %468 : vector<4x1x16xf32> to vector<4x16xf32>
    %470 = vector.shape_cast %467 : vector<4x16xf32> to vector<4x1x16xf32>
    tpu.vector_store %arg6[%c0_141, %c1_142, %c0_143], %470 {strides = array<i32>} : memref<4x8x16xf32, #tpu.memory_space<vmem>>, vector<4x1x16xf32>,
    %c7_144 = arith.constant 7 : index
    %c0_145 = arith.constant 0 : index
    %c0_146 = arith.constant 0 : index
    %471 = vector.load %arg1[%c7_144, %c0_145, %c0_146] : memref<8x4x64xf32, #tpu.memory_space<vmem>>, vector<1x4x64xf32>
    %472 = vector.shape_cast %471 : vector<1x4x64xf32> to vector<4x64xf32>
    %473 = arith.truncf %434 : vector<4x16xf32> to vector<4x16xbf16>
    %cst_147 = arith.constant dense<0.000000e+00> : vector<4x64xf32>
    %474 = tpu.matmul %473, %3, %cst_147 {dimension_numbers = #tpu.dot_dimension_numbers<[1], [0], [0], [1], [0, 0, 1, 1], [], []>} : vector<4x16xbf16>, vector<16x64xbf16>, vector<4x64xf32> -> vector<4x64xf32>
    %475 = arith.addf %472, %474 : vector<4x64xf32>
    %476 = vector.extract_strided_slice %475 {offsets = [0, 0], sizes = [4, 16], strides = [1, 1]} : vector<4x64xf32> to vector<4x16xf32>
    %477 = arith.negf %476 : vector<4x16xf32>
    %478 = math.exp %477 : vector<4x16xf32>
    %cst_148 = arith.constant 1.000000e+00 : f32
    %479 = vector.broadcast %cst_148 : f32 to vector<4x16xf32>
    %480 = arith.addf %479, %478 : vector<4x16xf32>
    %481 = arith.divf %479, %480 : vector<4x16xf32>
    %482 = vector.extract_strided_slice %475 {offsets = [0, 16], sizes = [4, 16], strides = [1, 1]} : vector<4x64xf32> to vector<4x16xf32>
    %483 = arith.negf %482 : vector<4x16xf32>
    %484 = math.exp %483 : vector<4x16xf32>
    %cst_149 = arith.constant 1.000000e+00 : f32
    %485 = vector.broadcast %cst_149 : f32 to vector<4x16xf32>
    %486 = arith.addf %485, %484 : vector<4x16xf32>
    %487 = arith.divf %485, %486 : vector<4x16xf32>
    %488 = vector.extract_strided_slice %475 {offsets = [0, 32], sizes = [4, 16], strides = [1, 1]} : vector<4x64xf32> to vector<4x16xf32>
    %489 = math.tanh %488 : vector<4x16xf32>
    %490 = vector.extract_strided_slice %475 {offsets = [0, 48], sizes = [4, 16], strides = [1, 1]} : vector<4x64xf32> to vector<4x16xf32>
    %491 = arith.negf %490 : vector<4x16xf32>
    %492 = math.exp %491 : vector<4x16xf32>
    %cst_150 = arith.constant 1.000000e+00 : f32
    %493 = vector.broadcast %cst_150 : f32 to vector<4x16xf32>
    %494 = arith.addf %493, %492 : vector<4x16xf32>
    %495 = arith.divf %493, %494 : vector<4x16xf32>
    %496 = arith.mulf %487, %432 : vector<4x16xf32>
    %497 = arith.mulf %481, %489 : vector<4x16xf32>
    %498 = arith.addf %496, %497 : vector<4x16xf32>
    %499 = math.tanh %498 : vector<4x16xf32>
    %500 = arith.mulf %495, %499 : vector<4x16xf32>
    %c0_151 = arith.constant 0 : index
    %c7_152 = arith.constant 7 : index
    %c0_153 = arith.constant 0 : index
    %501 = vector.load %arg5[%c0_151, %c7_152, %c0_153] : memref<4x8x16xf32, #tpu.memory_space<vmem>>, vector<4x1x16xf32>
    %502 = vector.shape_cast %501 : vector<4x1x16xf32> to vector<4x16xf32>
    %503 = vector.shape_cast %500 : vector<4x16xf32> to vector<4x1x16xf32>
    tpu.vector_store %arg5[%c0_151, %c7_152, %c0_153], %503 {strides = array<i32>} : memref<4x8x16xf32, #tpu.memory_space<vmem>>, vector<4x1x16xf32>,
    %c0_154 = arith.constant 0 : index
    %c0_155 = arith.constant 0 : index
    %c0_156 = arith.constant 0 : index
    %504 = vector.load %arg2[%c0_154, %c0_155, %c0_156] : memref<8x4x64xf32, #tpu.memory_space<vmem>>, vector<1x4x64xf32>
    %505 = vector.shape_cast %504 : vector<1x4x64xf32> to vector<4x64xf32>
    %506 = arith.truncf %467 : vector<4x16xf32> to vector<4x16xbf16>
    %cst_157 = arith.constant dense<0.000000e+00> : vector<4x64xf32>
    %507 = tpu.matmul %506, %4, %cst_157 {dimension_numbers = #tpu.dot_dimension_numbers<[1], [0], [0], [1], [0, 0, 1, 1], [], []>} : vector<4x16xbf16>, vector<16x64xbf16>, vector<4x64xf32> -> vector<4x64xf32>
    %508 = arith.addf %505, %507 : vector<4x64xf32>
    %509 = vector.extract_strided_slice %508 {offsets = [0, 0], sizes = [4, 16], strides = [1, 1]} : vector<4x64xf32> to vector<4x16xf32>
    %510 = arith.negf %509 : vector<4x16xf32>
    %511 = math.exp %510 : vector<4x16xf32>
    %cst_158 = arith.constant 1.000000e+00 : f32
    %512 = vector.broadcast %cst_158 : f32 to vector<4x16xf32>
    %513 = arith.addf %512, %511 : vector<4x16xf32>
    %514 = arith.divf %512, %513 : vector<4x16xf32>
    %515 = vector.extract_strided_slice %508 {offsets = [0, 16], sizes = [4, 16], strides = [1, 1]} : vector<4x64xf32> to vector<4x16xf32>
    %516 = arith.negf %515 : vector<4x16xf32>
    %517 = math.exp %516 : vector<4x16xf32>
    %cst_159 = arith.constant 1.000000e+00 : f32
    %518 = vector.broadcast %cst_159 : f32 to vector<4x16xf32>
    %519 = arith.addf %518, %517 : vector<4x16xf32>
    %520 = arith.divf %518, %519 : vector<4x16xf32>
    %521 = vector.extract_strided_slice %508 {offsets = [0, 32], sizes = [4, 16], strides = [1, 1]} : vector<4x64xf32> to vector<4x16xf32>
    %522 = math.tanh %521 : vector<4x16xf32>
    %523 = vector.extract_strided_slice %508 {offsets = [0, 48], sizes = [4, 16], strides = [1, 1]} : vector<4x64xf32> to vector<4x16xf32>
    %524 = arith.negf %523 : vector<4x16xf32>
    %525 = math.exp %524 : vector<4x16xf32>
    %cst_160 = arith.constant 1.000000e+00 : f32
    %526 = vector.broadcast %cst_160 : f32 to vector<4x16xf32>
    %527 = arith.addf %526, %525 : vector<4x16xf32>
    %528 = arith.divf %526, %527 : vector<4x16xf32>
    %529 = arith.mulf %520, %465 : vector<4x16xf32>
    %530 = arith.mulf %514, %522 : vector<4x16xf32>
    %531 = arith.addf %529, %530 : vector<4x16xf32>
    %532 = math.tanh %531 : vector<4x16xf32>
    %533 = arith.mulf %528, %532 : vector<4x16xf32>
    %c0_161 = arith.constant 0 : index
    %c0_162 = arith.constant 0 : index
    %c0_163 = arith.constant 0 : index
    %534 = vector.load %arg6[%c0_161, %c0_162, %c0_163] : memref<4x8x16xf32, #tpu.memory_space<vmem>>, vector<4x1x16xf32>
    %535 = vector.shape_cast %534 : vector<4x1x16xf32> to vector<4x16xf32>
    %536 = vector.shape_cast %533 : vector<4x16xf32> to vector<4x1x16xf32>
    tpu.vector_store %arg6[%c0_161, %c0_162, %c0_163], %536 {strides = array<i32>} : memref<4x8x16xf32, #tpu.memory_space<vmem>>, vector<4x1x16xf32>,
    %c0_164 = arith.constant 0 : index
    %c0_165 = arith.constant 0 : index
    %537 = vector.load %arg7[%c0_164, %c0_165] : memref<4x16xf32, #tpu.memory_space<vmem>>, vector<4x16xf32>
    tpu.vector_store %arg7[%c0_164, %c0_165], %500 {strides = array<i32>} : memref<4x16xf32, #tpu.memory_space<vmem>>, vector<4x16xf32>,
    %c0_166 = arith.constant 0 : index
    %c0_167 = arith.constant 0 : index
    %538 = vector.load %arg8[%c0_166, %c0_167] : memref<4x16xf32, #tpu.memory_space<vmem>>, vector<4x16xf32>
    tpu.vector_store %arg8[%c0_166, %c0_167], %498 {strides = array<i32>} : memref<4x16xf32, #tpu.memory_space<vmem>>, vector<4x16xf32>,
    %c0_168 = arith.constant 0 : index
    %c0_169 = arith.constant 0 : index
    %539 = vector.load %arg9[%c0_168, %c0_169] : memref<4x16xf32, #tpu.memory_space<vmem>>, vector<4x16xf32>
    tpu.vector_store %arg9[%c0_168, %c0_169], %533 {strides = array<i32>} : memref<4x16xf32, #tpu.memory_space<vmem>>, vector<4x16xf32>,
    %c0_170 = arith.constant 0 : index
    %c0_171 = arith.constant 0 : index
    %540 = vector.load %arg10[%c0_170, %c0_171] : memref<4x16xf32, #tpu.memory_space<vmem>>, vector<4x16xf32>
    tpu.vector_store %arg10[%c0_170, %c0_171], %531 {strides = array<i32>} : memref<4x16xf32, #tpu.memory_space<vmem>>, vector<4x16xf32>,
    return
  }
  func.func @transform_0(%arg0: i32) -> (i32, i32, i32) {
    %c0_i32 = arith.constant 0 : i32
    %c0_i32_0 = arith.constant 0 : i32
    %c0_i32_1 = arith.constant 0 : i32
    return %arg0, %c0_i32, %c0_i32_0 : i32, i32, i32
  }
  func.func @transform_1(%arg0: i32) -> (i32, i32, i32) {
    %c1_i32 = arith.constant 1 : i32
    %0 = arith.subi %c1_i32, %arg0 : i32
    %c0_i32 = arith.constant 0 : i32
    %c0_i32_0 = arith.constant 0 : i32
    %c0_i32_1 = arith.constant 0 : i32
    return %0, %c0_i32, %c0_i32_0 : i32, i32, i32
  }
  func.func @transform_2(%arg0: i32) -> (i32, i32) {
    %c0_i32 = arith.constant 0 : i32
    %c0_i32_0 = arith.constant 0 : i32
    %c0_i32_1 = arith.constant 0 : i32
    return %c0_i32, %c0_i32_0 : i32, i32
  }
  func.func @transform_3(%arg0: i32) -> (i32, i32) {
    %c0_i32 = arith.constant 0 : i32
    %c0_i32_0 = arith.constant 0 : i32
    %c0_i32_1 = arith.constant 0 : i32
    return %c0_i32, %c0_i32_0 : i32, i32
  }
  func.func @transform_4(%arg0: i32) -> (i32, i32, i32) {
    %c0_i32 = arith.constant 0 : i32
    %c0_i32_0 = arith.constant 0 : i32
    %c0_i32_1 = arith.constant 0 : i32
    return %c0_i32, %arg0, %c0_i32_0 : i32, i32, i32
  }
  func.func @transform_5(%arg0: i32) -> (i32, i32, i32) {
    %c1_i32 = arith.constant 1 : i32
    %0 = arith.subi %c1_i32, %arg0 : i32
    %c0_i32 = arith.constant 0 : i32
    %c0_i32_0 = arith.constant 0 : i32
    %c0_i32_1 = arith.constant 0 : i32
    return %c0_i32, %0, %c0_i32_0 : i32, i32, i32
  }
}

module attributes {stable_mosaic.version = 11 : i64} {
  func.func @_esim_kernel(%arg0: i32, %arg1: memref<2x16x16xf32, #tpu.memory_space<vmem>>, %arg2: memref<2x16x16xf32, #tpu.memory_space<vmem>>, %arg3: memref<2x16x16xf32, #tpu.memory_space<vmem>>, %arg4: memref<2x16x16xf32, #tpu.memory_space<vmem>>, %arg5: memref<2x512xf32, #tpu.memory_space<vmem>>) attributes {dimension_semantics = [#tpu.dimension_semantics<parallel>], iteration_bounds = array<i64: 1>, scalar_prefetch = 0 : i64, scratch_operands = 0 : i64, tpu.core_type = #tpu.core_type<tc>, window_params = [{transform_indices = @transform_0, window_bounds = array<i64: 2, 16, 16>}, {transform_indices = @transform_1, window_bounds = array<i64: 2, 16, 16>}, {transform_indices = @transform_2, window_bounds = array<i64: 2, 16, 16>}, {transform_indices = @transform_3, window_bounds = array<i64: 2, 16, 16>}, {transform_indices = @transform_4, window_bounds = array<i64: 2, 512>}]} {
    %c0 = arith.constant 0 : index
    %c0_0 = arith.constant 0 : index
    %c0_1 = arith.constant 0 : index
    %0 = vector.load %arg1[%c0, %c0_0, %c0_1] : memref<2x16x16xf32, #tpu.memory_space<vmem>>, vector<2x16x16xf32>
    %c0_2 = arith.constant 0 : index
    %c0_3 = arith.constant 0 : index
    %c0_4 = arith.constant 0 : index
    %1 = vector.load %arg2[%c0_2, %c0_3, %c0_4] : memref<2x16x16xf32, #tpu.memory_space<vmem>>, vector<2x16x16xf32>
    %2 = tpu.concatenate %0, %1 in 2 : vector<2x16x16xf32>, vector<2x16x16xf32> -> vector<2x16x32xf32>
    %c0_5 = arith.constant 0 : index
    %c0_6 = arith.constant 0 : index
    %c0_7 = arith.constant 0 : index
    %3 = vector.load %arg3[%c0_5, %c0_6, %c0_7] : memref<2x16x16xf32, #tpu.memory_space<vmem>>, vector<2x16x16xf32>
    %c0_8 = arith.constant 0 : index
    %c0_9 = arith.constant 0 : index
    %c0_10 = arith.constant 0 : index
    %4 = vector.load %arg4[%c0_8, %c0_9, %c0_10] : memref<2x16x16xf32, #tpu.memory_space<vmem>>, vector<2x16x16xf32>
    %5 = tpu.concatenate %3, %4 in 2 : vector<2x16x16xf32>, vector<2x16x16xf32> -> vector<2x16x32xf32>
    %6 = vector.extract_strided_slice %2 {offsets = [0, 0, 0], sizes = [1, 16, 32], strides = [1, 1, 1]} : vector<2x16x32xf32> to vector<1x16x32xf32>
    %7 = vector.shape_cast %6 : vector<1x16x32xf32> to vector<16x32xf32>
    %8 = vector.extract_strided_slice %5 {offsets = [0, 0, 0], sizes = [1, 16, 32], strides = [1, 1, 1]} : vector<2x16x32xf32> to vector<1x16x32xf32>
    %9 = vector.shape_cast %8 : vector<1x16x32xf32> to vector<16x32xf32>
    %10 = arith.truncf %7 : vector<16x32xf32> to vector<16x32xbf16>
    %11 = arith.truncf %9 : vector<16x32xf32> to vector<16x32xbf16>
    %cst = arith.constant dense<0.000000e+00> : vector<16x16xf32>
    %12 = tpu.matmul %10, %11, %cst {dimension_numbers = #tpu.dot_dimension_numbers<[1], [1], [0], [0], [0, 0, 1, 0], [], []>} : vector<16x32xbf16>, vector<16x32xbf16>, vector<16x16xf32> -> vector<16x16xf32>
    %cst_11 = arith.constant dense<0xFF800000> : vector<16xf32>
    %13 = vector.multi_reduction <maximumf>, %12, %cst_11 [1] : vector<16x16xf32> to vector<16xf32>
    %cst_12 = arith.constant 0xFF800000 : f32
    %14 = vector.broadcast %cst_12 : f32 to vector<16xf32>
    %15 = arith.maximumf %14, %13 : vector<16xf32>
    %16 = vector.shape_cast %15 : vector<16xf32> to vector<16x1xf32>
    %17 = vector.broadcast %16 : vector<16x1xf32> to vector<16x16xf32>
    %18 = arith.subf %12, %17 : vector<16x16xf32>
    %19 = math.exp %18 : vector<16x16xf32>
    %cst_13 = arith.constant dense<0.000000e+00> : vector<16xf32>
    %20 = vector.multi_reduction <add>, %19, %cst_13 [1] : vector<16x16xf32> to vector<16xf32>
    %21 = vector.shape_cast %20 : vector<16xf32> to vector<16x1xf32>
    %22 = vector.broadcast %21 : vector<16x1xf32> to vector<16x16xf32>
    %23 = arith.divf %19, %22 : vector<16x16xf32>
    %cst_14 = arith.constant dense<0xFF800000> : vector<16xf32>
    %24 = vector.multi_reduction <maximumf>, %12, %cst_14 [0] : vector<16x16xf32> to vector<16xf32>
    %cst_15 = arith.constant 0xFF800000 : f32
    %25 = vector.broadcast %cst_15 : f32 to vector<16xf32>
    %26 = arith.maximumf %25, %24 : vector<16xf32>
    %27 = vector.shape_cast %26 : vector<16xf32> to vector<1x16xf32>
    %28 = vector.broadcast %27 : vector<1x16xf32> to vector<16x16xf32>
    %29 = arith.subf %12, %28 : vector<16x16xf32>
    %30 = math.exp %29 : vector<16x16xf32>
    %cst_16 = arith.constant dense<0.000000e+00> : vector<16xf32>
    %31 = vector.multi_reduction <add>, %30, %cst_16 [0] : vector<16x16xf32> to vector<16xf32>
    %32 = vector.shape_cast %31 : vector<16xf32> to vector<1x16xf32>
    %33 = vector.broadcast %32 : vector<1x16xf32> to vector<16x16xf32>
    %34 = arith.divf %30, %33 : vector<16x16xf32>
    %35 = arith.truncf %23 : vector<16x16xf32> to vector<16x16xbf16>
    %cst_17 = arith.constant dense<0.000000e+00> : vector<16x32xf32>
    %36 = tpu.matmul %35, %11, %cst_17 {dimension_numbers = #tpu.dot_dimension_numbers<[1], [0], [0], [1], [0, 0, 1, 1], [], []>} : vector<16x16xbf16>, vector<16x32xbf16>, vector<16x32xf32> -> vector<16x32xf32>
    %37 = arith.truncf %34 : vector<16x16xf32> to vector<16x16xbf16>
    %cst_18 = arith.constant dense<0.000000e+00> : vector<16x32xf32>
    %38 = tpu.matmul %37, %10, %cst_18 {dimension_numbers = #tpu.dot_dimension_numbers<[0], [0], [1], [1], [0, 1, 1, 1], [], []>} : vector<16x16xbf16>, vector<16x32xbf16>, vector<16x32xf32> -> vector<16x32xf32>
    %39 = arith.subf %7, %36 : vector<16x32xf32>
    %40 = arith.mulf %7, %36 : vector<16x32xf32>
    %cst_19 = arith.constant dense<0.000000e+00> : vector<32xf32>
    %41 = vector.multi_reduction <add>, %7, %cst_19 [0] : vector<16x32xf32> to vector<32xf32>
    %42 = vector.shape_cast %41 : vector<32xf32> to vector<1x32xf32>
    %cst_20 = arith.constant 1.600000e+01 : f32
    %43 = vector.broadcast %cst_20 : f32 to vector<1x32xf32>
    %44 = arith.divf %42, %43 : vector<1x32xf32>
    %cst_21 = arith.constant dense<0.000000e+00> : vector<32xf32>
    %45 = vector.multi_reduction <add>, %36, %cst_21 [0] : vector<16x32xf32> to vector<32xf32>
    %46 = vector.shape_cast %45 : vector<32xf32> to vector<1x32xf32>
    %cst_22 = arith.constant 1.600000e+01 : f32
    %47 = vector.broadcast %cst_22 : f32 to vector<1x32xf32>
    %48 = arith.divf %46, %47 : vector<1x32xf32>
    %cst_23 = arith.constant dense<0.000000e+00> : vector<32xf32>
    %49 = vector.multi_reduction <add>, %39, %cst_23 [0] : vector<16x32xf32> to vector<32xf32>
    %50 = vector.shape_cast %49 : vector<32xf32> to vector<1x32xf32>
    %cst_24 = arith.constant 1.600000e+01 : f32
    %51 = vector.broadcast %cst_24 : f32 to vector<1x32xf32>
    %52 = arith.divf %50, %51 : vector<1x32xf32>
    %cst_25 = arith.constant dense<0.000000e+00> : vector<32xf32>
    %53 = vector.multi_reduction <add>, %40, %cst_25 [0] : vector<16x32xf32> to vector<32xf32>
    %54 = vector.shape_cast %53 : vector<32xf32> to vector<1x32xf32>
    %cst_26 = arith.constant 1.600000e+01 : f32
    %55 = vector.broadcast %cst_26 : f32 to vector<1x32xf32>
    %56 = arith.divf %54, %55 : vector<1x32xf32>
    %cst_27 = arith.constant dense<0xFF800000> : vector<32xf32>
    %57 = vector.multi_reduction <maximumf>, %7, %cst_27 [0] : vector<16x32xf32> to vector<32xf32>
    %58 = vector.shape_cast %57 : vector<32xf32> to vector<1x32xf32>
    %cst_28 = arith.constant dense<0xFF800000> : vector<32xf32>
    %59 = vector.multi_reduction <maximumf>, %36, %cst_28 [0] : vector<16x32xf32> to vector<32xf32>
    %60 = vector.shape_cast %59 : vector<32xf32> to vector<1x32xf32>
    %cst_29 = arith.constant dense<0xFF800000> : vector<32xf32>
    %61 = vector.multi_reduction <maximumf>, %39, %cst_29 [0] : vector<16x32xf32> to vector<32xf32>
    %62 = vector.shape_cast %61 : vector<32xf32> to vector<1x32xf32>
    %cst_30 = arith.constant dense<0xFF800000> : vector<32xf32>
    %63 = vector.multi_reduction <maximumf>, %40, %cst_30 [0] : vector<16x32xf32> to vector<32xf32>
    %64 = vector.shape_cast %63 : vector<32xf32> to vector<1x32xf32>
    %65 = arith.subf %9, %38 : vector<16x32xf32>
    %66 = arith.mulf %9, %38 : vector<16x32xf32>
    %cst_31 = arith.constant dense<0.000000e+00> : vector<32xf32>
    %67 = vector.multi_reduction <add>, %9, %cst_31 [0] : vector<16x32xf32> to vector<32xf32>
    %68 = vector.shape_cast %67 : vector<32xf32> to vector<1x32xf32>
    %cst_32 = arith.constant 1.600000e+01 : f32
    %69 = vector.broadcast %cst_32 : f32 to vector<1x32xf32>
    %70 = arith.divf %68, %69 : vector<1x32xf32>
    %cst_33 = arith.constant dense<0.000000e+00> : vector<32xf32>
    %71 = vector.multi_reduction <add>, %38, %cst_33 [0] : vector<16x32xf32> to vector<32xf32>
    %72 = vector.shape_cast %71 : vector<32xf32> to vector<1x32xf32>
    %cst_34 = arith.constant 1.600000e+01 : f32
    %73 = vector.broadcast %cst_34 : f32 to vector<1x32xf32>
    %74 = arith.divf %72, %73 : vector<1x32xf32>
    %cst_35 = arith.constant dense<0.000000e+00> : vector<32xf32>
    %75 = vector.multi_reduction <add>, %65, %cst_35 [0] : vector<16x32xf32> to vector<32xf32>
    %76 = vector.shape_cast %75 : vector<32xf32> to vector<1x32xf32>
    %cst_36 = arith.constant 1.600000e+01 : f32
    %77 = vector.broadcast %cst_36 : f32 to vector<1x32xf32>
    %78 = arith.divf %76, %77 : vector<1x32xf32>
    %cst_37 = arith.constant dense<0.000000e+00> : vector<32xf32>
    %79 = vector.multi_reduction <add>, %66, %cst_37 [0] : vector<16x32xf32> to vector<32xf32>
    %80 = vector.shape_cast %79 : vector<32xf32> to vector<1x32xf32>
    %cst_38 = arith.constant 1.600000e+01 : f32
    %81 = vector.broadcast %cst_38 : f32 to vector<1x32xf32>
    %82 = arith.divf %80, %81 : vector<1x32xf32>
    %cst_39 = arith.constant dense<0xFF800000> : vector<32xf32>
    %83 = vector.multi_reduction <maximumf>, %9, %cst_39 [0] : vector<16x32xf32> to vector<32xf32>
    %84 = vector.shape_cast %83 : vector<32xf32> to vector<1x32xf32>
    %cst_40 = arith.constant dense<0xFF800000> : vector<32xf32>
    %85 = vector.multi_reduction <maximumf>, %38, %cst_40 [0] : vector<16x32xf32> to vector<32xf32>
    %86 = vector.shape_cast %85 : vector<32xf32> to vector<1x32xf32>
    %cst_41 = arith.constant dense<0xFF800000> : vector<32xf32>
    %87 = vector.multi_reduction <maximumf>, %65, %cst_41 [0] : vector<16x32xf32> to vector<32xf32>
    %88 = vector.shape_cast %87 : vector<32xf32> to vector<1x32xf32>
    %cst_42 = arith.constant dense<0xFF800000> : vector<32xf32>
    %89 = vector.multi_reduction <maximumf>, %66, %cst_42 [0] : vector<16x32xf32> to vector<32xf32>
    %90 = vector.shape_cast %89 : vector<32xf32> to vector<1x32xf32>
    %91 = tpu.concatenate %44, %48, %52, %56, %58, %60, %62, %64, %70, %74, %78, %82, %84, %86, %88, %90 in 1 : vector<1x32xf32>, vector<1x32xf32>, vector<1x32xf32>, vector<1x32xf32>, vector<1x32xf32>, vector<1x32xf32>, vector<1x32xf32>, vector<1x32xf32>, vector<1x32xf32>, vector<1x32xf32>, vector<1x32xf32>, vector<1x32xf32>, vector<1x32xf32>, vector<1x32xf32>, vector<1x32xf32>, vector<1x32xf32> -> vector<1x512xf32>
    %92 = vector.extract_strided_slice %2 {offsets = [1, 0, 0], sizes = [1, 16, 32], strides = [1, 1, 1]} : vector<2x16x32xf32> to vector<1x16x32xf32>
    %93 = vector.shape_cast %92 : vector<1x16x32xf32> to vector<16x32xf32>
    %94 = vector.extract_strided_slice %5 {offsets = [1, 0, 0], sizes = [1, 16, 32], strides = [1, 1, 1]} : vector<2x16x32xf32> to vector<1x16x32xf32>
    %95 = vector.shape_cast %94 : vector<1x16x32xf32> to vector<16x32xf32>
    %96 = arith.truncf %93 : vector<16x32xf32> to vector<16x32xbf16>
    %97 = arith.truncf %95 : vector<16x32xf32> to vector<16x32xbf16>
    %cst_43 = arith.constant dense<0.000000e+00> : vector<16x16xf32>
    %98 = tpu.matmul %96, %97, %cst_43 {dimension_numbers = #tpu.dot_dimension_numbers<[1], [1], [0], [0], [0, 0, 1, 0], [], []>} : vector<16x32xbf16>, vector<16x32xbf16>, vector<16x16xf32> -> vector<16x16xf32>
    %cst_44 = arith.constant dense<0xFF800000> : vector<16xf32>
    %99 = vector.multi_reduction <maximumf>, %98, %cst_44 [1] : vector<16x16xf32> to vector<16xf32>
    %cst_45 = arith.constant 0xFF800000 : f32
    %100 = vector.broadcast %cst_45 : f32 to vector<16xf32>
    %101 = arith.maximumf %100, %99 : vector<16xf32>
    %102 = vector.shape_cast %101 : vector<16xf32> to vector<16x1xf32>
    %103 = vector.broadcast %102 : vector<16x1xf32> to vector<16x16xf32>
    %104 = arith.subf %98, %103 : vector<16x16xf32>
    %105 = math.exp %104 : vector<16x16xf32>
    %cst_46 = arith.constant dense<0.000000e+00> : vector<16xf32>
    %106 = vector.multi_reduction <add>, %105, %cst_46 [1] : vector<16x16xf32> to vector<16xf32>
    %107 = vector.shape_cast %106 : vector<16xf32> to vector<16x1xf32>
    %108 = vector.broadcast %107 : vector<16x1xf32> to vector<16x16xf32>
    %109 = arith.divf %105, %108 : vector<16x16xf32>
    %cst_47 = arith.constant dense<0xFF800000> : vector<16xf32>
    %110 = vector.multi_reduction <maximumf>, %98, %cst_47 [0] : vector<16x16xf32> to vector<16xf32>
    %cst_48 = arith.constant 0xFF800000 : f32
    %111 = vector.broadcast %cst_48 : f32 to vector<16xf32>
    %112 = arith.maximumf %111, %110 : vector<16xf32>
    %113 = vector.shape_cast %112 : vector<16xf32> to vector<1x16xf32>
    %114 = vector.broadcast %113 : vector<1x16xf32> to vector<16x16xf32>
    %115 = arith.subf %98, %114 : vector<16x16xf32>
    %116 = math.exp %115 : vector<16x16xf32>
    %cst_49 = arith.constant dense<0.000000e+00> : vector<16xf32>
    %117 = vector.multi_reduction <add>, %116, %cst_49 [0] : vector<16x16xf32> to vector<16xf32>
    %118 = vector.shape_cast %117 : vector<16xf32> to vector<1x16xf32>
    %119 = vector.broadcast %118 : vector<1x16xf32> to vector<16x16xf32>
    %120 = arith.divf %116, %119 : vector<16x16xf32>
    %121 = arith.truncf %109 : vector<16x16xf32> to vector<16x16xbf16>
    %cst_50 = arith.constant dense<0.000000e+00> : vector<16x32xf32>
    %122 = tpu.matmul %121, %97, %cst_50 {dimension_numbers = #tpu.dot_dimension_numbers<[1], [0], [0], [1], [0, 0, 1, 1], [], []>} : vector<16x16xbf16>, vector<16x32xbf16>, vector<16x32xf32> -> vector<16x32xf32>
    %123 = arith.truncf %120 : vector<16x16xf32> to vector<16x16xbf16>
    %cst_51 = arith.constant dense<0.000000e+00> : vector<16x32xf32>
    %124 = tpu.matmul %123, %96, %cst_51 {dimension_numbers = #tpu.dot_dimension_numbers<[0], [0], [1], [1], [0, 1, 1, 1], [], []>} : vector<16x16xbf16>, vector<16x32xbf16>, vector<16x32xf32> -> vector<16x32xf32>
    %125 = arith.subf %93, %122 : vector<16x32xf32>
    %126 = arith.mulf %93, %122 : vector<16x32xf32>
    %cst_52 = arith.constant dense<0.000000e+00> : vector<32xf32>
    %127 = vector.multi_reduction <add>, %93, %cst_52 [0] : vector<16x32xf32> to vector<32xf32>
    %128 = vector.shape_cast %127 : vector<32xf32> to vector<1x32xf32>
    %cst_53 = arith.constant 1.600000e+01 : f32
    %129 = vector.broadcast %cst_53 : f32 to vector<1x32xf32>
    %130 = arith.divf %128, %129 : vector<1x32xf32>
    %cst_54 = arith.constant dense<0.000000e+00> : vector<32xf32>
    %131 = vector.multi_reduction <add>, %122, %cst_54 [0] : vector<16x32xf32> to vector<32xf32>
    %132 = vector.shape_cast %131 : vector<32xf32> to vector<1x32xf32>
    %cst_55 = arith.constant 1.600000e+01 : f32
    %133 = vector.broadcast %cst_55 : f32 to vector<1x32xf32>
    %134 = arith.divf %132, %133 : vector<1x32xf32>
    %cst_56 = arith.constant dense<0.000000e+00> : vector<32xf32>
    %135 = vector.multi_reduction <add>, %125, %cst_56 [0] : vector<16x32xf32> to vector<32xf32>
    %136 = vector.shape_cast %135 : vector<32xf32> to vector<1x32xf32>
    %cst_57 = arith.constant 1.600000e+01 : f32
    %137 = vector.broadcast %cst_57 : f32 to vector<1x32xf32>
    %138 = arith.divf %136, %137 : vector<1x32xf32>
    %cst_58 = arith.constant dense<0.000000e+00> : vector<32xf32>
    %139 = vector.multi_reduction <add>, %126, %cst_58 [0] : vector<16x32xf32> to vector<32xf32>
    %140 = vector.shape_cast %139 : vector<32xf32> to vector<1x32xf32>
    %cst_59 = arith.constant 1.600000e+01 : f32
    %141 = vector.broadcast %cst_59 : f32 to vector<1x32xf32>
    %142 = arith.divf %140, %141 : vector<1x32xf32>
    %cst_60 = arith.constant dense<0xFF800000> : vector<32xf32>
    %143 = vector.multi_reduction <maximumf>, %93, %cst_60 [0] : vector<16x32xf32> to vector<32xf32>
    %144 = vector.shape_cast %143 : vector<32xf32> to vector<1x32xf32>
    %cst_61 = arith.constant dense<0xFF800000> : vector<32xf32>
    %145 = vector.multi_reduction <maximumf>, %122, %cst_61 [0] : vector<16x32xf32> to vector<32xf32>
    %146 = vector.shape_cast %145 : vector<32xf32> to vector<1x32xf32>
    %cst_62 = arith.constant dense<0xFF800000> : vector<32xf32>
    %147 = vector.multi_reduction <maximumf>, %125, %cst_62 [0] : vector<16x32xf32> to vector<32xf32>
    %148 = vector.shape_cast %147 : vector<32xf32> to vector<1x32xf32>
    %cst_63 = arith.constant dense<0xFF800000> : vector<32xf32>
    %149 = vector.multi_reduction <maximumf>, %126, %cst_63 [0] : vector<16x32xf32> to vector<32xf32>
    %150 = vector.shape_cast %149 : vector<32xf32> to vector<1x32xf32>
    %151 = arith.subf %95, %124 : vector<16x32xf32>
    %152 = arith.mulf %95, %124 : vector<16x32xf32>
    %cst_64 = arith.constant dense<0.000000e+00> : vector<32xf32>
    %153 = vector.multi_reduction <add>, %95, %cst_64 [0] : vector<16x32xf32> to vector<32xf32>
    %154 = vector.shape_cast %153 : vector<32xf32> to vector<1x32xf32>
    %cst_65 = arith.constant 1.600000e+01 : f32
    %155 = vector.broadcast %cst_65 : f32 to vector<1x32xf32>
    %156 = arith.divf %154, %155 : vector<1x32xf32>
    %cst_66 = arith.constant dense<0.000000e+00> : vector<32xf32>
    %157 = vector.multi_reduction <add>, %124, %cst_66 [0] : vector<16x32xf32> to vector<32xf32>
    %158 = vector.shape_cast %157 : vector<32xf32> to vector<1x32xf32>
    %cst_67 = arith.constant 1.600000e+01 : f32
    %159 = vector.broadcast %cst_67 : f32 to vector<1x32xf32>
    %160 = arith.divf %158, %159 : vector<1x32xf32>
    %cst_68 = arith.constant dense<0.000000e+00> : vector<32xf32>
    %161 = vector.multi_reduction <add>, %151, %cst_68 [0] : vector<16x32xf32> to vector<32xf32>
    %162 = vector.shape_cast %161 : vector<32xf32> to vector<1x32xf32>
    %cst_69 = arith.constant 1.600000e+01 : f32
    %163 = vector.broadcast %cst_69 : f32 to vector<1x32xf32>
    %164 = arith.divf %162, %163 : vector<1x32xf32>
    %cst_70 = arith.constant dense<0.000000e+00> : vector<32xf32>
    %165 = vector.multi_reduction <add>, %152, %cst_70 [0] : vector<16x32xf32> to vector<32xf32>
    %166 = vector.shape_cast %165 : vector<32xf32> to vector<1x32xf32>
    %cst_71 = arith.constant 1.600000e+01 : f32
    %167 = vector.broadcast %cst_71 : f32 to vector<1x32xf32>
    %168 = arith.divf %166, %167 : vector<1x32xf32>
    %cst_72 = arith.constant dense<0xFF800000> : vector<32xf32>
    %169 = vector.multi_reduction <maximumf>, %95, %cst_72 [0] : vector<16x32xf32> to vector<32xf32>
    %170 = vector.shape_cast %169 : vector<32xf32> to vector<1x32xf32>
    %cst_73 = arith.constant dense<0xFF800000> : vector<32xf32>
    %171 = vector.multi_reduction <maximumf>, %124, %cst_73 [0] : vector<16x32xf32> to vector<32xf32>
    %172 = vector.shape_cast %171 : vector<32xf32> to vector<1x32xf32>
    %cst_74 = arith.constant dense<0xFF800000> : vector<32xf32>
    %173 = vector.multi_reduction <maximumf>, %151, %cst_74 [0] : vector<16x32xf32> to vector<32xf32>
    %174 = vector.shape_cast %173 : vector<32xf32> to vector<1x32xf32>
    %cst_75 = arith.constant dense<0xFF800000> : vector<32xf32>
    %175 = vector.multi_reduction <maximumf>, %152, %cst_75 [0] : vector<16x32xf32> to vector<32xf32>
    %176 = vector.shape_cast %175 : vector<32xf32> to vector<1x32xf32>
    %177 = tpu.concatenate %130, %134, %138, %142, %144, %146, %148, %150, %156, %160, %164, %168, %170, %172, %174, %176 in 1 : vector<1x32xf32>, vector<1x32xf32>, vector<1x32xf32>, vector<1x32xf32>, vector<1x32xf32>, vector<1x32xf32>, vector<1x32xf32>, vector<1x32xf32>, vector<1x32xf32>, vector<1x32xf32>, vector<1x32xf32>, vector<1x32xf32>, vector<1x32xf32>, vector<1x32xf32>, vector<1x32xf32>, vector<1x32xf32> -> vector<1x512xf32>
    %178 = tpu.concatenate %91, %177 in 0 : vector<1x512xf32>, vector<1x512xf32> -> vector<2x512xf32>
    %c0_76 = arith.constant 0 : index
    %c0_77 = arith.constant 0 : index
    %179 = vector.load %arg5[%c0_76, %c0_77] : memref<2x512xf32, #tpu.memory_space<vmem>>, vector<2x512xf32>
    tpu.vector_store %arg5[%c0_76, %c0_77], %178 {strides = array<i32>} : memref<2x512xf32, #tpu.memory_space<vmem>>, vector<2x512xf32>,
    return
  }
  func.func @transform_0(%arg0: i32) -> (i32, i32, i32) {
    %c0_i32 = arith.constant 0 : i32
    %c0_i32_0 = arith.constant 0 : i32
    %c0_i32_1 = arith.constant 0 : i32
    return %arg0, %c0_i32, %c0_i32_0 : i32, i32, i32
  }
  func.func @transform_1(%arg0: i32) -> (i32, i32, i32) {
    %c0_i32 = arith.constant 0 : i32
    %c0_i32_0 = arith.constant 0 : i32
    %c0_i32_1 = arith.constant 0 : i32
    return %arg0, %c0_i32, %c0_i32_0 : i32, i32, i32
  }
  func.func @transform_2(%arg0: i32) -> (i32, i32, i32) {
    %c1_i32 = arith.constant 1 : i32
    %0 = arith.addi %c1_i32, %arg0 : i32
    %c0_i32 = arith.constant 0 : i32
    %c0_i32_0 = arith.constant 0 : i32
    %c0_i32_1 = arith.constant 0 : i32
    return %0, %c0_i32, %c0_i32_0 : i32, i32, i32
  }
  func.func @transform_3(%arg0: i32) -> (i32, i32, i32) {
    %c1_i32 = arith.constant 1 : i32
    %0 = arith.addi %c1_i32, %arg0 : i32
    %c0_i32 = arith.constant 0 : i32
    %c0_i32_0 = arith.constant 0 : i32
    %c0_i32_1 = arith.constant 0 : i32
    return %0, %c0_i32, %c0_i32_0 : i32, i32, i32
  }
  func.func @transform_4(%arg0: i32) -> (i32, i32) {
    %c0_i32 = arith.constant 0 : i32
    %c0_i32_0 = arith.constant 0 : i32
    return %arg0, %c0_i32 : i32, i32
  }
}

module attributes {stable_mosaic.version = 11 : i64} {
  func.func @_fc_head_kernel(%arg0: i32, %arg1: memref<2x256xf32, #tpu.memory_space<vmem>>, %arg2: memref<256x16xbf16, #tpu.memory_space<vmem>>, %arg3: memref<1x16xf32, #tpu.memory_space<vmem>>, %arg4: memref<16x3xbf16, #tpu.memory_space<vmem>>, %arg5: memref<1x3xf32, #tpu.memory_space<vmem>>, %arg6: memref<2x3xf32, #tpu.memory_space<vmem>>, %arg7: memref<2x16xf32, #tpu.memory_space<vmem>>) attributes {dimension_semantics = [#tpu.dimension_semantics<arbitrary>], iteration_bounds = array<i64: 2>, scalar_prefetch = 0 : i64, scratch_operands = 1 : i64, tpu.core_type = #tpu.core_type<tc>, window_params = [{transform_indices = @transform_0, window_bounds = array<i64: 2, 256>}, {transform_indices = @transform_1, window_bounds = array<i64: 256, 16>}, {pipeline_mode = #tpu.pipeline_mode<synchronous>, transform_indices = @transform_2, window_bounds = array<i64: 1, 16>}, {pipeline_mode = #tpu.pipeline_mode<synchronous>, transform_indices = @transform_3, window_bounds = array<i64: 16, 3>}, {pipeline_mode = #tpu.pipeline_mode<synchronous>, transform_indices = @transform_4, window_bounds = array<i64: 1, 3>}, {pipeline_mode = #tpu.pipeline_mode<synchronous>, transform_indices = @transform_5, window_bounds = array<i64: 2, 3>}]} {
    %c0_i32 = arith.constant 0 : i32
    %0 = arith.cmpi eq, %arg0, %c0_i32 : i32
    %1 = arith.extui %0 : i1 to i32
    %c0_i32_0 = arith.constant 0 : i32
    %2 = arith.cmpi ne, %1, %c0_i32_0 : i32
    scf.if %2 {
      %cst_9 = arith.constant 0.000000e+00 : f32
      %13 = vector.broadcast %cst_9 : f32 to vector<2x16xf32>
      %c0_10 = arith.constant 0 : index
      %c0_11 = arith.constant 0 : index
      %14 = vector.load %arg7[%c0_10, %c0_11] : memref<2x16xf32, #tpu.memory_space<vmem>>, vector<2x16xf32>
      tpu.vector_store %arg7[%c0_10, %c0_11], %13 {strides = array<i32>} : memref<2x16xf32, #tpu.memory_space<vmem>>, vector<2x16xf32>,
    } else {
    }
    %c0 = arith.constant 0 : index
    %c0_1 = arith.constant 0 : index
    %3 = vector.load %arg7[%c0, %c0_1] : memref<2x16xf32, #tpu.memory_space<vmem>>, vector<2x16xf32>
    %c0_2 = arith.constant 0 : index
    %c0_3 = arith.constant 0 : index
    %4 = vector.load %arg1[%c0_2, %c0_3] : memref<2x256xf32, #tpu.memory_space<vmem>>, vector<2x256xf32>
    %5 = arith.truncf %4 : vector<2x256xf32> to vector<2x256xbf16>
    %c0_4 = arith.constant 0 : index
    %c0_5 = arith.constant 0 : index
    %6 = vector.load %arg2[%c0_4, %c0_5] : memref<256x16xbf16, #tpu.memory_space<vmem>>, vector<256x16xbf16>
    %cst = arith.constant dense<0.000000e+00> : vector<2x16xf32>
    %7 = tpu.matmul %5, %6, %cst {dimension_numbers = #tpu.dot_dimension_numbers<[1], [0], [0], [1], [0, 0, 1, 1], [], []>} : vector<2x256xbf16>, vector<256x16xbf16>, vector<2x16xf32> -> vector<2x16xf32>
    %8 = arith.addf %3, %7 : vector<2x16xf32>
    %c0_6 = arith.constant 0 : index
    %c0_7 = arith.constant 0 : index
    %9 = vector.load %arg7[%c0_6, %c0_7] : memref<2x16xf32, #tpu.memory_space<vmem>>, vector<2x16xf32>
    tpu.vector_store %arg7[%c0_6, %c0_7], %8 {strides = array<i32>} : memref<2x16xf32, #tpu.memory_space<vmem>>, vector<2x16xf32>,
    %c1_i32 = arith.constant 1 : i32
    %10 = arith.cmpi eq, %arg0, %c1_i32 : i32
    %11 = arith.extui %10 : i1 to i32
    %c0_i32_8 = arith.constant 0 : i32
    %12 = arith.cmpi ne, %11, %c0_i32_8 : i32
    scf.if %12 {
      %c0_9 = arith.constant 0 : index
      %c0_10 = arith.constant 0 : index
      %13 = vector.load %arg7[%c0_9, %c0_10] : memref<2x16xf32, #tpu.memory_space<vmem>>, vector<2x16xf32>
      %c0_11 = arith.constant 0 : index
      %c0_12 = arith.constant 0 : index
      %14 = vector.load %arg3[%c0_11, %c0_12] : memref<1x16xf32, #tpu.memory_space<vmem>>, vector<1x16xf32>
      %15 = vector.broadcast %14 : vector<1x16xf32> to vector<2x16xf32>
      %16 = arith.addf %13, %15 : vector<2x16xf32>
      %cst_13 = arith.constant 0.000000e+00 : f32
      %17 = vector.broadcast %cst_13 : f32 to vector<2x16xf32>
      %18 = arith.maximumf %16, %17 : vector<2x16xf32>
      %19 = arith.truncf %18 : vector<2x16xf32> to vector<2x16xbf16>
      %c0_14 = arith.constant 0 : index
      %c0_15 = arith.constant 0 : index
      %20 = vector.load %arg4[%c0_14, %c0_15] : memref<16x3xbf16, #tpu.memory_space<vmem>>, vector<16x3xbf16>
      %cst_16 = arith.constant dense<0.000000e+00> : vector<2x3xf32>
      %21 = tpu.matmul %19, %20, %cst_16 {dimension_numbers = #tpu.dot_dimension_numbers<[1], [0], [0], [1], [0, 0, 1, 1], [], []>} : vector<2x16xbf16>, vector<16x3xbf16>, vector<2x3xf32> -> vector<2x3xf32>
      %c0_17 = arith.constant 0 : index
      %c0_18 = arith.constant 0 : index
      %22 = vector.load %arg5[%c0_17, %c0_18] : memref<1x3xf32, #tpu.memory_space<vmem>>, vector<1x3xf32>
      %23 = vector.broadcast %22 : vector<1x3xf32> to vector<2x3xf32>
      %24 = arith.addf %21, %23 : vector<2x3xf32>
      %c0_19 = arith.constant 0 : index
      %c0_20 = arith.constant 0 : index
      %25 = vector.load %arg6[%c0_19, %c0_20] : memref<2x3xf32, #tpu.memory_space<vmem>>, vector<2x3xf32>
      tpu.vector_store %arg6[%c0_19, %c0_20], %24 {strides = array<i32>} : memref<2x3xf32, #tpu.memory_space<vmem>>, vector<2x3xf32>,
    } else {
    }
    return
  }
  func.func @transform_0(%arg0: i32) -> (i32, i32) {
    %c0_i32 = arith.constant 0 : i32
    %c0_i32_0 = arith.constant 0 : i32
    return %c0_i32, %arg0 : i32, i32
  }
  func.func @transform_1(%arg0: i32) -> (i32, i32) {
    %c0_i32 = arith.constant 0 : i32
    %c0_i32_0 = arith.constant 0 : i32
    return %arg0, %c0_i32 : i32, i32
  }
  func.func @transform_2(%arg0: i32) -> (i32, i32) {
    %c0_i32 = arith.constant 0 : i32
    %c0_i32_0 = arith.constant 0 : i32
    %c0_i32_1 = arith.constant 0 : i32
    return %c0_i32, %c0_i32_0 : i32, i32
  }
  func.func @transform_3(%arg0: i32) -> (i32, i32) {
    %c0_i32 = arith.constant 0 : i32
    %c0_i32_0 = arith.constant 0 : i32
    %c0_i32_1 = arith.constant 0 : i32
    return %c0_i32, %c0_i32_0 : i32, i32
  }
  func.func @transform_4(%arg0: i32) -> (i32, i32) {
    %c0_i32 = arith.constant 0 : i32
    %c0_i32_0 = arith.constant 0 : i32
    %c0_i32_1 = arith.constant 0 : i32
    return %c0_i32, %c0_i32_0 : i32, i32
  }
  func.func @transform_5(%arg0: i32) -> (i32, i32) {
    %c0_i32 = arith.constant 0 : i32
    %c0_i32_0 = arith.constant 0 : i32
    %c0_i32_1 = arith.constant 0 : i32
    return %c0_i32, %c0_i32_0 : i32, i32
  }
}

</mosaic_0001>

<bundles_post_ra>
// kernel: sentence_pair_classifier.4
= control target key start
LH: loop header
LB: loop body
LE: loop exit
PB: predicated region body
PF: predicated region fallthrough
CT: control target
= control target key end

     0   :  { %vm74_vm0 = vcmask 261120   ;;  %vm152_vm1 = vcmask 523264   ;;  %s464_s1 = inlined_call_operand.vmem [shape: bf16[32,64], index: 1, kind: input, shape index: {}]   ;;  %s465_s2 = inlined_call_operand.vmem [shape: bf16[32,64], index: 2, kind: input, shape index: {}]   ;;  %s466_s0 = inlined_call_operand.vmem [shape: bf16[64,32], index: 0, kind: input, shape index: {}]   ;;  %s467_s3 = inlined_call_operand.vmem [shape: f32[1,64], index: 3, kind: input, shape index: {}]   ;;  %s468_s4 = inlined_call_operand.vmem [shape: f32[1,64], index: 4, kind: input, shape index: {}]   ;;  %s469_s5 = inlined_call_operand.vmem [shape: f32[64,64], index: 5, kind: output, shape index: {0}]   ;;  %s470_s6 = inlined_call_operand.vmem [shape: f32[64,64], index: 6, kind: output, shape index: {1}]  }
   0x1   :  { %v319_v0 = vld [vmem:[%s464_s1] sm:$0xff]   ;;  %v321_v2 = vld [vmem:[%s464_s1 + $0x8] sm:$0xff]   ;;  %v325_v6 = vld [vmem:[%s466_s0 + $0x10] sm:$0xff]  }
   0x2   :  { %v320_v1 = vld [vmem:[%s465_s2] sm:$0xff]   ;;  %295 = vmatprep.subr.bf16.mxu0 %v319_v0  ;;  %v322_v3 = vld [vmem:[%s465_s2 + $0x8] sm:$0xff]   ;;  %v326_v7 = vld [vmem:[%s466_s0 + $0x18] sm:$0xff]  }
   0x3   :  { %307 = vmatprep.subr.bf16.mxu1 %v320_v1  ;;  %296 = vmatpush3.bf16.msra.mxu0 %v319_v0  ;;  %v323_v4 = vld [vmem:[%s466_s0] sm:$0xff]   ;;  %v324_v5 = vld [vmem:[%s466_s0 + $0x8] sm:$0xff]  }
   0x4   :  { %308 = vmatpush3.bf16.msra.mxu1 %v320_v1  ;;  %297 = vmatprep.subr.bf16.mxu0 %v321_v2  ;;  %v265_v8 = vld [vmem:[%s467_s3] ss:$0 sm:$0xff] }
   0x5   :  { %309 = vmatprep.subr.bf16.mxu1 %v322_v3  ;;  %299 = vmatprep.mubr.msk.bf16.mxu0 %vm74_vm0, %v323_v4  ;;  %v276_v9 = vld [vmem:[%s468_s4] ss:$0 sm:$0xff] }
   0x6   :  { %311 = vmatprep.mubr.msk.bf16.mxu1 %vm74_vm0, %v323_v4 }
   0x7   :  { %298 = vmatpush3.bf16.msra.mxu0 %v321_v2 }
   0x8   :  { %310 = vmatpush3.bf16.msra.mxu1 %v322_v3 }
   0xa   :  { %300 = vmatmul.mubr.msk.bf16.vlgmr.msra.gmra.mrb[0].mxu0 %vm74_vm0, %v324_v5 }
   0xb   :  { %312 = vmatmul.mubr.msk.bf16.vlgmr.msra.gmra.mrb[0].mxu1 %vm74_vm0, %v324_v5  ;;  %303 = vmatprep.mubr.msk.bf16.mxu0 %vm74_vm0, %v325_v6 }
   0xc   :  { %315 = vmatprep.mubr.msk.bf16.mxu1 %vm74_vm0, %v325_v6 }
  0x12   :  { %304 = vmatmul.mubr.msk.bf16.gmra.mrb[4].mxu0 %vm74_vm0, %v326_v7 }
  0x13   :  { %316 = vmatmul.mubr.msk.bf16.gmra.mrb[4].mxu1 %vm74_vm0, %v326_v7 }
  0xdd   :  { %v301_v10 = vpop.f32.mrb[0].mxu0 }
  0xde   :  { %v130_v11 = vadd.f32 %v301_v10, %v265_v8  ;;  %v313_v12 = vpop.f32.mrb[0].mxu1  ;;  %v121_v13 = vpop.f32.mrb[1].mxu0 }
  0xdf   :  { %v227_v14 = vadd.f32 %v313_v12, %v276_v9  ;;  %v122_v15 = vadd.f32 %v265_v8, %v121_v13  ;;  %v218_v16 = vpop.f32.mrb[1].mxu1  ;;  %v302_v17 = vpop.f32.mrb[2].mxu0 }
  0xe0   :  { %155 = vst.msk [vmem:[%s469_s5 + $0x10] sm:$0xff] %vm152_vm1, %v130_v11  ;;  %v219_v18 = vadd.f32 %v276_v9, %v218_v16  ;;  %v133_v19 = vadd.f32 %v302_v17, %v265_v8  ;;  %v314_v20 = vpop.f32.mrb[2].mxu1  ;;  %v124_v21 = vpop.f32.mrb[3].mxu0 }
  0xe1   :  { %251 = vst.msk [vmem:[%s470_s6 + $0x10] sm:$0xff] %vm152_vm1, %v227_v14  ;;  %153 = vst.msk [vmem:[%s469_s5] sm:$0xff] %vm152_vm1, %v122_v15  ;;  %v230_v22 = vadd.f32 %v314_v20, %v276_v9  ;;  %v125_v23 = vadd.f32 %v265_v8, %v124_v21  ;;  %v221_v24 = vpop.f32.mrb[3].mxu1 }
  0xe2   :  { %249 = vst.msk [vmem:[%s470_s6] sm:$0xff] %vm152_vm1, %v219_v18  ;;  %156 = vst.msk [vmem:[%s469_s5 + $0x18] sm:$0xff] %vm152_vm1, %v133_v19  ;;  %v222_v25 = vadd.f32 %v276_v9, %v221_v24 }
  0xe3   :  { %252 = vst.msk [vmem:[%s470_s6 + $0x18] sm:$0xff] %vm152_vm1, %v230_v22  ;;  %154 = vst.msk [vmem:[%s469_s5 + $0x8] sm:$0xff] %vm152_vm1, %v125_v23 }
  0xe4   :  { %250 = vst.msk [vmem:[%s470_s6 + $0x8] sm:$0xff] %vm152_vm1, %v222_v25 }
  0xe5   :  { %v305_v26 = vpop.f32.mrb[4].mxu0 }
  0xe6   :  { %v146_v27 = vadd.f32 %v305_v26, %v265_v8  ;;  %v317_v28 = vpop.f32.mrb[4].mxu1  ;;  %v137_v29 = vpop.f32.mrb[5].mxu0 }
  0xe7   :  { %v243_v30 = vadd.f32 %v317_v28, %v276_v9  ;;  %v138_v31 = vadd.f32 %v265_v8, %v137_v29  ;;  %v234_v32 = vpop.f32.mrb[5].mxu1  ;;  %v306_v33 = vpop.f32.mrb[6].mxu0 }
  0xe8   :  { %159 = vst.msk [vmem:[%s469_s5 + $0x30] sm:$0xff] %vm152_vm1, %v146_v27  ;;  %v235_v34 = vadd.f32 %v276_v9, %v234_v32  ;;  %v149_v35 = vadd.f32 %v306_v33, %v265_v8  ;;  %v318_v36 = vpop.f32.mrb[6].mxu1  ;;  %v140_v37 = vpop.f32.mrb[7].mxu0 }
  0xe9   :  { %255 = vst.msk [vmem:[%s470_s6 + $0x30] sm:$0xff] %vm152_vm1, %v243_v30  ;;  %157 = vst.msk [vmem:[%s469_s5 + $0x20] sm:$0xff] %vm152_vm1, %v138_v31  ;;  %v246_v38 = vadd.f32 %v318_v36, %v276_v9  ;;  %v141_v39 = vadd.f32 %v265_v8, %v140_v37  ;;  %v237_v40 = vpop.f32.mrb[7].mxu1 }
  0xea   :  { %253 = vst.msk [vmem:[%s470_s6 + $0x20] sm:$0xff] %vm152_vm1, %v235_v34  ;;  %160 = vst.msk [vmem:[%s469_s5 + $0x38] sm:$0xff] %vm152_vm1, %v149_v35  ;;  %v238_v41 = vadd.f32 %v276_v9, %v237_v40 }
  0xeb   :  { %256 = vst.msk [vmem:[%s470_s6 + $0x38] sm:$0xff] %vm152_vm1, %v246_v38  ;;  %158 = vst.msk [vmem:[%s469_s5 + $0x28] sm:$0xff] %vm152_vm1, %v141_v39 }
  0xec   :  { %254 = vst.msk [vmem:[%s470_s6 + $0x28] sm:$0xff] %vm152_vm1, %v238_v41 }

// kernel: sentence_pair_classifier.6
= control target key start
LH: loop header
LB: loop body
LE: loop exit
PB: predicated region body
PF: predicated region fallthrough
CT: control target
= control target key end

     0   :  { %v1127_v2 = vmov 0.0   ;;  %s1128_s19 = smov 16   ;;  %vm1129_vm0 = vmmov 0   ;;  %vm92_vm1 = vcmask 130048   ;;  %vm127_vm2 = vcmask 261120   ;;  %s1132_s20 = smov 96   ;;  %s1585_s3 = inlined_call_operand.vmem [shape: f32[4,16,16], index: 3, kind: input, shape index: {}, may-alias: {1,3}]   ;;  %s1586_s1 = inlined_call_operand.vmem [shape: f32[4,16,16], index: 1, kind: input, shape index: {}, may-alias: {1,3}]   ;;  %s1587_s2 = inlined_call_operand.vmem [shape: f32[4,16,16], index: 2, kind: input, shape index: {}, may-alias: {0,2}]   ;;  %s1588_s0 = inlined_call_operand.vmem [shape: f32[4,16,16], index: 0, kind: input, shape index: {}, may-alias: {0,2}]   ;;  %s1589_s4 = inlined_call_operand.vmem [shape: f32[2,512], index: 4, kind: output, shape index: {}]  }
   0x1   :  { %v1033_v0 = vld [vmem:[%s1585_s3 + $0x20] sm:$0xff]  ;;  %1061 = vmatprep.subr.bf16.mxu1 %v1127_v2  ;;  %1055 = vmatprep.subr.bf16.mxu0 %v1127_v2  ;;  %v1034_v3 = vld [vmem:[%s1585_s3 + $0x28] sm:$0xff]  ;;  %v1035_v5 = vld [vmem:[%s1585_s3 + $0x30] sm:$0xff]  ;;  %vm538_vm3 = vcmask 523264   ;;  %vm540_vm4 = vcmask 785408   ;;  %vm985_vm5 = vcmask 1040384  }
   0x2   :  { %v72_v1 = vld [vmem:[%s1586_s1] sm:$0xff]  ;;  %109 = vrot.lane.b32.xlu0 %v1033_v0, %s1128_s19  ;;  %v73_v4 = vld [vmem:[%s1586_s1 + $0x8] sm:$0xff]  ;;  %1057 = vmatprep.mubr.msk.bf16.mxu0 %vm1129_vm0, %v1127_v2  ;;  %v1036_v6 = vld [vmem:[%s1585_s3 + $0x38] sm:$0xff] }
   0x3   :  { %80 = vrot.lane.b32.xlu1 %v72_v1, %s1128_s19  ;;  %1063 = vmatprep.mubr.msk.bf16.mxu1 %vm1129_vm0, %v1127_v2  ;;  %v74_v7 = vld [vmem:[%s1586_s1 + $0x10] sm:$0xff]  ;;  %v75_v8 = vld [vmem:[%s1586_s1 + $0x18] sm:$0xff]  ;;  %v1030_v11 = vld [vmem:[%s1587_s2 + $0x28] sm:$0xff] }
   0x4   :  { %v1029_v12 = vld [vmem:[%s1587_s2 + $0x20] sm:$0xff]  ;;  %v1031_v18 = vld [vmem:[%s1587_s2 + $0x30] sm:$0xff]  ;;  %v1032_v20 = vld [vmem:[%s1587_s2 + $0x38] sm:$0xff] }
   0x5   :  { %v68_v22 = vld [vmem:[%s1588_s0] sm:$0xff]  ;;  %v69_v23 = vld [vmem:[%s1588_s0 + $0x8] sm:$0xff]  ;;  %v70_v33 = vld [vmem:[%s1588_s0 + $0x10] sm:$0xff] }
   0x6   :  { %111 = vrot.lane.b32.xlu0 %v1034_v3, %s1128_s19  ;;  %v71_v35 = vld [vmem:[%s1588_s0 + $0x18] sm:$0xff]  ;;  %s1130_s0 = smov 32  }
   0x7   :  { %82 = vrot.lane.b32.xlu1 %v73_v4, %s1128_s19 }
   0xa   :  { %113 = vrot.lane.b32.xlu0 %v1035_v5, %s1128_s19 }
   0xb   :  { %115 = vrot.lane.b32.xlu1 %v1036_v6, %s1128_s19 }
   0xe   :  { %84 = vrot.lane.b32.xlu0 %v74_v7, %s1128_s19 }
   0xf   :  { %86 = vrot.lane.b32.xlu1 %v75_v8, %s1128_s19  ;;  %s1131_s19 = smov 64  }
  0x74   :  { %v110_v9 = vpop.permute.xlu0 %109 }
  0x75   :  { %v81_v10 = vpop.permute.xlu1 %80  ;;  %v1199_v16 = vsel %vm92_vm1, %v1029_v12, %v110_v9 }
  0x76   :  { %v1229_v28 = vsel %vm92_vm1, %v68_v22, %v81_v10 }
  0x78   :  { %v112_v13 = vpop.permute.xlu0 %111 }
  0x79   :  { %v83_v14 = vpop.permute.xlu1 %82  ;;  %v1196_v15 = vsel %vm92_vm1, %v1030_v11, %v112_v13 }
  0x7a   :  { %v126_v19 = vpack.c.bf16 %v1196_v15, %v1199_v16  ;;  %v1232_v29 = vsel %vm92_vm1, %v69_v23, %v83_v14 }
  0x7b   :  { %v1236_v30 = vpack.c.bf16 %v1232_v29, %v1229_v28 }
  0x7c   :  { %v114_v17 = vpop.permute.xlu0 %113  ;;  %1062 = vmatpush3.bf16.msra.mxu1 %v126_v19  ;;  %v132_v24 = vsel %vm127_vm2, %v126_v19, 0 }
  0x7d   :  { %v116_v21 = vpop.permute.xlu1 %115  ;;  %v1217_v25 = vsel %vm92_vm1, %v1031_v18, %v114_v17  ;;  %1056 = vmatpush3.bf16.xpose.msra.mxu0 %v132_v24  ;;  %1067 = vmatprep.subr.bf16.mxu1 %v1127_v2 }
  0x7e   :  { %v1220_v26 = vsel %vm92_vm1, %v1032_v20, %v116_v21  ;;  %1073 = vmatprep.subr.bf16.mxu0 %v1127_v2 }
  0x7f   :  { %v1226_v27 = vpack.c.bf16 %v1220_v26, %v1217_v25 }
  0x80   :  { %v85_v32 = vpop.permute.xlu0 %84 }
  0x81   :  { %v557_v31 = vsel %vm127_vm2, %v1226_v27, 0  ;;  %v87_v34 = vpop.permute.xlu1 %86  ;;  %v1252_v36 = vsel %vm92_vm1, %v70_v33, %v85_v32 }
  0x82   :  { %v1255_v37 = vsel %vm92_vm1, %v71_v35, %v87_v34 }
  0x83   :  { %v551_v38 = vpack.c.bf16 %v1255_v37, %v1252_v36 }
  0x84   :  { %1058 = vmatmul.mubr.msk.bf16.vlgmr.msra.gmra.mrb[0].mxu0 %vm127_vm2, %v1236_v30 }
  0x85   :  { %1074 = vmatpush3.bf16.xpose.msra.mxu0 %v557_v31  ;;  %1075 = vmatprep.mubr.msk.bf16.mxu0 %vm1129_vm0, %v1127_v2 }
  0x86   :  { %1085 = vmatprep.subr.bf16.mxu0 %v1127_v2 }
  0x8c   :  { %1076 = vmatmul.mubr.msk.bf16.vlgmr.msra.gmra.mrb[4].mxu0 %vm127_vm2, %v551_v38 }
  0x8d   :  { %1086 = vmatpush3.bf16.msra.mxu0 %v551_v38  ;;  %1087 = vmatprep.mubr.msk.bf16.mxu0 %vm1129_vm0, %v1127_v2 }
 0x157   :  { %v1262_v39 = vpop.f32.mrb[0].mxu0 }
 0x158   :  { %v1059_v40 = vpop.f32.mrb[1].mxu0  ;;  %v175_v41 = vsel %vm92_vm1, %v1262_v39, -inf }
 0x159   :  { %176 = vmax.xlane.f32.xlu0 %v175_v41  ;;  %v1266_v42 = vpop.f32.mrb[2].mxu0 }
 0x15a   :  { %v1060_v43 = vpop.f32.mrb[3].mxu0  ;;  %v178_v44 = vsel %vm92_vm1, %v1266_v42, -inf }
 0x15b   :  { %179 = vmax.xlane.f32.xlu1 %v178_v44  ;;  %v197_v45 = vmax.f32 %v175_v41, %v178_v44 }
 0x15d   :  { %v198_v46 = vrot.slane %v197_v45, 4 }
 0x15f   :  { %v199_v47 = vmax.f32 %v197_v45, %v198_v46  ;;  %v1270_v48 = vpop.f32.mrb[4].mxu0 }
 0x160   :  { %v1077_v49 = vpop.f32.mrb[5].mxu0  ;;  %v600_v50 = vsel %vm92_vm1, %v1270_v48, -inf }
 0x161   :  { %v200_v51 = vrot.slane %v199_v47, 2  ;;  %601 = vmax.xlane.f32.xlu0 %v600_v50  ;;  %v1274_v52 = vpop.f32.mrb[6].mxu0 }
 0x162   :  { %v1078_v53 = vpop.f32.mrb[7].mxu0  ;;  %v603_v54 = vsel %vm92_vm1, %v1274_v52, -inf }
 0x163   :  { %v201_v55 = vmax.f32 %v199_v47, %v200_v51  ;;  %v622_v56 = vmax.f32 %v600_v50, %v603_v54 }
 0x165   :  { %v202_v57 = vrot.slane %v201_v55, 1  ;;  %604 = vmax.xlane.f32.xlu0 %v603_v54  ;;  %v623_v58 = vrot.slane %v622_v56, 4 }
 0x167   :  { %v203_v59 = vmax.f32 %v201_v55, %v202_v57  ;;  %v624_v60 = vmax.f32 %v622_v56, %v623_v58 }
 0x169   :  { %v204_v61 = vsub.f32 %v1262_v39, %v203_v59  ;;  %v205_v62 = vsub.f32 %v1266_v42, %v203_v59  ;;  %v625_v63 = vrot.slane %v624_v60, 2 }
 0x16b   :  { %v206_v0 = vmul.f32 1.442695, %v204_v61  ;;  %v208_v1 = vmul.f32 1.442695, %v205_v62  ;;  %v626_v3 = vmax.f32 %v624_v60, %v625_v63 }
 0x16d   :  { %1099 = vpow2.f32 %v206_v0  ;;  %v627_v4 = vrot.slane %v626_v3, 1 }
 0x16e   :  { %1101 = vpow2.f32 %v208_v1 }
 0x16f   :  { %v628_v5 = vmax.f32 %v626_v3, %v627_v4 }
 0x171   :  { %v629_v6 = vsub.f32 %v1270_v48, %v628_v5  ;;  %v630_v7 = vsub.f32 %v1274_v52, %v628_v5 }
 0x173   :  { %v631_v8 = vmul.f32 1.442695, %v629_v6  ;;  %v633_v9 = vmul.f32 1.442695, %v630_v7 }
 0x175   :  { %1103 = vpow2.f32 %v631_v8 }
 0x176   :  { %1105 = vpow2.f32 %v633_v9 }
 0x177   :  { %v1100_v10 = vpop.eup %1099 }
 0x178   :  { %v1102_v11 = vpop.eup %1101  ;;  %v210_v12 = vsel %vm92_vm1, %v1100_v10, 0.0 }
 0x179   :  { %v211_v13 = vsel %vm92_vm1, %v1102_v11, 0.0 }
 0x17a   :  { %v212_v14 = vadd.f32 %v211_v13, %v210_v12 }
 0x17c   :  { %v213_v17 = vrot.slane %v212_v14, 4 }
 0x17e   :  { %v214_v18 = vadd.f32 %v213_v17, %v212_v14 }
 0x17f   :  { %v1104_v19 = vpop.eup %1103 }
 0x180   :  { %v1106_v20 = vpop.eup %1105  ;;  %v635_v21 = vsel %vm92_vm1, %v1104_v19, 0.0  ;;  %v215_v22 = vrot.slane %v214_v18, 2 }
 0x181   :  { %v636_v23 = vsel %vm92_vm1, %v1106_v20, 0.0 }
 0x182   :  { %v216_v24 = vadd.f32 %v215_v22, %v214_v18  ;;  %v637_v31 = vadd.f32 %v636_v23, %v635_v21 }
 0x184   :  { %v217_v32 = vrot.slane %v216_v24, 1  ;;  %v638_v33 = vrot.slane %v637_v31, 4 }
 0x186   :  { %v218_v34 = vadd.f32 %v217_v32, %v216_v24  ;;  %v639_v35 = vadd.f32 %v638_v33, %v637_v31 }
 0x188   :  { %1107 = vrcp.f32 %v218_v34  ;;  %v640_v38 = vrot.slane %v639_v35, 2 }
 0x18a   :  { %v641_v40 = vadd.f32 %v640_v38, %v639_v35 }
 0x18c   :  { %v642_v41 = vrot.slane %v641_v40, 1 }
 0x18e   :  { %v643_v43 = vadd.f32 %v642_v41, %v641_v40 }
 0x190   :  { %1109 = vrcp.f32 %v643_v43 }
 0x192   :  { %v1108_v44 = vpop.eup %1107 }
 0x193   :  { %v220_v45 = vmul.f32 %v1108_v44, %v1100_v10  ;;  %v221_v46 = vmul.f32 %v1108_v44, %v1102_v11 }
 0x195   :  { %v267_v47 = vpack.c.bf16 %v221_v46, %v220_v45 }
 0x19a   :  { %v1110_v49 = vpop.eup %1109 }
 0x19b   :  { %v645_v50 = vmul.f32 %v1110_v49, %v1104_v19  ;;  %v646_v51 = vmul.f32 %v1110_v49, %v1106_v20 }
 0x19d   :  { %v692_v53 = vpack.c.bf16 %v646_v51, %v645_v50 }
 0x1e6   :  { %v177_v54 = vpop.xlane.xlu0 %176 }
 0x1e7   :  { %v181_v55 = vsub.f32 %v1262_v39, %v177_v54 }
 0x1e8   :  { %v180_v56 = vpop.xlane.xlu1 %179 }
 0x1e9   :  { %v183_v57 = vmul.f32 1.442695, %v181_v55  ;;  %v182_v58 = vsub.f32 %v1266_v42, %v180_v56 }
 0x1eb   :  { %1111 = vpow2.f32 %v183_v57  ;;  %v185_v59 = vmul.f32 1.442695, %v182_v58 }
 0x1ed   :  { %1113 = vpow2.f32 %v185_v59 }
 0x1ee   :  { %v602_v60 = vpop.xlane.xlu0 %601 }
 0x1ef   :  { %v606_v61 = vsub.f32 %v1270_v48, %v602_v60 }
 0x1f1   :  { %v608_v62 = vmul.f32 1.442695, %v606_v61 }
 0x1f2   :  { %v605_v63 = vpop.xlane.xlu0 %604 }
 0x1f3   :  { %1115 = vpow2.f32 %v608_v62  ;;  %v607_v0 = vsub.f32 %v1274_v52, %v605_v63 }
 0x1f5   :  { %v1112_v1 = vpop.eup %1111  ;;  %v610_v3 = vmul.f32 1.442695, %v607_v0 }
 0x1f6   :  { %v187_v4 = vsel %vm92_vm1, %v1112_v1, 0.0 }
 0x1f7   :  { %v1114_v39 = vpop.eup %1113  ;;  %1117 = vpow2.f32 %v610_v3  ;;  %188 = vadd.xlane.f32.xlu1 %v187_v4 }
 0x1f8   :  { %v190_v42 = vsel %vm92_vm1, %v1114_v39, 0.0 }
 0x1f9   :  { %191 = vadd.xlane.f32.xlu0 %v190_v42 }
 0x1fd   :  { %v1116_v5 = vpop.eup %1115 }
 0x1fe   :  { %v612_v6 = vsel %vm92_vm1, %v1116_v5, 0.0 }
 0x1ff   :  { %613 = vadd.xlane.f32.xlu1 %v612_v6 }
 0x201   :  { %v1118_v48 = vpop.eup %1117 }
 0x202   :  { %v615_v7 = vsel %vm92_vm1, %v1118_v48, 0.0 }
 0x203   :  { %616 = vadd.xlane.f32.xlu0 %v615_v7 }
 0x22c   :  { %268 = vxpose.xlu1.c.b16.start.end [1/1] (short) (narrow) %v267_v47, 16 }
 0x230   :  { %693 = vxpose.xlu0.c.b16.start.end [1/1] (short) (narrow) %v692_v53, 16 }
 0x284   :  { %v189_v52 = vpop.xlane.xlu1 %188 }
 0x285   :  { %1119 = vrcp.f32 %v189_v52 }
 0x286   :  { %v192_v8 = vpop.xlane.xlu0 %191 }
 0x287   :  { %1121 = vrcp.f32 %v192_v8 }
 0x28c   :  { %v614_v12 = vpop.xlane.xlu1 %613 }
 0x28f   :  { %v1120_v9 = vpop.eup %1119 }
 0x290   :  { %v617_v10 = vpop.xlane.xlu0 %616  ;;  %v194_v13 = vmul.f32 %v1120_v9, %v1112_v1 }
 0x291   :  { %v1122_v11 = vpop.eup %1121  ;;  %1123 = vrcp.f32 %v617_v10 }
 0x292   :  { %v196_v14 = vmul.f32 %v1122_v11, %v1114_v39  ;;  %1125 = vrcp.f32 %v614_v12  ;;  %v276_v19 = vpop.trf.xlu1 }
 0x294   :  { %v222_v17 = vpack.c.bf16 %v196_v14, %v194_v13 }
 0x296   :  { %1064 = vmatmul.mubr.msk.bf16.vlgmr.msra.gmra.mrb[0].mxu1 %vm92_vm1, %v222_v17  ;;  %v701_v18 = vpop.trf.xlu0 }
 0x297   :  { %1068 = vmatpush3.bf16.msra.mxu1 %v1236_v30  ;;  %1088 = vmatmul.mubr.msk.bf16.vlgmr.msra.gmra.mrb[8].mxu0 %vm92_vm1, %v701_v18 }
 0x298   :  { %1069 = vmatprep.mubr.msk.bf16.mxu1 %vm1129_vm0, %v1127_v2  ;;  %1079 = vmatprep.subr.bf16.mxu1 %v1127_v2 }
 0x29b   :  { %v1124_v20 = vpop.eup %1123 }
 0x29c   :  { %v1126_v21 = vpop.eup %1125  ;;  %v621_v22 = vmul.f32 %v1124_v20, %v1118_v48 }
 0x29d   :  { %v619_v23 = vmul.f32 %v1126_v21, %v1116_v5 }
 0x29e   :  { %1070 = vmatmul.mubr.msk.bf16.vlgmr.msra.gmra.mrb[4].mxu1 %vm92_vm1, %v276_v19 }
 0x29f   :  { %1080 = vmatpush3.bf16.msra.mxu1 %v1226_v27  ;;  %1081 = vmatprep.mubr.msk.bf16.mxu1 %vm1129_vm0, %v1127_v2  ;;  %v647_v30 = vpack.c.bf16 %v621_v22, %v619_v23 }
 0x2a6   :  { %1082 = vmatmul.mubr.msk.bf16.vlgmr.msra.gmra.mrb[8].mxu1 %vm92_vm1, %v647_v30 }
 0x369   :  { %v260_v24 = vpop.f32.mrb[0].mxu1 }
 0x36a   :  { %v328_v31 = vsub.f32 %v1229_v28, %v260_v24  ;;  %v330_v32 = vmul.f32 %v260_v24, %v1229_v28  ;;  %v1065_v33 = vpop.f32.mrb[1].mxu1  ;;  %v746_v34 = vpop.f32.mrb[8].mxu0  ;;  %v343_v35 = vsel %vm127_vm2, %v260_v24, 0.0  ;;  %v382_v38 = vsel %vm127_vm2, %v260_v24, -inf }
 0x36b   :  { %v833_v27 = vsub.f32 %v1217_v25, %v746_v34  ;;  %v835_v2 = vmul.f32 %v746_v34, %v1217_v25  ;;  %v263_v40 = vpop.f32.mrb[2].mxu1  ;;  %v1089_v41 = vpop.f32.mrb[9].mxu0  ;;  %v847_v45 = vsel %vm127_vm2, %v746_v34, 0.0  ;;  %v886_v46 = vsel %vm127_vm2, %v746_v34, -inf }
 0x36c   :  { %v353_v43 = vsel %vm127_vm2, %v328_v31, 0.0  ;;  %v363_v44 = vsel %vm127_vm2, %v330_v32, 0.0  ;;  %v1066_v47 = vpop.f32.mrb[3].mxu1  ;;  %v749_v49 = vpop.f32.mrb[10].mxu0  ;;  %v391_v50 = vsel %vm127_vm2, %v328_v31, -inf  ;;  %v400_v51 = vsel %vm127_vm2, %v330_v32, -inf }
 0x36d   :  { %v857_v53 = vsel %vm127_vm2, %v833_v27, 0.0  ;;  %v867_v54 = vsel %vm127_vm2, %v835_v2, 0.0  ;;  %v1090_v55 = vpop.f32.mrb[11].mxu0  ;;  %v329_v56 = vsub.f32 %v1232_v29, %v263_v40  ;;  %v331_v57 = vmul.f32 %v263_v40, %v1232_v29 }
 0x36e   :  { %v344_v58 = vsel %vm127_vm2, %v263_v40, 0.0  ;;  %v383_v59 = vsel %vm127_vm2, %v263_v40, -inf  ;;  %v834_v62 = vsub.f32 %v1220_v26, %v749_v49  ;;  %v836_v63 = vmul.f32 %v749_v49, %v1220_v26 }
 0x36f   :  { %v1323_v60 = vadd.f32 %v344_v58, %v343_v35  ;;  %v1325_v61 = vmax.f32 %v382_v38, %v383_v59  ;;  %v354_v0 = vsel %vm127_vm2, %v329_v56, 0.0  ;;  %v364_v1 = vsel %vm127_vm2, %v331_v57, 0.0 }
 0x370   :  { %v392_v3 = vsel %vm127_vm2, %v329_v56, -inf  ;;  %v401_v4 = vsel %vm127_vm2, %v331_v57, -inf  ;;  %v895_v39 = vsel %vm127_vm2, %v833_v27, -inf  ;;  %v904_v42 = vsel %vm127_vm2, %v835_v2, -inf }
 0x371   :  { %v1335_v5 = vadd.f32 %v354_v0, %v353_v43  ;;  %v1337_v6 = vadd.f32 %v364_v1, %v363_v44  ;;  %v321_v48 = vpop.f32.mrb[4].mxu1  ;;  %v1339_v7 = vmax.f32 %v391_v50, %v392_v3  ;;  %v1341_v52 = vmax.f32 %v400_v51, %v401_v4 }
 0x372   :  { %v848_v8 = vsel %vm127_vm2, %v749_v49, 0.0  ;;  %v858_v9 = vsel %vm127_vm2, %v834_v62, 0.0  ;;  %v1071_v10 = vpop.f32.mrb[5].mxu1  ;;  %v868_v13 = vsel %vm127_vm2, %v836_v63, 0.0  ;;  %v887_v14 = vsel %vm127_vm2, %v749_v49, -inf }
 0x373   :  { %v1345_v11 = vadd.f32 %v848_v8, %v847_v45  ;;  %v1347_v12 = vadd.f32 %v858_v9, %v857_v53  ;;  %v324_v17 = vpop.f32.mrb[6].mxu1  ;;  %v1351_v18 = vadd.f32 %v868_v13, %v867_v54  ;;  %v888_v19 = vmax.f32 %v886_v46, %v887_v14 }
 0x374   :  { %v896_v20 = vsel %vm127_vm2, %v834_v62, -inf  ;;  %v905_v21 = vsel %vm127_vm2, %v836_v63, -inf  ;;  %v1072_v22 = vpop.f32.mrb[7].mxu1  ;;  %v409_v24 = vsub.f32 %v1199_v16, %v321_v48  ;;  %v411_v31 = vmul.f32 %v321_v48, %v1199_v16 }
 0x375   :  { %v897_v23 = vmax.f32 %v895_v39, %v896_v20  ;;  %v906_v30 = vmax.f32 %v904_v42, %v905_v21  ;;  %v423_v32 = vsel %vm127_vm2, %v321_v48, 0.0  ;;  %v462_v33 = vsel %vm127_vm2, %v321_v48, -inf }
 0x376   :  { %v433_v34 = vsel %vm127_vm2, %v409_v24, 0.0  ;;  %v471_v35 = vsel %vm127_vm2, %v409_v24, -inf  ;;  %v410_v38 = vsub.f32 %v1196_v15, %v324_v17  ;;  %v412_v27 = vmul.f32 %v324_v17, %v1196_v15 }
 0x377   :  { %v443_v2 = vsel %vm127_vm2, %v411_v31, 0.0  ;;  %v480_v40 = vsel %vm127_vm2, %v411_v31, -inf  ;;  %v424_v41 = vsel %vm127_vm2, %v324_v17, 0.0  ;;  %v463_v43 = vsel %vm127_vm2, %v324_v17, -inf }
 0x378   :  { %v1367_v44 = vadd.f32 %v424_v41, %v423_v32  ;;  %v434_v45 = vsel %vm127_vm2, %v410_v38, 0.0  ;;  %v444_v46 = vsel %vm127_vm2, %v412_v27, 0.0  ;;  %v1371_v47 = vmax.f32 %v462_v33, %v463_v43 }
 0x379   :  { %v685_v49 = vpop.f32.mrb[8].mxu1  ;;  %v1373_v50 = vadd.f32 %v434_v45, %v433_v34  ;;  %v1375_v51 = vadd.f32 %v444_v46, %v443_v2  ;;  %v472_v53 = vsel %vm127_vm2, %v410_v38, -inf  ;;  %v481_v54 = vsel %vm127_vm2, %v412_v27, -inf }
 0x37a   :  { %v1083_v55 = vpop.f32.mrb[9].mxu1  ;;  %v850_v56 = vrot.slane %v1345_v11, 4  ;;  %v889_v57 = vrot.slane %v888_v19, 4  ;;  %v1380_v58 = vmax.f32 %v471_v35, %v472_v53  ;;  %v1382_v59 = vmax.f32 %v480_v40, %v481_v54 }
 0x37b   :  { %v688_v62 = vpop.f32.mrb[10].mxu1  ;;  %v753_v63 = vsub.f32 %v1252_v36, %v685_v49  ;;  %v755_v0 = vmul.f32 %v685_v49, %v1252_v36  ;;  %v767_v1 = vsel %vm127_vm2, %v685_v49, 0.0  ;;  %v806_v3 = vsel %vm127_vm2, %v685_v49, -inf }
 0x37c   :  { %v1084_v4 = vpop.f32.mrb[11].mxu1  ;;  %v754_v39 = vsub.f32 %v1255_v37, %v688_v62  ;;  %v756_v42 = vmul.f32 %v688_v62, %v1255_v37  ;;  %v768_v48 = vsel %vm127_vm2, %v688_v62, 0.0  ;;  %v807_v8 = vsel %vm127_vm2, %v688_v62, -inf }
 0x37d   :  { %v777_v9 = vsel %vm127_vm2, %v753_v63, 0.0  ;;  %v787_v10 = vsel %vm127_vm2, %v755_v0, 0.0  ;;  %v815_v13 = vsel %vm127_vm2, %v753_v63, -inf  ;;  %v824_v14 = vsel %vm127_vm2, %v755_v0, -inf }
 0x37e   :  { %v1396_v17 = vadd.f32 %v768_v48, %v767_v1  ;;  %v778_v20 = vsel %vm127_vm2, %v754_v39, 0.0  ;;  %v788_v21 = vsel %vm127_vm2, %v756_v42, 0.0  ;;  %v1400_v22 = vmax.f32 %v806_v3, %v807_v8 }
 0x37f   :  { %v1402_v24 = vadd.f32 %v778_v20, %v777_v9  ;;  %v1404_v31 = vadd.f32 %v788_v21, %v787_v10  ;;  %v816_v32 = vsel %vm127_vm2, %v754_v39, -inf  ;;  %v825_v33 = vsel %vm127_vm2, %v756_v42, -inf }
 0x380   :  { %v385_v34 = vrot.slane %v1325_v61, 4  ;;  %v1409_v35 = vmax.f32 %v815_v13, %v816_v32  ;;  %v1411_v38 = vmax.f32 %v824_v14, %v825_v33  ;;  %v890_v27 = vmax.f32 %v888_v19, %v889_v57 }
 0x381   :  { %v851_v2 = vadd.f32 %v850_v56, %v1345_v11  ;;  %v898_v40 = vrot.slane %v897_v23, 4  ;;  %v907_v41 = vrot.slane %v906_v30, 4  ;;  %v870_v43 = vrot.slane %v1351_v18, 4 }
 0x382   :  { %v860_v45 = vrot.slane %v1347_v12, 4  ;;  %v394_v46 = vrot.slane %v1339_v7, 4  ;;  %v891_v49 = vrot.slane %v890_v27, 2  ;;  %v386_v19 = vmax.f32 %v1325_v61, %v385_v34 }
 0x383   :  { %v852_v53 = vrot.slane %v851_v2, 2  ;;  %v899_v54 = vmax.f32 %v897_v23, %v898_v40  ;;  %v908_v55 = vmax.f32 %v906_v30, %v907_v41  ;;  %v871_v62 = vadd.f32 %v870_v43, %v1351_v18 }
 0x384   :  { %v861_v63 = vadd.f32 %v860_v45, %v1347_v12  ;;  %v395_v11 = vmax.f32 %v1339_v7, %v394_v46  ;;  %v892_v56 = vmax.f32 %v890_v27, %v891_v49  ;;  %v346_v3 = vrot.slane %v1323_v60, 4 }
 0x385   :  { %v853_v57 = vadd.f32 %v852_v53, %v851_v2  ;;  %v900_v0 = vrot.slane %v899_v54, 2  ;;  %v909_v1 = vrot.slane %v908_v55, 2  ;;  %v872_v4 = vrot.slane %v871_v62, 2 }
 0x386   :  { %v862_v39 = vrot.slane %v861_v63, 2  ;;  %v893_v42 = vrot.slane %v892_v56, 1  ;;  %v387_v9 = vrot.slane %v386_v19, 2  ;;  %v396_v12 = vrot.slane %v395_v11, 2 }
 0x387   :  { %v854_v48 = vrot.slane %v853_v57, 1  ;;  %v901_v23 = vmax.f32 %v899_v54, %v900_v0  ;;  %v910_v30 = vmax.f32 %v908_v55, %v909_v1  ;;  %v873_v8 = vadd.f32 %v872_v4, %v871_v62 }
 0x388   :  { %v863_v18 = vadd.f32 %v862_v39, %v861_v63  ;;  %v894_v10 = vmax.f32 %v892_v56, %v893_v42  ;;  %v426_v7 = vrot.slane %v1367_v44, 4  ;;  %v465_v14 = vrot.slane %v1371_v47, 4 }
 0x389   :  { %v855_v61 = vadd.f32 %v854_v48, %v853_v57  ;;  %v902_v13 = vrot.slane %v901_v23, 1  ;;  %v911_v20 = vrot.slane %v910_v30, 1  ;;  %v874_v21 = vrot.slane %v873_v8, 1 }
 0x38a   :  { %v770_v32 = vrot.slane %v1396_v17, 4  ;;  %950 = vrot.lane.b32.xlu1 %v894_v10, %s1130_s0  ;;  %v864_v34 = vrot.slane %v863_v18, 1  ;;  %v347_v27 = vadd.f32 %v346_v3, %v1323_v60  ;;  %v388_v40 = vmax.f32 %v386_v19, %v387_v9 }
 0x38b   :  { %v856_v33 = vmul.f32 0.0625, %v855_v61  ;;  %v903_v2 = vmax.f32 %v901_v23, %v902_v13  ;;  %v397_v41 = vmax.f32 %v395_v11, %v396_v12  ;;  %v356_v43 = vrot.slane %v1335_v5, 4 }
 0x38c   :  { %v875_v45 = vadd.f32 %v874_v21, %v873_v8  ;;  %v348_v46 = vrot.slane %v347_v27, 2  ;;  %v403_v49 = vrot.slane %v1341_v52, 4  ;;  %v366_v53 = vrot.slane %v1337_v6, 4 }
 0x38d   :  { %938 = vrot.lane.b32.xlu0 %v856_v33, %s1130_s0  ;;  %v912_v54 = vmax.f32 %v910_v30, %v911_v20  ;;  %v357_v55 = vadd.f32 %v356_v43, %v1335_v5  ;;  %v466_v62 = vmax.f32 %v1371_v47, %v465_v14  ;;  %v427_v60 = vadd.f32 %v426_v7, %v1367_v44 }
 0x38e   :  { %954 = vrot.lane.b32.xlu1 %v903_v2, %s1131_s19  ;;  %v865_v63 = vadd.f32 %v864_v34, %v863_v18  ;;  %v349_v19 = vadd.f32 %v348_v46, %v347_v27  ;;  %v404_v11 = vmax.f32 %v1341_v52, %v403_v49  ;;  %v367_v56 = vadd.f32 %v366_v53, %v1337_v6 }
 0x38f   :  { %v389_v57 = vrot.slane %v388_v40, 1  ;;  %v358_v0 = vrot.slane %v357_v55, 2  ;;  %v474_v1 = vrot.slane %v1380_v58, 4  ;;  %v876_v5 = vmul.f32 0.0625, %v875_v45 }
 0x390   :  { %v350_v47 = vrot.slane %v349_v19, 1  ;;  %v405_v3 = vrot.slane %v404_v11, 2  ;;  %v368_v44 = vrot.slane %v367_v56, 2  ;;  %v467_v39 = vrot.slane %v466_v62, 2 }
 0x391   :  { %958 = vrot.lane.b32.xlu0 %v912_v54, %s1132_s20  ;;  %v359_v4 = vadd.f32 %v358_v0, %v357_v55  ;;  %v428_v42 = vrot.slane %v427_v60, 2  ;;  %v771_v48 = vadd.f32 %v770_v32, %v1396_v17  ;;  %v866_v52 = vmul.f32 0.0625, %v865_v63 }
 0x392   :  { %946 = vrot.lane.b32.xlu1 %v876_v5, %s1132_s20  ;;  %v398_v6 = vrot.slane %v397_v41, 1  ;;  %v406_v30 = vmax.f32 %v404_v11, %v405_v3  ;;  %v369_v8 = vadd.f32 %v368_v44, %v367_v56  ;;  %v475_v18 = vmax.f32 %v1380_v58, %v474_v1 }
 0x393   :  { %v360_v23 = vrot.slane %v359_v4, 1  ;;  %v390_v9 = vmax.f32 %v388_v40, %v389_v57  ;;  %v351_v12 = vadd.f32 %v350_v47, %v349_v19  ;;  %v468_v10 = vmax.f32 %v466_v62, %v467_v39 }
 0x394   :  { %v429_v61 = vadd.f32 %v428_v42, %v427_v60  ;;  %v772_v13 = vrot.slane %v771_v48, 2  ;;  %v399_v7 = vmax.f32 %v397_v41, %v398_v6  ;;  %v436_v14 = vrot.slane %v1373_v50, 4 }
 0x395   :  { %942 = vrot.lane.b32.xlu0 %v866_v52, %s1131_s19  ;;  %v361_v17 = vadd.f32 %v360_v23, %v359_v4  ;;  %v827_v20 = vrot.slane %v1411_v38, 4  ;;  %v407_v21 = vrot.slane %v406_v30, 1  ;;  %v370_v32 = vrot.slane %v369_v8, 1 }
 0x396   :  { %502 = vrot.lane.b32.xlu1 %v390_v9, %s1130_s0  ;;  %v476_v33 = vrot.slane %v475_v18, 2  ;;  %v809_v58 = vrot.slane %v1400_v22, 4  ;;  %v352_v34 = vmul.f32 0.0625, %v351_v12  ;;  %v437_v27 = vadd.f32 %v436_v14, %v1373_v50 }
 0x397   :  { %v469_v2 = vrot.slane %v468_v10, 1  ;;  %v430_v40 = vrot.slane %v429_v61, 1  ;;  %v773_v43 = vadd.f32 %v772_v13, %v771_v48  ;;  %v780_v41 = vrot.slane %v1402_v24, 4 }
 0x398   :  { %v362_v45 = vmul.f32 0.0625, %v361_v17  ;;  %v438_v46 = vrot.slane %v437_v27, 2  ;;  %v828_v49 = vmax.f32 %v1411_v38, %v827_v20  ;;  %v446_v53 = vrot.slane %v1375_v51, 4 }
 0x399   :  { %506 = vrot.lane.b32.xlu0 %v399_v7, %s1131_s19  ;;  %v408_v54 = vmax.f32 %v406_v30, %v407_v21  ;;  %v371_v55 = vadd.f32 %v370_v32, %v369_v8  ;;  %v477_v62 = vmax.f32 %v475_v18, %v476_v33  ;;  %v781_v60 = vadd.f32 %v780_v41, %v1402_v24 }
 0x39a   :  { %490 = vrot.lane.b32.xlu1 %v352_v34, %s1130_s0  ;;  %v439_v50 = vadd.f32 %v438_v46, %v437_v27  ;;  %v810_v63 = vmax.f32 %v1400_v22, %v809_v58  ;;  %v818_v19 = vrot.slane %v1409_v35, 4  ;;  %v790_v11 = vrot.slane %v1404_v31, 4 }
 0x39b   :  { %v470_v56 = vmax.f32 %v468_v10, %v469_v2  ;;  %v431_v57 = vadd.f32 %v430_v40, %v429_v61  ;;  %v774_v38 = vrot.slane %v773_v43, 1  ;;  %v829_v0 = vrot.slane %v828_v49, 2 }
 0x39c   :  { %v782_v1 = vrot.slane %v781_v60, 2  ;;  %v447_v5 = vadd.f32 %v446_v53, %v1375_v51  ;;  %v372_v47 = vmul.f32 0.0625, %v371_v55  ;;  %v478_v24 = vrot.slane %v477_v62, 1 }
 0x39d   :  { %494 = vrot.lane.b32.xlu0 %v362_v45, %s1131_s19  ;;  %v440_v3 = vrot.slane %v439_v50, 1  ;;  %v811_v44 = vrot.slane %v810_v63, 2  ;;  %v819_v22 = vmax.f32 %v1409_v35, %v818_v19  ;;  %v791_v4 = vadd.f32 %v790_v11, %v1404_v31 }
 0x39e   :  { %510 = vrot.lane.b32.xlu1 %v408_v54, %s1132_s20  ;;  %v432_v39 = vmul.f32 0.0625, %v431_v57  ;;  %v775_v42 = vadd.f32 %v774_v38, %v773_v43  ;;  %v830_v48 = vmax.f32 %v828_v49, %v829_v0  ;;  %v783_v52 = vadd.f32 %v782_v1, %v781_v60 }
 0x39f   :  { %v448_v6 = vrot.slane %v447_v5, 2  ;;  %v479_v23 = vmax.f32 %v477_v62, %v478_v24  ;;  %v483_v51 = vrot.slane %v1382_v59, 4  ;;  %v441_v30 = vadd.f32 %v440_v3, %v439_v50 }
 0x3a0   :  { %v812_v8 = vmax.f32 %v810_v63, %v811_v44  ;;  %v820_v18 = vrot.slane %v819_v22, 2  ;;  %v792_v9 = vrot.slane %v791_v4, 2  ;;  %v776_v35 = vmul.f32 0.0625, %v775_v42 }
 0x3a1   :  { %526 = vrot.lane.b32.xlu0 %v470_v56, %s1130_s0  ;;  %v831_v31 = vrot.slane %v830_v48, 1  ;;  %v784_v12 = vrot.slane %v783_v52, 1  ;;  %v449_v10 = vadd.f32 %v448_v6, %v447_v5  ;;  %v484_v61 = vmax.f32 %v1382_v59, %v483_v51 }
 0x3a2   :  { %498 = vrot.lane.b32.xlu1 %v372_v47, %s1132_s20  ;;  %v442_v13 = vmul.f32 0.0625, %v441_v30  ;;  %v813_v7 = vrot.slane %v812_v8, 1  ;;  %v821_v17 = vmax.f32 %v819_v22, %v820_v18  ;;  %v793_v14 = vadd.f32 %v792_v9, %v791_v4 }
 0x3a3   :  { %v832_v20 = vmax.f32 %v830_v48, %v831_v31  ;;  %v785_v21 = vadd.f32 %v784_v12, %v783_v52  ;;  %v450_v32 = vrot.slane %v449_v10, 1  ;;  %v485_v27 = vrot.slane %v484_v61, 2 }
 0x3a4   :  { %v814_v33 = vmax.f32 %v812_v8, %v813_v7  ;;  %v822_v58 = vrot.slane %v821_v17, 1  ;;  %v794_v34 = vrot.slane %v793_v14, 1  ;;  %v837_v50 = vsel %vm127_vm2, %v1217_v25, 0.0 }
 0x3a5   :  { %514 = vrot.lane.b32.xlu0 %v432_v39, %s1130_s0  ;;  %v786_v59 = vmul.f32 0.0625, %v785_v21  ;;  %v451_v2 = vadd.f32 %v450_v32, %v449_v10  ;;  %v486_v41 = vmax.f32 %v484_v61, %v485_v27  ;;  %v838_v63 = vsel %vm127_vm2, %v1220_v26, 0.0 }
 0x3a6   :  { %530 = vrot.lane.b32.xlu1 %v479_v23, %s1131_s19  ;;  %v823_v40 = vmax.f32 %v821_v17, %v822_v58  ;;  %v795_v43 = vadd.f32 %v794_v34, %v793_v14  ;;  %v877_v11 = vsel %vm127_vm2, %v1217_v25, -inf  ;;  %v878_v56 = vsel %vm127_vm2, %v1220_v26, -inf }
 0x3a7   :  { %v452_v45 = vmul.f32 0.0625, %v451_v2  ;;  %v487_v49 = vrot.slane %v486_v41, 1  ;;  %v332_v57 = vsel %vm127_vm2, %v1229_v28, 0.0  ;;  %v333_v38 = vsel %vm127_vm2, %v1232_v29, 0.0 }
 0x3a8   :  { %v796_v46 = vmul.f32 0.0625, %v795_v43  ;;  %v757_v0 = vsel %vm127_vm2, %v1252_v36, 0.0  ;;  %v758_v1 = vsel %vm127_vm2, %v1255_v37, 0.0  ;;  %v414_v25 = vsel %vm127_vm2, %v1196_v15, 0.0 }
 0x3a9   :  { %914 = vrot.lane.b32.xlu0 %v776_v35, %s1130_s0  ;;  %v488_v53 = vmax.f32 %v486_v41, %v487_v49  ;;  %v839_v47 = vadd.f32 %v838_v63, %v837_v50  ;;  %v797_v26 = vsel %vm127_vm2, %v1252_v36, -inf  ;;  %v798_v24 = vsel %vm127_vm2, %v1255_v37, -inf }
 0x3aa   :  { %518 = vrot.lane.b32.xlu1 %v442_v13, %s1131_s19  ;;  %v373_v3 = vsel %vm127_vm2, %v1229_v28, -inf  ;;  %v374_v44 = vsel %vm127_vm2, %v1232_v29, -inf  ;;  %v879_v22 = vmax.f32 %v877_v11, %v878_v56  ;;  %v413_v39 = vsel %vm127_vm2, %v1199_v16, 0.0 }
 0x3ab   :  { %v454_v42 = vsel %vm127_vm2, %v1196_v15, -inf  ;;  %v334_v48 = vadd.f32 %v333_v38, %v332_v57  ;;  %v759_v36 = vadd.f32 %v758_v1, %v757_v0  ;;  %v415_v52 = vadd.f32 %v414_v25, %v413_v39 }
 0x3ac   :  { %v799_v6 = vmax.f32 %v797_v26, %v798_v24  ;;  %v453_v28 = vsel %vm127_vm2, %v1199_v16, -inf  ;;  %v375_v23 = vmax.f32 %v373_v3, %v374_v44  ;;  %v840_v29 = vrot.slane %v839_v47, 4 }
 0x3ad   :  { %934 = vrot.lane.b32.xlu0 %v832_v20, %s1132_s20  ;;  %v455_v51 = vmax.f32 %v453_v28, %v454_v42  ;;  %v880_v30 = vrot.slane %v879_v22, 4  ;;  %v335_v18 = vrot.slane %v334_v48, 4  ;;  %v760_v9 = vrot.slane %v759_v36, 4 }
 0x3ae   :  { %926 = vrot.lane.b32.xlu1 %v814_v33, %s1130_s0  ;;  %v416_v35 = vrot.slane %v415_v52, 4  ;;  %v800_v31 = vrot.slane %v799_v6, 4  ;;  %v376_v12 = vrot.slane %v375_v23, 4  ;;  %v841_v10 = vadd.f32 %v840_v29, %v839_v47 }
 0x3af   :  { %v456_v61 = vrot.slane %v455_v51, 4  ;;  %v881_v13 = vmax.f32 %v879_v22, %v880_v30  ;;  %v336_v17 = vadd.f32 %v335_v18, %v334_v48  ;;  %v761_v16 = vadd.f32 %v760_v9, %v759_v36 }
 0x3b0   :  { %v417_v20 = vadd.f32 %v416_v35, %v415_v52  ;;  %v801_v21 = vmax.f32 %v799_v6, %v800_v31  ;;  %v842_v32 = vrot.slane %v841_v10, 2  ;;  %v377_v33 = vmax.f32 %v375_v23, %v376_v12 }
 0x3b1   :  { %918 = vrot.lane.b32.xlu0 %v786_v59, %s1131_s19  ;;  %v882_v58 = vrot.slane %v881_v13, 2  ;;  %v457_v34 = vmax.f32 %v455_v51, %v456_v61  ;;  %v337_v59 = vrot.slane %v336_v17, 2  ;;  %v762_v2 = vrot.slane %v761_v16, 2 }
 0x3b2   :  { %930 = vrot.lane.b32.xlu1 %v823_v40, %s1131_s19  ;;  %v418_v40 = vrot.slane %v417_v20, 2  ;;  %v802_v41 = vrot.slane %v801_v21, 2 }
 0x3b3   :  { %v883_v49 = vmax.f32 %v881_v13, %v882_v58  ;;  %v338_v63 = vadd.f32 %v337_v59, %v336_v17  ;;  %v763_v11 = vadd.f32 %v762_v2, %v761_v16  ;;  %v1133_v13 = vmov 1983009808  }
 0x3b4   :  { %v419_v56 = vadd.f32 %v418_v40, %v417_v20  ;;  %v803_v38 = vmax.f32 %v801_v21, %v802_v41  ;;  %v997_v17 = vunpack.c.l.s4 %v1133_v13  ;;  %v999_v16 = vlaneseq }
 0x3b5   :  { %522 = vrot.lane.b32.xlu0 %v452_v45, %s1132_s20  ;;  %v843_v45 = vadd.f32 %v842_v32, %v841_v10  ;;  %v884_v25 = vrot.slane %v883_v49, 1  ;;  %v339_v24 = vrot.slane %v338_v63, 1  ;;  %v764_v3 = vrot.slane %v763_v11, 1 }
 0x3b6   :  { %922 = vrot.lane.b32.xlu1 %v796_v46, %s1132_s20  ;;  %v378_v46 = vrot.slane %v377_v33, 2  ;;  %v420_v44 = vrot.slane %v419_v56, 1  ;;  %v804_v39 = vrot.slane %v803_v38, 1 }
 0x3b7   :  { %v844_v0 = vrot.slane %v843_v45, 1  ;;  %v885_v36 = vmax.f32 %v883_v49, %v884_v25  ;;  %v340_v28 = vadd.f32 %v339_v24, %v338_v63  ;;  %v765_v23 = vadd.f32 %v764_v3, %v763_v11 }
 0x3b8   :  { %v379_v1 = vmax.f32 %v377_v33, %v378_v46  ;;  %v421_v51 = vadd.f32 %v420_v44, %v419_v56  ;;  %v805_v30 = vmax.f32 %v803_v38, %v804_v39  ;;  %v998_v46 = vunpack.c.0.s8 %v997_v17 }
 0x3b9   :  { %v845_v42 = vadd.f32 %v844_v0, %v843_v45  ;;  %v766_v21 = vmul.f32 0.0625, %v765_v23  ;;  %v1000_v49 = vshrl.u32 %v999_v16, 7 }
 0x3ba   :  { %534 = vrot.lane.b32.xlu1 %v488_v53, %s1132_s20  ;;  %v458_v53 = vrot.slane %v457_v34, 2  ;;  %v380_v48 = vrot.slane %v379_v1, 1  ;;  %v422_v58 = vmul.f32 0.0625, %v421_v51 }
 0x3bb   :  { %v846_v9 = vmul.f32 0.0625, %v845_v42  ;;  %v1001_v24 = vsub.s32 %v998_v46, %v1000_v49 }
 0x3bc   :  { %v459_v47 = vmax.f32 %v457_v34, %v458_v53  ;;  %v381_v31 = vmax.f32 %v379_v1, %v380_v48 }
 0x3be   :  { %v460_v52 = vrot.slane %v459_v47, 1 }
 0x3c0   :  { %v461_v12 = vmax.f32 %v459_v47, %v460_v52 }
 0x3fc   :  { %v1477_v54 = vpop.permute.xlu1 %950 }
 0x3fd   :  { %v970_v29 = vsel %vm127_vm2, %v885_v36, %v1477_v54  ;;  %v342_v54 = vmul.f32 0.0625, %v340_v28 }
 0x3ff   :  { %v1479_v55 = vpop.permute.xlu0 %938 }
 0x400   :  { %v1481_v62 = vpop.permute.xlu1 %954  ;;  %v967_v20 = vsel %vm127_vm2, %v846_v9, %v1479_v55 }
 0x401   :  { %v971_v35 = vsel %vm538_vm3, %v970_v29, %v1481_v62 }
 0x403   :  { %v1483_v60 = vpop.permute.xlu0 %958 }
 0x404   :  { %v1489_v19 = vpop.permute.xlu1 %946  ;;  %v972_v33 = vsel %vm540_vm4, %v971_v35, %v1483_v60 }
 0x407   :  { %v1503_v5 = vpop.permute.xlu0 %942 }
 0x408   :  { %v1515_v4 = vpop.permute.xlu1 %502  ;;  %v968_v62 = vsel %vm538_vm3, %v967_v20, %v1503_v5  ;;  %v980_v5 = vrot.slane %v972_v33, 7 }
 0x409   :  { %v542_v59 = vsel %vm127_vm2, %v381_v31, %v1515_v4  ;;  %v969_v53 = vsel %vm540_vm4, %v968_v62, %v1489_v19 }
 0x40a   :  { %v979_v1 = vrot.slane %v969_v53, 7 }
 0x40b   :  { %v1521_v37 = vpop.permute.xlu0 %506 }
 0x40c   :  { %v1525_v8 = vpop.permute.xlu1 %490 }
 0x40d   :  { %v537_v2 = vsel %vm127_vm2, %v342_v54, %v1525_v8  ;;  %v543_v8 = vsel %vm538_vm3, %v542_v59, %v1521_v37 }
 0x40f   :  { %v1527_v15 = vpop.permute.xlu0 %494 }
 0x410   :  { %v1529_v7 = vpop.permute.xlu1 %510  ;;  %v539_v11 = vsel %vm538_vm3, %v537_v2, %v1527_v15 }
 0x411   :  { %v544_v38 = vsel %vm540_vm4, %v543_v8, %v1529_v7 }
 0x413   :  { %v1531_v14 = vpop.permute.xlu0 %526 }
 0x414   :  { %v1533_v27 = vpop.permute.xlu1 %498  ;;  %v548_v19 = vsel %vm127_vm2, %v461_v12, %v1531_v14 }
 0x417   :  { %v1535_v43 = vpop.permute.xlu0 %514 }
 0x418   :  { %v1537_v50 = vpop.permute.xlu1 %530  ;;  %v545_v4 = vsel %vm127_vm2, %v422_v58, %v1535_v43  ;;  %v541_v43 = vsel %vm540_vm4, %v539_v11, %v1533_v27 }
 0x419   :  { %v549_v37 = vsel %vm538_vm3, %v548_v19, %v1537_v50 }
 0x41b   :  { %v915_v57 = vpop.permute.xlu0 %914 }
 0x41c   :  { %v519_v26 = vpop.permute.xlu1 %518  ;;  %v961_v55 = vsel %vm127_vm2, %v766_v21, %v915_v57 }
 0x41d   :  { %v546_v56 = vsel %vm538_vm3, %v545_v4, %v519_v26 }
 0x41f   :  { %v935_v22 = vpop.permute.xlu0 %934 }
 0x420   :  { %v927_v6 = vpop.permute.xlu1 %926 }
 0x421   :  { %v964_v10 = vsel %vm127_vm2, %v805_v30, %v927_v6 }
 0x423   :  { %v919_v18 = vpop.permute.xlu0 %918 }
 0x424   :  { %v931_v61 = vpop.permute.xlu1 %930  ;;  %v962_v40 = vsel %vm538_vm3, %v961_v55, %v919_v18 }
 0x425   :  { %v965_v32 = vsel %vm538_vm3, %v964_v10, %v931_v61 }
 0x426   :  { %v966_v34 = vsel %vm540_vm4, %v965_v32, %v935_v22 }
 0x427   :  { %v978_v41 = vrot.slane %v966_v34, 7  ;;  %v523_v45 = vpop.permute.xlu0 %522 }
 0x428   :  { %v923_v60 = vpop.permute.xlu1 %922  ;;  %v547_v0 = vsel %vm540_vm4, %v546_v56, %v523_v45 }
 0x429   :  { %v963_v63 = vsel %vm540_vm4, %v962_v40, %v923_v60  ;;  %v987_v25 = vsel %vm985_vm5, %v544_v38, %v978_v41  ;;  %v988_v14 = vsel %vm985_vm5, %v547_v0, %v979_v1 }
 0x42a   :  { %v977_v57 = vrot.slane %v963_v63, 7 }
 0x42c   :  { %v986_v15 = vsel %vm985_vm5, %v541_v43, %v977_v57  ;;  %v535_v47 = vpop.permute.xlu1 %534 }
 0x42d   :  { %v994_v26 = vcombine.low %v986_v15, %v987_v25  ;;  %v550_v7 = vsel %vm540_vm4, %v549_v37, %v535_v47 }
 0x42e   :  { %v989_v3 = vsel %vm985_vm5, %v550_v7, %v980_v5 }
 0x42f   :  { %v995_v27 = vcombine.low %v988_v14, %v989_v3  ;;  %v1002_v44 = vrot.slane %v994_v26, %v1001_v24 }
 0x431   :  { %v1009_v22 = vrot.slane %v995_v27, %v1001_v24 }
 0x433   :  { %v1010_v39 = vcombine.low %v1002_v44, %v1009_v22 }
 0x435   :  { %1012 = vst [vmem:[%s1589_s4] sm:$0xff] %v1010_v39 }

// kernel: sentence_pair_classifier.7
= control target key start
LH: loop header
LB: loop body
LE: loop exit
PB: predicated region body
PF: predicated region fallthrough
CT: control target
= control target key end

     0   :  { %10 = vsyncpa [#allocation4], 0  ;;  %s734_s18 = smov 0   ;;  %s807_s0 = inlined_call_operand.vmem [shape: f32[2,512], index: 0, kind: input, shape index: {}]   ;;  %s808_s1 = inlined_call_operand.vmem [shape: bf16[512,16], index: 1, kind: input, shape index: {}]   ;;  %s809_s2 = inlined_call_operand.vmem [shape: f32[1,16], index: 2, kind: input, shape index: {}]   ;;  %s810_s3 = inlined_call_operand.vmem [shape: bf16[16,3], index: 3, kind: input, shape index: {}]   ;;  %s811_s4 = inlined_call_operand.vmem [shape: f32[1,3], index: 4, kind: input, shape index: {}]   ;;  %s812_s5 = inlined_call_operand.hbm [shape: f32[2,3], index: 5, kind: output, shape index: {}]  }
   0x1 LB: > { %s740_s19 = sadd.s32 4294967295, %s698_s18   ;;  %p565_p0 = scmp.ge.s32.totalorder %s698_s18, 1  ;;  %s698_s18 = sphi %s734_s18, %s16_s18  }
   0x2   : > { %p195_p1 = scmp.lt.s32.totalorder %s698_s18, 3 }
   0x4   : > { %p196_p2 = pnand %p565_p0, %p195_p1 }
   0x5   : > { %s566_s20 = sshll.u32 (!%p196_p2), %s740_s19, 1  ;;  %s568_s21 = sshll.u32 (!%p196_p2), %s740_s19, 5 }
   0x6   : > { %199 = sbr.rel (%p196_p2) target bundleno = 527 (0x20f), region = 40  ;;  %p224_p3 = scmp.lt.s32.totalorder (!%p196_p2), %s566_s20, 3 }
   0x7   : > { %p230_p4 = scmp.lt.s32.totalorder (!%p196_p2), %s568_s21, 63  ;;  %p570_p5 = scmp.ne.s32.totalorder (!%p196_p2), %s740_s19, 0 }
   0xd   : > { %s814_s20 = smov (!%p224_p3, %s566_s20), 3  ;;  %s816_s21 = smov (!%p230_p4, %s568_s21), 63 }
   0xe   : > { %s567_s22 = sshll.u32 %s814_s20, 1  ;;  %s569_s26 = sshll.u32 %s816_s21, 2  ;;  %vm240_vm0 = vcmask (!%p570_p5), 123904   ;;  %v700_v0 = vmov (!%p570_p5), 0.0  }
   0xf   : > { %s227_s25 = scalar_lea.vmem %s807_s0, %s567_s22  ;;  %s752_s29 = scalar_lea.vmem %s808_s1, %s569_s26  ;;  %241 = vst.msk [vmem:[#allocation2] sm:$0x3] (!%p570_p5), %vm240_vm0, %v700_v0 }
  0x10   : > { %239 = sbr.rel (%p570_p5) target bundleno = 23 (0x17), region = 44 }
  0x17 PF: > { %v645_v1 = vld [vmem:[%s752_s29 + $0x40] sm:$0xff]   ;;  %v647_v3 = vld [vmem:[%s752_s29 + $0x48] sm:$0xff]   ;;  %v649_v5 = vld [vmem:[%s752_s29 + $0x50] sm:$0xff]   ;;  %vm426_vm1 = vcmask 123904   ;;  %p588_p6 = scmp.ne.s32.totalorder %s740_s19, 1 }
  0x18   : > { %v646_v2 = vld [vmem:[%s752_s29] sm:$0xff]   ;;  %597 = vmatprep.subr.bf16.mxu0 %v645_v1  ;;  %v648_v4 = vld [vmem:[%s752_s29 + $0x8] sm:$0xff]   ;;  %v650_v6 = vld [vmem:[%s752_s29 + $0x10] sm:$0xff]   ;;  %v701_v29 = vmov (!%p588_p6), 0.0   ;;  %vm702_vm2 = vmmov (!%p588_p6), 0   ;;  %vm458_vm3 = vcmask (!%p588_p6), 130048  }
  0x19   : > { %598 = vmatpush3.bf16.msra.mxu0 %v646_v2  ;;  %v651_v7 = vld [vmem:[%s752_s29 + $0x58] sm:$0xff]   ;;  %v653_v9 = vld [vmem:[%s752_s29 + $0x60] sm:$0xff]   ;;  %v655_v11 = vld [vmem:[%s752_s29 + $0x68] sm:$0xff]   ;;  %vm502_vm4 = vcmask (!%p588_p6), 17408  }
  0x1a   : > { %599 = vmatprep.subr.bf16.mxu0 %v647_v3  ;;  %v652_v8 = vld [vmem:[%s752_s29 + $0x18] sm:$0xff]   ;;  %v654_v10 = vld [vmem:[%s752_s29 + $0x20] sm:$0xff]   ;;  %v656_v14 = vld [vmem:[%s752_s29 + $0x28] sm:$0xff]  }
  0x1b   : > { %v571_v12 = vld.sshfl [vmem:[%s227_s25] sm:$0x33 pattern:$0x76325410]  ;;  %v657_v16 = vld [vmem:[%s752_s29 + $0x70] sm:$0xff]   ;;  %v659_v18 = vld [vmem:[%s752_s29 + $0x78] sm:$0xff]  }
  0x1c   : > { %v252_v13 = vcombine.high %v571_v12, %v571_v12  ;;  %v658_v17 = vld [vmem:[%s752_s29 + $0x30] sm:$0xff]   ;;  %v660_v19 = vld [vmem:[%s752_s29 + $0x38] sm:$0xff]   ;;  %v255_v20 = vpack.c.bf16 %v571_v12, %v571_v12  ;;  %v242_v22 = vld [vmem:[#allocation2] sm:$0x3] }
  0x1d   : > { %600 = vmatpush3.bf16.msra.mxu0 %v648_v4  ;;  %v661_v28 = vld [vmem:[%s810_s3] sm:$0xff] (!%p588_p6)  }
  0x1e   : > { %601 = vmatprep.subr.bf16.mxu0 %v649_v5  ;;  %v256_v15 = vpack.c.bf16 %v252_v13, %v252_v13  ;;  %v589_v31 = vld [vmem:[%s809_s2] ss:$0 sm:$0xff] (!%p588_p6) }
  0x1f   : > { %v590_v35 = vld [vmem:[%s811_s4] ss:$0 sm:$0xff] (!%p588_p6) }
  0x20   : > { %417 = vmatprep.mubr.bf16.mxu0 %v256_v15 }
  0x21   : > { %602 = vmatpush3.bf16.msra.mxu0 %v650_v6 }
  0x22   : > { %603 = vmatprep.subr.bf16.mxu0 %v651_v7 }
  0x25   : > { %604 = vmatpush3.bf16.msra.mxu0 %v652_v8 }
  0x26   : > { %605 = vmatprep.subr.bf16.mxu0 %v653_v9 }
  0x29   : > { %606 = vmatpush3.bf16.msra.mxu0 %v654_v10 }
  0x2a   : > { %607 = vmatprep.subr.bf16.mxu0 %v655_v11 }
  0x2d   : > { %608 = vmatpush3.bf16.msra.mxu0 %v656_v14 }
  0x2e   : > { %609 = vmatprep.subr.bf16.mxu0 %v657_v16 }
  0x31   : > { %610 = vmatpush3.bf16.msra.mxu0 %v658_v17 }
  0x32   : > { %611 = vmatprep.subr.bf16.mxu0 %v659_v18 }
  0x35   : > { %612 = vmatpush3.bf16.msra.mxu0 %v660_v19 }
  0x36   : > { %621 = vmatprep.subr.bf16.mxu0 (!%p588_p6), %v701_v29 }
  0x38   : > { %418 = vmatmul.mubr.bf16.vlgmr.msra.gmra.mrb[0].mxu0 %v255_v20 }
  0x39   : > { %622 = vmatpush3.bf16.msra.mxu0 (!%p588_p6), %v661_v28  ;;  %623 = vmatprep.mubr.msk.bf16.mxu0 (!%p588_p6), %vm702_vm2, %v701_v29 }
 0x10b   : > { %v613_v21 = vpop.f32.mrb[0].mxu0  ;;  %431 = sbr.rel (%p588_p6) target bundleno = 502 (0x1f6), region = 48 }
 0x10c   : > { %v614_v23 = vpop.f32.mrb[1].mxu0 }
 0x10d   : > { %v615_v24 = vadd.f32 %v614_v23, %v613_v21  ;;  %v616_v25 = vpop.f32.mrb[2].mxu0 }
 0x10e   : > { %v617_v26 = vpop.f32.mrb[3].mxu0 }
 0x10f   : > { %v425_v27 = vadd.f32 %v615_v24, %v242_v22 }
 0x111   : > { %427 = vst.msk [vmem:[#allocation2] sm:$0x3] %vm426_vm1, %v425_v27 }
 0x118   : > { %v432_v30 = vld [vmem:[#allocation2] sm:$0x3] }
 0x119   : > { %v440_v32 = vadd.f32 %v589_v31, %v432_v30 }
 0x11b   : > { %v441_v33 = vmax.f32 %v440_v32, 0.0 }
 0x11d   : > { %v442_v34 = vpack.c.bf16 %v441_v33, %v441_v33 }
 0x11f   : > { %624 = vmatmul.mubr.msk.bf16.vlgmr.msra.gmra.mrb[0].mxu0 %vm458_vm3, %v442_v34 }
 0x1f2   : > { %v496_v36 = vpop.f32.mrb[0].mxu0 }
 0x1f3   : > { %v497_v37 = vadd.f32 %v590_v35, %v496_v36  ;;  %v625_v38 = vpop.f32.mrb[1].mxu0 }
 0x1f4   : > { %v499_v39 = vpop.f32.mrb[2].mxu0 }
 0x1f5   : > { %503 = vst.msk [vmem:[#allocation3] sm:$0x3] %vm502_vm4, %v497_v37  ;;  %v626_v40 = vpop.f32.mrb[3].mxu0 }
 0x1f6 PF: > { %p631_p7 = scmp.eq.s32.totalorder %s740_s19, 1  ;;  %s703_s11 = smov [#allocation3]  }
 0x1f7   : > { %s511_s12 = sshll.u32 %s703_s11, 4  ;;  %s512_s12 = int_to_ptr.vmem [resolvable:$true] %s511_s12 }
 0x1f8   : > { %s662_s13 = scalar_lea.vmem %s512_s12, 32  ;;  %p669_p11 = scmp.lt.s32.totalorder %s512_s12, %s512_s12 }
 0x1f9   : > { %p663_p8 = scmp.ne.s32.totalorder %s512_s12, %s662_s13  ;;  %p670_p12 = scmp.lt.s32.totalorder %s662_s13, %s662_s13 }
 0x1fb   : > { %p664_p9 = pnand %p663_p8, %p631_p7  ;;  %p671_p13 = por %p670_p12, %p669_p11 }
 0x1fd   : > { %p665_p10 = pneg %p664_p9 }
 0x1ff   : > { %p672_p0 = pnand %p671_p13, %p665_p10 }
 0x201   : > { %675 = shalt.err (!%p672_p0)
}
 0x202   : > { %s676_s16 = scalar_lea.hbm %s812_s5, 32 }
 0x203   : > { %p677_p1 = scmp.ne.s32.totalorder %s812_s5, %s676_s16  ;;  %p682_p4 = scmp.lt.u32.totalorder %s676_s16, %s812_s5 }
 0x205   : > { %p678_p2 = pnand %p677_p1, %p631_p7 }
 0x207   : > { %p679_p3 = pneg %p678_p2 }
 0x209   : > { %p684_p5 = pnand %p682_p4, %p679_p3 }
 0x20b   : > { %687 = shalt.err (!%p684_p5)
}
 0x20c   : > { %628 = dma.vmem_to_hbm [thread:$0]  (%p631_p7), %s512_s12, 32, %s812_s5, [#allocation4]  }
 0x20d   : > { %693 = dma.done.wait (%p631_p7), [#allocation4], 32  }
 0x20e   : > { %695 = vsyncadd (%p631_p7), [#allocation4], 4294967264 }
 0x20f PF: > { %s16_s18 = sadd.s32 1, %s698_s18  }
 0x210   : > { %p13_p6 = scmp.ge.s32.totalorder %s16_s18, 4  }
 0x212   :  { %15 = sbr.rel (!%p13_p6) target bundleno = 1 (0x1), region = 78 }
 0x219   :  { %524 = vsyncpa [#allocation4], 1 }
 0x21a   :  { %526 = vsyncpa [#allocation4 + $0x1], 1 }

// kernel: sentence_pair_classifier.5
= control target key start
LH: loop header
LB: loop body
LE: loop exit
PB: predicated region body
PF: predicated region fallthrough
CT: control target
= control target key end

     0   :  { %s3056_s18 = smov 0   ;;  %s3058_s19 = smov 0   ;;  %s3787_s0 = inlined_call_operand.vmem [shape: f32[16,4,64], index: 0, kind: input, shape index: {}]   ;;  %s3788_s1 = inlined_call_operand.vmem [shape: f32[16,4,64], index: 1, kind: input, shape index: {}]   ;;  %s3789_s2 = inlined_call_operand.vmem [shape: bf16[16,64], index: 2, kind: input, shape index: {}]   ;;  %s3790_s3 = inlined_call_operand.vmem [shape: bf16[16,64], index: 3, kind: input, shape index: {}]   ;;  %s3791_s4 = inlined_call_operand.vmem [shape: f32[4,16,16], index: 4, kind: output, shape index: {0}]   ;;  %s3792_s5 = inlined_call_operand.vmem [shape: f32[4,16,16], index: 5, kind: output, shape index: {1}]  }
   0x1   :  { %s3060_s20 = smov 0   ;;  %s3062_s21 = smov 0  }
   0x2   :  { %s3064_s22 = smov 0  }
   0x3 LB: > { %s3077_s23 = sadd.s32 4294967295, %s3015_s22   ;;  %s3079_s24 = sadd.s32 1, %s3015_s22   ;;  %s3015_s22 = sphi %s3064_s22, %s3799_s22   ;;  %s3011_s21 = sphi %s3062_s21, %s3798_s21   ;;  %s3007_s20 = sphi %s3060_s20, %s3797_s20   ;;  %s3003_s19 = sphi %s3058_s19, %s3796_s19   ;;  %s2999_s18 = sphi %s3056_s18, %s3795_s18  }
   0x4   : > { %s116_s25 = ssub.s32 %s3015_s22, %s3079_s24  ;;  %s119_s26 = sadd.s32 1, %s3011_s21 }
   0x5   : > { %p117_p0 = scmp.eq.s32.totalorder %s116_s25, 0  ;;  %p129_p1 = scmp.ne.s32.totalorder %s3011_s21, %s3007_s20 }
   0x6   : > { %p130_p2 = scmp.eq.s32.totalorder %s3077_s23, 1  ;;  %s142_s27 = ssub.s32 1, %s3015_s22 }
   0x7   : > { %s3086_s28 = scalar_select %p117_p0, %s3011_s21, %s119_s26  }
   0x8   : > { %p3088_p3 = por %p130_p2, %p129_p1  ;;  %s143_s30 = ssub.s32 1, %s3079_s24 }
   0x9   : > { %s144_s6 = ssub.s32 %s142_s27, %s143_s30  ;;  %s147_s7 = sadd.s32 1, %s3003_s19 }
   0xa   : > { %p145_p4 = scmp.eq.s32.totalorder %s144_s6, 0  ;;  %p157_p5 = scmp.ne.s32.totalorder %s3003_s19, %s2999_s18 }
   0xb   : > { %p2608_p6 = scmp.ge.s32.totalorder %s3015_s22, 1  ;;  %p208_p7 = scmp.lt.s32.totalorder %s3015_s22, 3 }
   0xc   : > { %s3097_s8 = scalar_select %p145_p4, %s3003_s19, %s147_s7  }
   0xd   : > { %p3099_p8 = por %p157_p5, %p130_p2  ;;  %p209_p9 = pnand %p2608_p6, %p208_p7 }
   0xe   : > { %s236_s10 = sand.u32 (!%p209_p9), 1, %s3007_s20   ;;  %s242_s11 = sand.u32 (!%p209_p9), 1, %s2999_s18  }
   0xf   : > { %212 = sbr.rel (%p209_p9) target bundleno = 5698 (0x1642), region = 36  ;;  %s2609_s12 = sshll.u32 (!%p209_p9), %s236_s10, 5 }
  0x10   : > { %s2610_s13 = sshll.u32 (!%p209_p9), %s242_s11, 5  ;;  %s3105_s14 = sshll.u32 (!%p209_p9), %s3077_s23, 3 }
  0x11   : > { %s251_s15 = ssub.s32 (!%p209_p9), 1, %s3077_s23  ;;  %p246_p10 = scmp.lt.s32.totalorder (!%p209_p9), %s3105_s14, 15 }
  0x12   : > { %s3109_s16 = sshll.u32 (!%p209_p9), %s251_s15, 3  ;;  %s3124_s10 = scalar_lea.vmem (!%p209_p9), [#allocation6], %s2609_s12 }
  0x13   : > { %p253_p11 = scmp.lt.s32.totalorder (!%p209_p9), %s3109_s16, 15  ;;  %s3126_s11 = scalar_lea.vmem (!%p209_p9), [#allocation7], %s2610_s13 }
  0x14   : > { %p2615_p12 = scmp.ne.s32.totalorder (!%p209_p9), %s3077_s23, 0 }
  0x16   : > { %s247_s17 = scalar_select %p246_p10, %s3105_s14, 15 }
  0x17   : > { %s254_s22 = scalar_select %p253_p11, %s3109_s16, 15 }
  0x18   : > { %s2612_s20 = sshll.u32 %s247_s17, 2  ;;  %264 = sbr.rel (%p2615_p12) target bundleno = 31 (0x1f), region = 40  ;;  %vm265_vm0 = vcmask (!%p2615_p12), 125952   ;;  %v3017_v0 = vmov (!%p2615_p12), 0.0  }
  0x19   : > { %s3117_s18 = scalar_lea.vmem %s3787_s0, %s2612_s20  ;;  %s2614_s27 = sshll.u32 %s254_s22, 2  ;;  %266 = vst.msk [vmem:[#allocation2] sm:$0xf] (!%p2615_p12), %vm265_vm0, %v3017_v0  ;;  %267 = vst.msk [vmem:[#allocation3] sm:$0xf] (!%p2615_p12), %vm265_vm0, %v3017_v0 }
  0x1a   : > { %s3122_s7 = scalar_lea.vmem %s3788_s1, %s2614_s27  ;;  %268 = vst.msk [vmem:[#allocation4] sm:$0xf] (!%p2615_p12), %vm265_vm0, %v3017_v0  ;;  %269 = vst.msk [vmem:[#allocation5] sm:$0xf] (!%p2615_p12), %vm265_vm0, %v3017_v0 }
  0x1f PF: > { %v3132_v1 = vld [vmem:[%s3789_s2] sm:$0xff]   ;;  %v3018_v2 = vmov 0.0   ;;  %vm3019_vm1 = vmmov 0   ;;  %vm286_vm2 = vcmask 130048   ;;  %s3020_s13 = smov 16   ;;  %s3021_s22 = smov 96  }
  0x20   : > { %2702 = vmatprep.subr.bf16.mxu0 %v3018_v2  ;;  %2708 = vmatprep.subr.bf16.mxu1 %v3018_v2  ;;  %v3139_v3 = vld [vmem:[%s3790_s3] sm:$0xff]   ;;  %v2619_v11 = vld [vmem:[%s3122_s7 + $0x1c] sm:$0xf]  ;;  %s3022_s20 = smov 32   ;;  %s3023_s25 = smov 80   ;;  %vm412_vm3 = vcmask 122880  }
  0x21   : > { %2703 = vmatpush3.bf16.msra.mxu0 %v3132_v1  ;;  %2704 = vmatprep.mubr.msk.bf16.mxu0 %vm3019_vm1, %v3018_v2  ;;  %v274_v4 = vld [vmem:[#allocation2] sm:$0xf]  ;;  %v276_v5 = vld [vmem:[#allocation4] sm:$0xf]  ;;  %v275_v8 = vld [vmem:[#allocation3] sm:$0xf]  ;;  %s2419_s30 = scalar_lea.vmem (%p3088_p3), %s3791_s4, %s3105_s14 }
  0x22   : > { %2709 = vmatpush3.bf16.msra.mxu1 %v3139_v3  ;;  %v279_v6 = vpack.c.bf16 %v274_v4, %v274_v4  ;;  %2710 = vmatprep.mubr.msk.bf16.mxu1 %vm3019_vm1, %v3018_v2  ;;  %v419_v7 = vpack.c.bf16 %v276_v5, %v276_v5  ;;  %v277_v9 = vld [vmem:[#allocation5] sm:$0xf]  ;;  %v278_v10 = vld [vmem:[%s3117_s18] sm:$0xf]  ;;  %v2623_v54 = vld [vmem:[%s3117_s18 + $0x4] sm:$0xf] }
  0x23   : > { %339 = vrot.lane.b32.xlu1 %v275_v8, %s3020_s13  ;;  %2714 = vmatprep.subr.bf16.mxu0 %v3018_v2  ;;  %v2626_v59 = vld [vmem:[%s3122_s7 + $0x18] sm:$0xf]  ;;  %s3025_s26 = smov 112   ;;  %vm2391_vm4 = vcmask 125952  }
  0x24   : > { %2705 = vmatmul.mubr.msk.bf16.vlgmr.msra.gmra.mrb[0].mxu0 %vm286_vm2, %v279_v6  ;;  %2720 = vmatprep.subr.bf16.mxu1 %v3018_v2 }
  0x25   : > { %2711 = vmatmul.mubr.msk.bf16.vlgmr.msra.gmra.mrb[0].mxu1 %vm286_vm2, %v419_v7  ;;  %2715 = vmatpush3.bf16.msra.mxu0 %v3132_v1 }
  0x26   : > { %2721 = vmatpush3.bf16.msra.mxu1 %v3139_v3  ;;  %2716 = vmatprep.mubr.msk.bf16.mxu0 %vm3019_vm1, %v3018_v2 }
  0x27   : > { %478 = vrot.lane.b32.xlu1 %v277_v9, %s3020_s13  ;;  %2722 = vmatprep.mubr.msk.bf16.mxu1 %vm3019_vm1, %v3018_v2 }
  0x28   : > { %2726 = vmatprep.subr.bf16.mxu0 %v3018_v2  ;;  %2732 = vmatprep.subr.bf16.mxu1 %v3018_v2 }
  0x95   : > { %v340_v36 = vpop.permute.xlu1 %339 }
  0x99   : > { %v479_v38 = vpop.permute.xlu1 %478 }
  0xf7   : > { %v324_v12 = vpop.f32.mrb[0].mxu0 }
  0xf8   : > { %v330_v13 = vadd.f32 %v324_v12, %v278_v10  ;;  %v2706_v14 = vpop.f32.mrb[1].mxu0  ;;  %v463_v15 = vpop.f32.mrb[0].mxu1 }
  0xf9   : > { %v469_v16 = vadd.f32 %v2619_v11, %v463_v15  ;;  %v327_v17 = vpop.f32.mrb[2].mxu0  ;;  %v2712_v18 = vpop.f32.mrb[1].mxu1 }
  0xfa   : > { %2849 = vtanh.f32 %v330_v13  ;;  %v2707_v19 = vpop.f32.mrb[3].mxu0  ;;  %v466_v20 = vpop.f32.mrb[2].mxu1  ;;  %v2618_v24 = vmul.f32 -1.442695, %v330_v13 }
  0xfb   : > { %v2713_v21 = vpop.f32.mrb[3].mxu1  ;;  %2851 = vtanh.f32 %v469_v16  ;;  %v2622_v25 = vmul.f32 -1.442695, %v469_v16 }
  0xfc   : > { %2853 = vpow2.f32 %v2618_v24 }
  0xfd   : > { %2855 = vpow2.f32 %v2622_v25 }
 0x104   : > { %v2850_v22 = vpop.eup %2849 }
 0x105   : > { %344 = vrot.lane.b32.xlu0 %v2850_v22, %s3021_s22  ;;  %v2852_v23 = vpop.eup %2851 }
 0x106   : > { %v2854_v26 = vpop.eup %2853 }
 0x107   : > { %v334_v27 = vadd.f32 1.0, %v2854_v26  ;;  %v2856_v28 = vpop.eup %2855 }
 0x108   : > { %v473_v29 = vadd.f32 1.0, %v2856_v28 }
 0x109   : > { %483 = vrot.lane.b32.xlu0 %v2852_v23, %s3021_s22  ;;  %2857 = vrcp.f32 %v334_v27 }
 0x10a   : > { %2859 = vrcp.f32 %v473_v29 }
 0x113   : > { %v2858_v30 = vpop.eup %2857 }
 0x114   : > { %v2860_v33 = vpop.eup %2859  ;;  %v342_v37 = vmul.f32 %v2858_v30, %v340_v36 }
 0x115   : > { %v481_v41 = vmul.f32 %v2860_v33, %v479_v38 }
 0x177   : > { %v345_v31 = vpop.permute.xlu0 %344 }
 0x178   : > { %v347_v32 = vmul.f32 %v2858_v30, %v345_v31 }
 0x17a   : > { %349 = vrot.lane.b32.xlu0 %v347_v32, %s3020_s13 }
 0x17b   : > { %v484_v34 = vpop.permute.xlu0 %483 }
 0x17c   : > { %v486_v35 = vmul.f32 %v2860_v33, %v484_v34 }
 0x17e   : > { %488 = vrot.lane.b32.xlu1 %v486_v35, %s3020_s13  ;;  %v2629_v35 = vld [vmem:[%s3117_s18 + $0x8] sm:$0xf] }
 0x1ec   : > { %v350_v39 = vpop.permute.xlu0 %349 }
 0x1ed   : > { %v3167_v40 = vadd.f32 %v350_v39, %v342_v37 }
 0x1ef   : > { %2861 = vtanh.f32 %v3167_v40 }
 0x1f0   : > { %v489_v42 = vpop.permute.xlu1 %488 }
 0x1f1   : > { %v3170_v43 = vadd.f32 %v489_v42, %v481_v41 }
 0x1f3   : > { %2863 = vtanh.f32 %v3170_v43 }
 0x1f9   : > { %v2862_v44 = vpop.eup %2861 }
 0x1fa   : > { %355 = vrot.lane.b32.xlu0 %v2862_v44, %s3022_s20 }
 0x1fd   : > { %v2864_v45 = vpop.eup %2863 }
 0x1fe   : > { %494 = vrot.lane.b32.xlu1 %v2864_v45, %s3022_s20 }
 0x26c   : > { %v356_v46 = vpop.permute.xlu0 %355 }
 0x26d   : > { %v3175_v47 = vmul.f32 %v2858_v30, %v356_v46 }
 0x26f   : > { %v557_v48 = vpack.c.bf16 %v3175_v47, %v3175_v47 }
 0x270   : > { %v495_v49 = vpop.permute.xlu1 %494 }
 0x271   : > { %v3179_v50 = vmul.f32 %v2860_v33, %v495_v49  ;;  %559 = vrot.lane.b32.xlu0 %v557_v48, %s3023_s25 }
 0x273   : > { %v688_v51 = vpack.c.bf16 %v3179_v50, %v3179_v50 }
 0x275   : > { %690 = vrot.lane.b32.xlu1 %v688_v51, %s3023_s25 }
 0x2e3   : > { %v560_v52 = vpop.permute.xlu0 %559 }
 0x2e4   : > { %2717 = vmatmul.mubr.msk.bf16.vlgmr.msra.gmra.mrb[4].mxu0 %vm286_vm2, %v560_v52 }
 0x2e5   : > { %2727 = vmatpush3.bf16.msra.mxu0 %v3132_v1  ;;  %2728 = vmatprep.mubr.msk.bf16.mxu0 %vm3019_vm1, %v3018_v2 }
 0x2e6   : > { %2738 = vmatprep.subr.bf16.mxu0 %v3018_v2 }
 0x2e7   : > { %v691_v53 = vpop.permute.xlu1 %690 }
 0x2e8   : > { %2723 = vmatmul.mubr.msk.bf16.vlgmr.msra.gmra.mrb[4].mxu1 %vm286_vm2, %v691_v53 }
 0x2e9   : > { %2733 = vmatpush3.bf16.msra.mxu1 %v3139_v3  ;;  %2734 = vmatprep.mubr.msk.bf16.mxu1 %vm3019_vm1, %v3018_v2 }
 0x2ea   : > { %2744 = vmatprep.subr.bf16.mxu1 %v3018_v2 }
 0x3b7   : > { %v598_v55 = vpop.f32.mrb[4].mxu0 }
 0x3b8   : > { %v604_v56 = vadd.f32 %v2623_v54, %v598_v55  ;;  %v2718_v57 = vpop.f32.mrb[5].mxu0 }
 0x3b9   : > { %v601_v58 = vpop.f32.mrb[6].mxu0 }
 0x3ba   : > { %2865 = vtanh.f32 %v604_v56  ;;  %v2719_v60 = vpop.f32.mrb[7].mxu0  ;;  %v2625_v7 = vmul.f32 -1.442695, %v604_v56 }
 0x3bb   : > { %v729_v61 = vpop.f32.mrb[4].mxu1 }
 0x3bc   : > { %v735_v62 = vadd.f32 %v2626_v59, %v729_v61  ;;  %v2724_v63 = vpop.f32.mrb[5].mxu1 }
 0x3bd   : > { %v732_v0 = vpop.f32.mrb[6].mxu1 }
 0x3be   : > { %2867 = vtanh.f32 %v735_v62  ;;  %v2725_v4 = vpop.f32.mrb[7].mxu1  ;;  %v2628_v8 = vmul.f32 -1.442695, %v735_v62 }
 0x3bf   : > { %2869 = vpow2.f32 %v2625_v7 }
 0x3c0   : > { %2871 = vpow2.f32 %v2628_v8 }
 0x3c4   : > { %v2866_v5 = vpop.eup %2865 }
 0x3c5   : > { %614 = vrot.lane.b32.xlu0 %v2866_v5, %s3021_s22 }
 0x3c8   : > { %v2868_v6 = vpop.eup %2867 }
 0x3c9   : > { %745 = vrot.lane.b32.xlu1 %v2868_v6, %s3021_s22  ;;  %v2870_v9 = vpop.eup %2869 }
 0x3ca   : > { %v608_v10 = vadd.f32 1.0, %v2870_v9  ;;  %v2872_v11 = vpop.eup %2871 }
 0x3cb   : > { %v739_v12 = vadd.f32 1.0, %v2872_v11 }
 0x3cc   : > { %2873 = vrcp.f32 %v608_v10 }
 0x3cd   : > { %2875 = vrcp.f32 %v739_v12 }
 0x3d6   : > { %v2874_v13 = vpop.eup %2873 }
 0x3d7   : > { %v2876_v16 = vpop.eup %2875  ;;  %v612_v19 = vmul.f32 %v2874_v13, %v3167_v40  ;;  %v2632_v40 = vld [vmem:[%s3122_s7 + $0x14] sm:$0xf] }
 0x3d8   : > { %v743_v22 = vmul.f32 %v2876_v16, %v3170_v43 }
 0x437   : > { %v615_v14 = vpop.permute.xlu0 %614 }
 0x438   : > { %v617_v15 = vmul.f32 %v2874_v13, %v615_v14 }
 0x43a   : > { %619 = vrot.lane.b32.xlu0 %v617_v15, %s3020_s13 }
 0x43b   : > { %v746_v17 = vpop.permute.xlu1 %745 }
 0x43c   : > { %v748_v18 = vmul.f32 %v2876_v16, %v746_v17 }
 0x43e   : > { %750 = vrot.lane.b32.xlu1 %v748_v18, %s3020_s13  ;;  %v2635_v18 = vld [vmem:[%s3117_s18 + $0xc] sm:$0xf] }
 0x4ac   : > { %v620_v20 = vpop.permute.xlu0 %619 }
 0x4ad   : > { %v3202_v21 = vadd.f32 %v620_v20, %v612_v19 }
 0x4af   : > { %2877 = vtanh.f32 %v3202_v21 }
 0x4b0   : > { %v751_v23 = vpop.permute.xlu1 %750 }
 0x4b1   : > { %v3206_v24 = vadd.f32 %v751_v23, %v743_v22  ;;  %v2638_v23 = vld [vmem:[%s3122_s7 + $0x10] sm:$0xf] }
 0x4b3   : > { %2879 = vtanh.f32 %v3206_v24 }
 0x4b9   : > { %v2878_v25 = vpop.eup %2877 }
 0x4ba   : > { %625 = vrot.lane.b32.xlu0 %v2878_v25, %s3022_s20 }
 0x4bd   : > { %v2880_v26 = vpop.eup %2879 }
 0x4be   : > { %756 = vrot.lane.b32.xlu1 %v2880_v26, %s3022_s20 }
 0x52c   : > { %v626_v27 = vpop.permute.xlu0 %625 }
 0x52d   : > { %v3211_v28 = vmul.f32 %v2874_v13, %v626_v27 }
 0x52f   : > { %v819_v29 = vpack.c.bf16 %v3211_v28, %v3211_v28 }
 0x530   : > { %v757_v30 = vpop.permute.xlu1 %756 }
 0x531   : > { %v3215_v31 = vmul.f32 %v2876_v16, %v757_v30  ;;  %821 = vrot.lane.b32.xlu0 %v819_v29, %s3023_s25 }
 0x533   : > { %v950_v32 = vpack.c.bf16 %v3215_v31, %v3215_v31 }
 0x535   : > { %952 = vrot.lane.b32.xlu1 %v950_v32, %s3023_s25 }
 0x5a3   : > { %v822_v33 = vpop.permute.xlu0 %821 }
 0x5a4   : > { %2729 = vmatmul.mubr.msk.bf16.vlgmr.msra.gmra.mrb[8].mxu0 %vm286_vm2, %v822_v33 }
 0x5a5   : > { %2739 = vmatpush3.bf16.msra.mxu0 %v3132_v1  ;;  %2740 = vmatprep.mubr.msk.bf16.mxu0 %vm3019_vm1, %v3018_v2 }
 0x5a6   : > { %2750 = vmatprep.subr.bf16.mxu0 %v3018_v2 }
 0x5a7   : > { %v953_v34 = vpop.permute.xlu1 %952 }
 0x5a8   : > { %2735 = vmatmul.mubr.msk.bf16.vlgmr.msra.gmra.mrb[8].mxu1 %vm286_vm2, %v953_v34 }
 0x5a9   : > { %2745 = vmatpush3.bf16.msra.mxu1 %v3139_v3  ;;  %2746 = vmatprep.mubr.msk.bf16.mxu1 %vm3019_vm1, %v3018_v2 }
 0x5aa   : > { %2756 = vmatprep.subr.bf16.mxu1 %v3018_v2 }
 0x677   : > { %v860_v36 = vpop.f32.mrb[8].mxu0 }
 0x678   : > { %v866_v37 = vadd.f32 %v2629_v35, %v860_v36  ;;  %v2730_v38 = vpop.f32.mrb[9].mxu0 }
 0x679   : > { %v863_v39 = vpop.f32.mrb[10].mxu0 }
 0x67a   : > { %2881 = vtanh.f32 %v866_v37  ;;  %v2731_v41 = vpop.f32.mrb[11].mxu0  ;;  %v2631_v51 = vmul.f32 -1.442695, %v866_v37 }
 0x67b   : > { %v991_v42 = vpop.f32.mrb[8].mxu1 }
 0x67c   : > { %v997_v43 = vadd.f32 %v2632_v40, %v991_v42  ;;  %v2736_v44 = vpop.f32.mrb[9].mxu1 }
 0x67d   : > { %v994_v45 = vpop.f32.mrb[10].mxu1 }
 0x67e   : > { %2883 = vtanh.f32 %v997_v43  ;;  %v2737_v46 = vpop.f32.mrb[11].mxu1  ;;  %v2634_v52 = vmul.f32 -1.442695, %v997_v43 }
 0x67f   : > { %2885 = vpow2.f32 %v2631_v51 }
 0x680   : > { %2887 = vpow2.f32 %v2634_v52 }
 0x684   : > { %v2882_v48 = vpop.eup %2881 }
 0x685   : > { %876 = vrot.lane.b32.xlu0 %v2882_v48, %s3021_s22 }
 0x688   : > { %v2884_v49 = vpop.eup %2883 }
 0x689   : > { %1007 = vrot.lane.b32.xlu1 %v2884_v49, %s3021_s22  ;;  %v2886_v53 = vpop.eup %2885 }
 0x68a   : > { %v870_v54 = vadd.f32 1.0, %v2886_v53  ;;  %v2888_v55 = vpop.eup %2887 }
 0x68b   : > { %v1001_v56 = vadd.f32 1.0, %v2888_v55 }
 0x68c   : > { %2889 = vrcp.f32 %v870_v54 }
 0x68d   : > { %2891 = vrcp.f32 %v1001_v56 }
 0x696   : > { %v2890_v57 = vpop.eup %2889 }
 0x697   : > { %v2892_v60 = vpop.eup %2891  ;;  %v874_v63 = vmul.f32 %v2890_v57, %v3202_v21 }
 0x698   : > { %v1005_v5 = vmul.f32 %v2892_v60, %v3206_v24 }
 0x6f7   : > { %v877_v58 = vpop.permute.xlu0 %876 }
 0x6f8   : > { %v879_v59 = vmul.f32 %v2890_v57, %v877_v58 }
 0x6fa   : > { %881 = vrot.lane.b32.xlu0 %v879_v59, %s3020_s13 }
 0x6fb   : > { %v1008_v61 = vpop.permute.xlu1 %1007 }
 0x6fc   : > { %v1010_v62 = vmul.f32 %v2892_v60, %v1008_v61 }
 0x6fe   : > { %1012 = vrot.lane.b32.xlu1 %v1010_v62, %s3020_s13 }
 0x76c   : > { %v882_v0 = vpop.permute.xlu0 %881 }
 0x76d   : > { %v3238_v4 = vadd.f32 %v882_v0, %v874_v63  ;;  %v2641_v0 = vld [vmem:[%s3117_s18 + $0x10] sm:$0xf] }
 0x76f   : > { %2893 = vtanh.f32 %v3238_v4 }
 0x770   : > { %v1013_v6 = vpop.permute.xlu1 %1012 }
 0x771   : > { %v3242_v7 = vadd.f32 %v1013_v6, %v1005_v5 }
 0x773   : > { %2895 = vtanh.f32 %v3242_v7 }
 0x779   : > { %v2894_v8 = vpop.eup %2893 }
 0x77a   : > { %887 = vrot.lane.b32.xlu0 %v2894_v8, %s3022_s20  ;;  %v2644_v8 = vld [vmem:[%s3122_s7 + $0xc] sm:$0xf] }
 0x77d   : > { %v2896_v9 = vpop.eup %2895 }
 0x77e   : > { %1018 = vrot.lane.b32.xlu1 %v2896_v9, %s3022_s20 }
 0x7ec   : > { %v888_v10 = vpop.permute.xlu0 %887 }
 0x7ed   : > { %v3247_v11 = vmul.f32 %v2890_v57, %v888_v10 }
 0x7ef   : > { %v1081_v12 = vpack.c.bf16 %v3247_v11, %v3247_v11 }
 0x7f0   : > { %v1019_v13 = vpop.permute.xlu1 %1018 }
 0x7f1   : > { %v3251_v14 = vmul.f32 %v2892_v60, %v1019_v13  ;;  %1083 = vrot.lane.b32.xlu0 %v1081_v12, %s3023_s25 }
 0x7f3   : > { %v1212_v15 = vpack.c.bf16 %v3251_v14, %v3251_v14 }
 0x7f5   : > { %1214 = vrot.lane.b32.xlu1 %v1212_v15, %s3023_s25 }
 0x863   : > { %v1084_v16 = vpop.permute.xlu0 %1083 }
 0x864   : > { %2741 = vmatmul.mubr.msk.bf16.vlgmr.msra.gmra.mrb[12].mxu0 %vm286_vm2, %v1084_v16 }
 0x865   : > { %2751 = vmatpush3.bf16.msra.mxu0 %v3132_v1  ;;  %2752 = vmatprep.mubr.msk.bf16.mxu0 %vm3019_vm1, %v3018_v2 }
 0x866   : > { %2762 = vmatprep.subr.bf16.mxu0 %v3018_v2 }
 0x867   : > { %v1215_v17 = vpop.permute.xlu1 %1214 }
 0x868   : > { %2747 = vmatmul.mubr.msk.bf16.vlgmr.msra.gmra.mrb[12].mxu1 %vm286_vm2, %v1215_v17 }
 0x869   : > { %2757 = vmatpush3.bf16.msra.mxu1 %v3139_v3  ;;  %2758 = vmatprep.mubr.msk.bf16.mxu1 %vm3019_vm1, %v3018_v2 }
 0x86a   : > { %2768 = vmatprep.subr.bf16.mxu1 %v3018_v2 }
 0x937   : > { %v1122_v19 = vpop.f32.mrb[12].mxu0 }
 0x938   : > { %v1128_v20 = vadd.f32 %v2635_v18, %v1122_v19  ;;  %v2742_v21 = vpop.f32.mrb[13].mxu0 }
 0x939   : > { %v1125_v22 = vpop.f32.mrb[14].mxu0 }
 0x93a   : > { %2897 = vtanh.f32 %v1128_v20  ;;  %v2743_v24 = vpop.f32.mrb[15].mxu0  ;;  %v2637_v34 = vmul.f32 -1.442695, %v1128_v20 }
 0x93b   : > { %v1253_v25 = vpop.f32.mrb[12].mxu1 }
 0x93c   : > { %v1259_v26 = vadd.f32 %v2638_v23, %v1253_v25  ;;  %v2748_v27 = vpop.f32.mrb[13].mxu1 }
 0x93d   : > { %v1256_v29 = vpop.f32.mrb[14].mxu1 }
 0x93e   : > { %2899 = vtanh.f32 %v1259_v26  ;;  %v2749_v30 = vpop.f32.mrb[15].mxu1  ;;  %v2640_v35 = vmul.f32 -1.442695, %v1259_v26 }
 0x93f   : > { %2901 = vpow2.f32 %v2637_v34 }
 0x940   : > { %2903 = vpow2.f32 %v2640_v35 }
 0x944   : > { %v2898_v32 = vpop.eup %2897 }
 0x945   : > { %1138 = vrot.lane.b32.xlu0 %v2898_v32, %s3021_s22 }
 0x948   : > { %v2900_v33 = vpop.eup %2899 }
 0x949   : > { %1269 = vrot.lane.b32.xlu1 %v2900_v33, %s3021_s22  ;;  %v2902_v36 = vpop.eup %2901 }
 0x94a   : > { %v1132_v37 = vadd.f32 1.0, %v2902_v36  ;;  %v2904_v38 = vpop.eup %2903 }
 0x94b   : > { %v1263_v39 = vadd.f32 1.0, %v2904_v38 }
 0x94c   : > { %2905 = vrcp.f32 %v1132_v37 }
 0x94d   : > { %2907 = vrcp.f32 %v1263_v39 }
 0x956   : > { %v2906_v40 = vpop.eup %2905 }
 0x957   : > { %v2908_v43 = vpop.eup %2907  ;;  %v1136_v46 = vmul.f32 %v2906_v40, %v3238_v4 }
 0x958   : > { %v1267_v51 = vmul.f32 %v2908_v43, %v3242_v7 }
 0x9b7   : > { %v1139_v41 = vpop.permute.xlu0 %1138 }
 0x9b8   : > { %v1141_v42 = vmul.f32 %v2906_v40, %v1139_v41 }
 0x9ba   : > { %1143 = vrot.lane.b32.xlu0 %v1141_v42, %s3020_s13 }
 0x9bb   : > { %v1270_v44 = vpop.permute.xlu1 %1269 }
 0x9bc   : > { %v1272_v45 = vmul.f32 %v2908_v43, %v1270_v44 }
 0x9be   : > { %1274 = vrot.lane.b32.xlu1 %v1272_v45, %s3020_s13 }
 0xa2c   : > { %v1144_v48 = vpop.permute.xlu0 %1143 }
 0xa2d   : > { %v3274_v49 = vadd.f32 %v1144_v48, %v1136_v46 }
 0xa2f   : > { %2909 = vtanh.f32 %v3274_v49 }
 0xa30   : > { %v1275_v52 = vpop.permute.xlu1 %1274 }
 0xa31   : > { %v3278_v53 = vadd.f32 %v1275_v52, %v1267_v51  ;;  %v2647_v51 = vld [vmem:[%s3117_s18 + $0x14] sm:$0xf] }
 0xa33   : > { %2911 = vtanh.f32 %v3278_v53 }
 0xa39   : > { %v2910_v54 = vpop.eup %2909 }
 0xa3a   : > { %1149 = vrot.lane.b32.xlu0 %v2910_v54, %s3022_s20 }
 0xa3d   : > { %v2912_v55 = vpop.eup %2911 }
 0xa3e   : > { %1280 = vrot.lane.b32.xlu1 %v2912_v55, %s3022_s20 }
 0xaac   : > { %v1150_v56 = vpop.permute.xlu0 %1149 }
 0xaad   : > { %v3283_v57 = vmul.f32 %v2906_v40, %v1150_v56  ;;  %v2650_v56 = vld [vmem:[%s3122_s7 + $0x8] sm:$0xf] }
 0xaaf   : > { %v1343_v58 = vpack.c.bf16 %v3283_v57, %v3283_v57 }
 0xab0   : > { %v1281_v59 = vpop.permute.xlu1 %1280 }
 0xab1   : > { %v3287_v60 = vmul.f32 %v2908_v43, %v1281_v59  ;;  %1345 = vrot.lane.b32.xlu0 %v1343_v58, %s3023_s25 }
 0xab3   : > { %v1474_v61 = vpack.c.bf16 %v3287_v60, %v3287_v60 }
 0xab5   : > { %1476 = vrot.lane.b32.xlu1 %v1474_v61, %s3023_s25 }
 0xb23   : > { %v1346_v62 = vpop.permute.xlu0 %1345 }
 0xb24   : > { %2753 = vmatmul.mubr.msk.bf16.vlgmr.msra.gmra.mrb[16].mxu0 %vm286_vm2, %v1346_v62 }
 0xb25   : > { %2763 = vmatpush3.bf16.msra.mxu0 %v3132_v1  ;;  %2764 = vmatprep.mubr.msk.bf16.mxu0 %vm3019_vm1, %v3018_v2 }
 0xb26   : > { %2774 = vmatprep.subr.bf16.mxu0 %v3018_v2 }
 0xb27   : > { %v1477_v63 = vpop.permute.xlu1 %1476 }
 0xb28   : > { %2759 = vmatmul.mubr.msk.bf16.vlgmr.msra.gmra.mrb[16].mxu1 %vm286_vm2, %v1477_v63 }
 0xb29   : > { %2769 = vmatpush3.bf16.msra.mxu1 %v3139_v3  ;;  %2770 = vmatprep.mubr.msk.bf16.mxu1 %vm3019_vm1, %v3018_v2 }
 0xb2a   : > { %2780 = vmatprep.subr.bf16.mxu1 %v3018_v2 }
 0xbf7   : > { %v1384_v4 = vpop.f32.mrb[16].mxu0 }
 0xbf8   : > { %v1390_v5 = vadd.f32 %v2641_v0, %v1384_v4  ;;  %v2754_v6 = vpop.f32.mrb[17].mxu0 }
 0xbf9   : > { %v1387_v7 = vpop.f32.mrb[18].mxu0 }
 0xbfa   : > { %2913 = vtanh.f32 %v1390_v5  ;;  %v2755_v9 = vpop.f32.mrb[19].mxu0  ;;  %v2643_v19 = vmul.f32 -1.442695, %v1390_v5 }
 0xbfb   : > { %v1515_v10 = vpop.f32.mrb[16].mxu1 }
 0xbfc   : > { %v1521_v12 = vadd.f32 %v2644_v8, %v1515_v10  ;;  %v2760_v13 = vpop.f32.mrb[17].mxu1 }
 0xbfd   : > { %v1518_v15 = vpop.f32.mrb[18].mxu1 }
 0xbfe   : > { %2915 = vtanh.f32 %v1521_v12  ;;  %v2761_v16 = vpop.f32.mrb[19].mxu1  ;;  %v2646_v20 = vmul.f32 -1.442695, %v1521_v12 }
 0xbff   : > { %2917 = vpow2.f32 %v2643_v19 }
 0xc00   : > { %2919 = vpow2.f32 %v2646_v20 }
 0xc04   : > { %v2914_v17 = vpop.eup %2913 }
 0xc05   : > { %1400 = vrot.lane.b32.xlu0 %v2914_v17, %s3021_s22 }
 0xc08   : > { %v2916_v18 = vpop.eup %2915 }
 0xc09   : > { %1531 = vrot.lane.b32.xlu1 %v2916_v18, %s3021_s22  ;;  %v2918_v21 = vpop.eup %2917 }
 0xc0a   : > { %v1394_v22 = vadd.f32 1.0, %v2918_v21  ;;  %v2920_v23 = vpop.eup %2919 }
 0xc0b   : > { %v1525_v24 = vadd.f32 1.0, %v2920_v23 }
 0xc0c   : > { %2921 = vrcp.f32 %v1394_v22 }
 0xc0d   : > { %2923 = vrcp.f32 %v1525_v24 }
 0xc16   : > { %v2922_v25 = vpop.eup %2921 }
 0xc17   : > { %v2924_v29 = vpop.eup %2923  ;;  %v1398_v33 = vmul.f32 %v2922_v25, %v3274_v49 }
 0xc18   : > { %v1529_v36 = vmul.f32 %v2924_v29, %v3278_v53 }
 0xc77   : > { %v1401_v26 = vpop.permute.xlu0 %1400 }
 0xc78   : > { %v1403_v27 = vmul.f32 %v2922_v25, %v1401_v26 }
 0xc7a   : > { %1405 = vrot.lane.b32.xlu0 %v1403_v27, %s3020_s13 }
 0xc7b   : > { %v1532_v30 = vpop.permute.xlu1 %1531 }
 0xc7c   : > { %v1534_v32 = vmul.f32 %v2924_v29, %v1532_v30 }
 0xc7e   : > { %1536 = vrot.lane.b32.xlu1 %v1534_v32, %s3020_s13 }
 0xcec   : > { %v1406_v34 = vpop.permute.xlu0 %1405 }
 0xced   : > { %v3310_v35 = vadd.f32 %v1406_v34, %v1398_v33 }
 0xcef   : > { %2925 = vtanh.f32 %v3310_v35 }
 0xcf0   : > { %v1537_v37 = vpop.permute.xlu1 %1536 }
 0xcf1   : > { %v3314_v38 = vadd.f32 %v1537_v37, %v1529_v36 }
 0xcf3   : > { %2927 = vtanh.f32 %v3314_v38 }
 0xcf9   : > { %v2926_v39 = vpop.eup %2925 }
 0xcfa   : > { %1411 = vrot.lane.b32.xlu0 %v2926_v39, %s3022_s20 }
 0xcfd   : > { %v2928_v40 = vpop.eup %2927 }
 0xcfe   : > { %1542 = vrot.lane.b32.xlu1 %v2928_v40, %s3022_s20 }
 0xd6c   : > { %v1412_v41 = vpop.permute.xlu0 %1411 }
 0xd6d   : > { %v3319_v42 = vmul.f32 %v2922_v25, %v1412_v41 }
 0xd6f   : > { %v1605_v43 = vpack.c.bf16 %v3319_v42, %v3319_v42 }
 0xd70   : > { %v1543_v44 = vpop.permute.xlu1 %1542 }
 0xd71   : > { %v3323_v45 = vmul.f32 %v2924_v29, %v1543_v44  ;;  %1607 = vrot.lane.b32.xlu0 %v1605_v43, %s3023_s25 }
 0xd73   : > { %v1736_v46 = vpack.c.bf16 %v3323_v45, %v3323_v45 }
 0xd75   : > { %1738 = vrot.lane.b32.xlu1 %v1736_v46, %s3023_s25  ;;  %v2656_v46 = vld [vmem:[%s3122_s7 + $0x4] sm:$0xf] }
 0xde3   : > { %v1608_v48 = vpop.permute.xlu0 %1607 }
 0xde4   : > { %2765 = vmatmul.mubr.msk.bf16.vlgmr.msra.gmra.mrb[20].mxu0 %vm286_vm2, %v1608_v48 }
 0xde5   : > { %2775 = vmatpush3.bf16.msra.mxu0 %v3132_v1  ;;  %2776 = vmatprep.mubr.msk.bf16.mxu0 %vm3019_vm1, %v3018_v2 }
 0xde6   : > { %2786 = vmatprep.subr.bf16.mxu0 %v3018_v2 }
 0xde7   : > { %v1739_v49 = vpop.permute.xlu1 %1738 }
 0xde8   : > { %2771 = vmatmul.mubr.msk.bf16.vlgmr.msra.gmra.mrb[20].mxu1 %vm286_vm2, %v1739_v49 }
 0xde9   : > { %2781 = vmatpush3.bf16.msra.mxu1 %v3139_v3  ;;  %2782 = vmatprep.mubr.msk.bf16.mxu1 %vm3019_vm1, %v3018_v2 }
 0xdea   : > { %2792 = vmatprep.subr.bf16.mxu1 %v3018_v2 }
 0xeb7   : > { %v1646_v52 = vpop.f32.mrb[20].mxu0 }
 0xeb8   : > { %v1652_v53 = vadd.f32 %v2647_v51, %v1646_v52  ;;  %v2766_v54 = vpop.f32.mrb[21].mxu0 }
 0xeb9   : > { %v1649_v55 = vpop.f32.mrb[22].mxu0 }
 0xeba   : > { %2929 = vtanh.f32 %v1652_v53  ;;  %v2767_v58 = vpop.f32.mrb[23].mxu0  ;;  %v2649_v6 = vmul.f32 -1.442695, %v1652_v53 }
 0xebb   : > { %v1777_v59 = vpop.f32.mrb[20].mxu1 }
 0xebc   : > { %v1783_v61 = vadd.f32 %v2650_v56, %v1777_v59  ;;  %v2772_v62 = vpop.f32.mrb[21].mxu1 }
 0xebd   : > { %v1780_v63 = vpop.f32.mrb[22].mxu1 }
 0xebe   : > { %2931 = vtanh.f32 %v1783_v61  ;;  %v2773_v0 = vpop.f32.mrb[23].mxu1  ;;  %v2652_v7 = vmul.f32 -1.442695, %v1783_v61 }
 0xebf   : > { %2933 = vpow2.f32 %v2649_v6 }
 0xec0   : > { %2935 = vpow2.f32 %v2652_v7 }
 0xec4   : > { %v2930_v4 = vpop.eup %2929 }
 0xec5   : > { %1662 = vrot.lane.b32.xlu0 %v2930_v4, %s3021_s22 }
 0xec8   : > { %v2932_v5 = vpop.eup %2931 }
 0xec9   : > { %1793 = vrot.lane.b32.xlu1 %v2932_v5, %s3021_s22  ;;  %v2934_v8 = vpop.eup %2933 }
 0xeca   : > { %v1656_v9 = vadd.f32 1.0, %v2934_v8  ;;  %v2936_v10 = vpop.eup %2935 }
 0xecb   : > { %v1787_v12 = vadd.f32 1.0, %v2936_v10 }
 0xecc   : > { %2937 = vrcp.f32 %v1656_v9 }
 0xecd   : > { %2939 = vrcp.f32 %v1787_v12 }
 0xed6   : > { %v2938_v13 = vpop.eup %2937 }
 0xed7   : > { %v2940_v17 = vpop.eup %2939  ;;  %v1660_v20 = vmul.f32 %v2938_v13, %v3310_v35 }
 0xed8   : > { %v1791_v23 = vmul.f32 %v2940_v17, %v3314_v38  ;;  %v2653_v38 = vld [vmem:[%s3117_s18 + $0x18] sm:$0xf] }
 0xf37   : > { %v1663_v15 = vpop.permute.xlu0 %1662 }
 0xf38   : > { %v1665_v16 = vmul.f32 %v2938_v13, %v1663_v15 }
 0xf3a   : > { %1667 = vrot.lane.b32.xlu0 %v1665_v16, %s3020_s13 }
 0xf3b   : > { %v1794_v18 = vpop.permute.xlu1 %1793 }
 0xf3c   : > { %v1796_v19 = vmul.f32 %v2940_v17, %v1794_v18 }
 0xf3e   : > { %1798 = vrot.lane.b32.xlu1 %v1796_v19, %s3020_s13 }
 0xfac   : > { %v1668_v21 = vpop.permute.xlu0 %1667 }
 0xfad   : > { %v1670_v22 = vadd.f32 %v1668_v21, %v1660_v20 }
 0xfaf   : > { %2941 = vtanh.f32 %v1670_v22 }
 0xfb0   : > { %v1799_v24 = vpop.permute.xlu1 %1798 }
 0xfb1   : > { %v1801_v25 = vadd.f32 %v1799_v24, %v1791_v23  ;;  %v2659_v24 = vld [vmem:[%s3117_s18 + $0x1c] sm:$0xf] }
 0xfb3   : > { %2943 = vtanh.f32 %v1801_v25 }
 0xfb9   : > { %v2942_v26 = vpop.eup %2941 }
 0xfba   : > { %1673 = vrot.lane.b32.xlu0 %v2942_v26, %s3022_s20 }
 0xfbd   : > { %v2944_v27 = vpop.eup %2943 }
 0xfbe   : > { %1804 = vrot.lane.b32.xlu1 %v2944_v27, %s3022_s20 }
0x102c   : > { %v1674_v29 = vpop.permute.xlu0 %1673 }
0x102d   : > { %v3349_v30 = vmul.f32 %v2938_v13, %v1674_v29 }
0x102f   : > { %v1867_v32 = vpack.c.bf16 %v3349_v30, %v3349_v30 }
0x1030   : > { %v1805_v33 = vpop.permute.xlu1 %1804 }
0x1031   : > { %v3353_v34 = vmul.f32 %v2940_v17, %v1805_v33  ;;  %1869 = vrot.lane.b32.xlu0 %v1867_v32, %s3023_s25  ;;  %v2258_v33 = vld [vmem:[%s3122_s7] sm:$0xf] }
0x1033   : > { %v1998_v35 = vpack.c.bf16 %v3353_v34, %v3353_v34 }
0x1035   : > { %2000 = vrot.lane.b32.xlu1 %v1998_v35, %s3023_s25 }
0x10a3   : > { %v1870_v36 = vpop.permute.xlu0 %1869 }
0x10a4   : > { %2777 = vmatmul.mubr.msk.bf16.vlgmr.msra.gmra.mrb[24].mxu0 %vm286_vm2, %v1870_v36 }
0x10a5   : > { %2787 = vmatpush3.bf16.msra.mxu0 %v3132_v1  ;;  %2788 = vmatprep.mubr.msk.bf16.mxu0 %vm3019_vm1, %v3018_v2 }
0x10a7   : > { %v2001_v37 = vpop.permute.xlu1 %2000 }
0x10a8   : > { %2783 = vmatmul.mubr.msk.bf16.vlgmr.msra.gmra.mrb[24].mxu1 %vm286_vm2, %v2001_v37 }
0x10a9   : > { %2793 = vmatpush3.bf16.msra.mxu1 %v3139_v3  ;;  %2794 = vmatprep.mubr.msk.bf16.mxu1 %vm3019_vm1, %v3018_v2 }
0x1177   : > { %v1908_v39 = vpop.f32.mrb[24].mxu0 }
0x1178   : > { %v1914_v40 = vadd.f32 %v2653_v38, %v1908_v39  ;;  %v2778_v41 = vpop.f32.mrb[25].mxu0 }
0x1179   : > { %v1911_v43 = vpop.f32.mrb[26].mxu0 }
0x117a   : > { %2945 = vtanh.f32 %v1914_v40  ;;  %v2779_v44 = vpop.f32.mrb[27].mxu0  ;;  %v2655_v2 = vmul.f32 -1.442695, %v1914_v40 }
0x117b   : > { %v2039_v1 = vpop.f32.mrb[24].mxu1 }
0x117c   : > { %v2045_v48 = vadd.f32 %v2656_v46, %v2039_v1  ;;  %v2784_v49 = vpop.f32.mrb[25].mxu1  ;;  %v3024_v1 = vmov 1966171168  }
0x117d   : > { %v2042_v51 = vpop.f32.mrb[26].mxu1  ;;  %v363_v49 = vlaneseq }
0x117e   : > { %2947 = vtanh.f32 %v2045_v48  ;;  %v2785_v52 = vpop.f32.mrb[27].mxu1  ;;  %v2658_v54 = vmul.f32 -1.442695, %v2045_v48  ;;  %v361_v48 = vunpack.c.l.s4 %v3024_v1 }
0x117f   : > { %2949 = vpow2.f32 %v2655_v2 }
0x1180   : > { %2951 = vpow2.f32 %v2658_v54 }
0x1184   : > { %v2946_v53 = vpop.eup %2945 }
0x1185   : > { %1924 = vrot.lane.b32.xlu0 %v2946_v53, %s3021_s22  ;;  %v362_v53 = vunpack.c.0.s8 %v361_v48 }
0x1188   : > { %v2948_v3 = vpop.eup %2947 }
0x1189   : > { %2055 = vrot.lane.b32.xlu1 %v2948_v3, %s3021_s22  ;;  %v2950_v55 = vpop.eup %2949  ;;  %v364_v3 = vshrl.u32 %v363_v49, 7 }
0x118a   : > { %v1918_v56 = vadd.f32 1.0, %v2950_v55  ;;  %v2952_v58 = vpop.eup %2951 }
0x118b   : > { %v2049_v59 = vadd.f32 1.0, %v2952_v58  ;;  %v3397_v54 = vsub.s32 %v362_v53, %v364_v3 }
0x118c   : > { %2953 = vrcp.f32 %v1918_v56 }
0x118d   : > { %2955 = vrcp.f32 %v2049_v59  ;;  %v366_v55 = vrot.slane %v3175_v47, %v3397_v54 }
0x118f   : > { %v374_v59 = vrot.slane %v366_v55, %v3397_v54 }
0x1196   : > { %v2954_v61 = vpop.eup %2953 }
0x1197   : > { %v2956_v0 = vpop.eup %2955  ;;  %v1922_v6 = vmul.f32 %v2954_v61, %v1670_v22 }
0x1198   : > { %v2053_v9 = vmul.f32 %v2956_v0, %v1801_v25 }
0x11f7   : > { %v1925_v62 = vpop.permute.xlu0 %1924 }
0x11f8   : > { %v1927_v63 = vmul.f32 %v2954_v61, %v1925_v62 }
0x11fa   : > { %1929 = vrot.lane.b32.xlu0 %v1927_v63, %s3020_s13  ;;  %v367_v63 = vcombine.high %v366_v55, %v366_v55 }
0x11fb   : > { %v2056_v4 = vpop.permute.xlu1 %2055 }
0x11fc   : > { %v2058_v5 = vmul.f32 %v2956_v0, %v2056_v4  ;;  %v505_v4 = vrot.slane %v3179_v50, %v3397_v54 }
0x11fe   : > { %2060 = vrot.lane.b32.xlu1 %v2058_v5, %s3020_s13 }
0x126c   : > { %v1930_v7 = vpop.permute.xlu0 %1929 }
0x126d   : > { %v3373_v8 = vadd.f32 %v1930_v7, %v1922_v6  ;;  %v382_v6 = vcombine.high %v374_v59, %v374_v59 }
0x126f   : > { %2957 = vtanh.f32 %v3373_v8 }
0x1270   : > { %v2061_v10 = vpop.permute.xlu1 %2060 }
0x1271   : > { %v3376_v12 = vadd.f32 %v2061_v10, %v2053_v9  ;;  %v381_v9 = vrot.slane %v367_v63, %v3397_v54  ;;  %v513_v10 = vrot.slane %v505_v4, %v3397_v54 }
0x1273   : > { %2959 = vtanh.f32 %v3376_v12  ;;  %v383_v50 = vcombine.high %v381_v9, %v381_v9 }
0x1279   : > { %v2958_v13 = vpop.eup %2957 }
0x127a   : > { %1935 = vrot.lane.b32.xlu0 %v2958_v13, %s3022_s20 }
0x127d   : > { %v2960_v15 = vpop.eup %2959 }
0x127e   : > { %2066 = vrot.lane.b32.xlu1 %v2960_v15, %s3022_s20  ;;  %v506_v15 = vcombine.high %v505_v4, %v505_v4 }
0x12ec   : > { %v1936_v16 = vpop.permute.xlu0 %1935 }
0x12ed   : > { %v3381_v17 = vmul.f32 %v2954_v61, %v1936_v16  ;;  %v3404_v61 = vsub.s32 0, %v364_v3 }
0x12ef   : > { %v2129_v18 = vpack.c.bf16 %v3381_v17, %v3381_v17  ;;  %v387_v47 = vrot.slane %v374_v59, %v3404_v61  ;;  %v395_v13 = vrot.slane %v382_v6, %v3404_v61  ;;  %v391_v16 = vrot.slane %v381_v9, %v3404_v61 }
0x12f0   : > { %v2067_v19 = vpop.permute.xlu1 %2066 }
0x12f1   : > { %2131 = vrot.lane.b32.xlu0 %v2129_v18, %s3023_s25  ;;  %v3386_v20 = vmul.f32 %v2956_v0, %v2067_v19  ;;  %v636_v18 = vrot.slane %v3211_v28, %v3397_v54  ;;  %v526_v19 = vrot.slane %v513_v10, %v3404_v61  ;;  %v767_v28 = vrot.slane %v3215_v31, %v3397_v54 }
0x12f2   : > { %v898_v31 = vrot.slane %v3247_v11, %v3397_v54  ;;  %v1029_v11 = vrot.slane %v3251_v14, %v3397_v54  ;;  %v1160_v14 = vrot.slane %v3283_v57, %v3397_v54  ;;  %v1291_v57 = vrot.slane %v3287_v60, %v3397_v54 }
0x12f3   : > { %v2259_v21 = vpack.c.bf16 %v3386_v20, %v3386_v20 }
0x12f4   : > { %v906_v48 = vrot.slane %v898_v31, %v3397_v54  ;;  %v1037_v59 = vrot.slane %v1029_v11, %v3397_v54  ;;  %v1030_v63 = vcombine.high %v1029_v11, %v1029_v11 }
0x12f5   : > { %2261 = vrot.lane.b32.xlu1 %v2259_v21, %s3023_s25  ;;  %v521_v21 = vcombine.high %v513_v10, %v513_v10  ;;  %v1168_v10 = vrot.slane %v1160_v14, %v3397_v54 }
0x12f6   : > { %v919_v3 = vrot.slane %v906_v48, %v3404_v61  ;;  %v1045_v6 = vcombine.high %v1037_v59, %v1037_v59  ;;  %v1044_v9 = vrot.slane %v1030_v63, %v3397_v54 }
0x1363   : > { %v2132_v22 = vpop.permute.xlu0 %2131 }
0x1364   : > { %2789 = vmatmul.mubr.msk.bf16.vlgmr.msra.gmra.mrb[28].mxu0 %vm286_vm2, %v2132_v22  ;;  %v399_v22 = vrot.slane %v383_v50, %v3404_v61  ;;  %v1046_v50 = vcombine.high %v1044_v9, %v1044_v9 }
0x1367   : > { %v2262_v23 = vpop.permute.xlu1 %2261 }
0x1368   : > { %2795 = vmatmul.mubr.msk.bf16.vlgmr.msra.gmra.mrb[28].mxu1 %vm286_vm2, %v2262_v23  ;;  %v520_v23 = vrot.slane %v506_v15, %v3397_v54  ;;  %v1161_v15 = vcombine.high %v1160_v14, %v1160_v14 }
0x1437   : > { %v2170_v25 = vpop.f32.mrb[28].mxu0 }
0x1438   : > { %v2176_v26 = vadd.f32 %v2659_v24, %v2170_v25  ;;  %v2790_v27 = vpop.f32.mrb[29].mxu0  ;;  %v644_v24 = vrot.slane %v636_v18, %v3397_v54  ;;  %v534_v25 = vrot.slane %v521_v21, %v3404_v61  ;;  %v1062_v21 = vrot.slane %v1046_v50, %v3404_v61 }
0x1439   : > { %v2173_v29 = vpop.f32.mrb[30].mxu0  ;;  %v530_v27 = vrot.slane %v520_v23, %v3404_v61 }
0x143a   : > { %2961 = vtanh.f32 %v2176_v26  ;;  %v2791_v32 = vpop.f32.mrb[31].mxu0  ;;  %v2661_v43 = vmul.f32 -1.442695, %v2176_v26  ;;  %v637_v26 = vcombine.high %v636_v18, %v636_v18  ;;  %v522_v29 = vcombine.high %v520_v23, %v520_v23 }
0x143b   : > { %v2300_v35 = vpop.f32.mrb[28].mxu1  ;;  %v657_v32 = vrot.slane %v644_v24, %v3404_v61  ;;  %v1181_v18 = vrot.slane %v1168_v10, %v3404_v61  ;;  %v1299_v23 = vrot.slane %v1291_v57, %v3397_v54 }
0x143c   : > { %v2306_v36 = vadd.f32 %v2300_v35, %v2258_v33  ;;  %v2796_v37 = vpop.f32.mrb[29].mxu1  ;;  %v652_v33 = vcombine.high %v644_v24, %v644_v24  ;;  %v538_v35 = vrot.slane %v522_v29, %v3404_v61 }
0x143d   : > { %v2303_v38 = vpop.f32.mrb[30].mxu1  ;;  %v775_v37 = vrot.slane %v767_v28, %v3397_v54  ;;  %v1312_v60 = vrot.slane %v1299_v23, %v3404_v61  ;;  %v1307_v29 = vcombine.high %v1299_v23, %v1299_v23 }
0x143e   : > { %2963 = vtanh.f32 %v2306_v36  ;;  %v2797_v39 = vpop.f32.mrb[31].mxu1  ;;  %v2663_v44 = vmul.f32 -1.442695, %v2306_v36  ;;  %v651_v36 = vrot.slane %v637_v26, %v3397_v54  ;;  %v665_v38 = vrot.slane %v652_v33, %v3404_v61 }
0x143f   : > { %2965 = vpow2.f32 %v2661_v43  ;;  %v768_v39 = vcombine.high %v767_v28, %v767_v28  ;;  %v788_v43 = vrot.slane %v775_v37, %v3404_v61  ;;  %v1320_v33 = vrot.slane %v1307_v29, %v3404_v61 }
0x1440   : > { %2967 = vpow2.f32 %v2663_v44  ;;  %v783_v44 = vcombine.high %v775_v37, %v775_v37 }
0x1441   : > { %v782_v1 = vrot.slane %v768_v39, %v3397_v54 }
0x1442   : > { %v796_v49 = vrot.slane %v783_v44, %v3404_v61 }
0x1443   : > { %v784_v53 = vcombine.high %v782_v1, %v782_v1 }
0x1444   : > { %v2962_v40 = vpop.eup %2961 }
0x1445   : > { %2186 = vrot.lane.b32.xlu0 %v2962_v40, %s3021_s22  ;;  %v661_v40 = vrot.slane %v651_v36, %v3404_v61  ;;  %v800_v55 = vrot.slane %v784_v53, %v3404_v61  ;;  %v1553_v53 = vrot.slane %v3323_v45, %v3397_v54 }
0x1447   : > { %v1554_v63 = vcombine.high %v1553_v53, %v1553_v53 }
0x1448   : > { %v2964_v41 = vpop.eup %2963 }
0x1449   : > { %2316 = vrot.lane.b32.xlu1 %v2964_v41, %s3021_s22  ;;  %v2966_v46 = vpop.eup %2965  ;;  %v653_v41 = vcombine.high %v651_v36, %v651_v36 }
0x144a   : > { %v2180_v51 = vadd.f32 1.0, %v2966_v46  ;;  %v2968_v52 = vpop.eup %2967 }
0x144b   : > { %v2310_v2 = vadd.f32 1.0, %v2968_v52  ;;  %v669_v46 = vrot.slane %v653_v41, %v3404_v61  ;;  %v792_v52 = vrot.slane %v782_v1, %v3404_v61 }
0x144c   : > { %2969 = vrcp.f32 %v2180_v51  ;;  %v899_v51 = vcombine.high %v898_v31, %v898_v31 }
0x144d   : > { %2971 = vrcp.f32 %v2310_v2  ;;  %v914_v2 = vcombine.high %v906_v48, %v906_v48 }
0x1456   : > { %v3401_v56 = vpop.eup %2969 }
0x1457   : > { %v3408_v0 = vpop.eup %2971 }
0x1458   : > { %v2314_v41 = vmul.f32 %v3408_v0, %v3376_v12 }
0x14b7   : > { %v2187_v58 = vpop.permute.xlu0 %2186 }
0x14b8   : > { %v2189_v62 = vmul.f32 %v3401_v56, %v2187_v58  ;;  %v913_v58 = vrot.slane %v899_v51, %v3397_v54 }
0x14ba   : > { %2191 = vrot.lane.b32.xlu0 %v2189_v62, %s3020_s13  ;;  %v927_v62 = vrot.slane %v914_v2, %v3404_v61  ;;  %v923_v4 = vrot.slane %v913_v58, %v3404_v61 }
0x14bb   : > { %v2317_v5 = vpop.permute.xlu1 %2316 }
0x14bc   : > { %v2319_v7 = vmul.f32 %v3408_v0, %v2317_v5  ;;  %v915_v5 = vcombine.high %v913_v58, %v913_v58 }
0x14be   : > { %400 = vrot.lane.b32.xlu0 %v387_v47, %s3023_s25  ;;  %2321 = vrot.lane.b32.xlu1 %v2319_v7, %s3020_s13  ;;  %v1050_v47 = vrot.slane %v1037_v59, %v3404_v61  ;;  %v931_v7 = vrot.slane %v915_v5, %v3404_v61  ;;  %v1561_v59 = vrot.slane %v1553_v53, %v3397_v54 }
0x14bf   : > { %v2077_v53 = vrot.slane %v3386_v20, %v3397_v54 }
0x14c2   : > { %404 = vrot.lane.b32.xlu0 %v395_v13, %s3023_s25  ;;  %402 = vrot.lane.b32.xlu1 %v391_v16, %s3023_s25  ;;  %v1058_v13 = vrot.slane %v1045_v6, %v3404_v61  ;;  %v1054_v16 = vrot.slane %v1044_v9, %v3404_v61  ;;  %v1574_v6 = vrot.slane %v1561_v59, %v3404_v61 }
0x14c6   : > { %539 = vrot.lane.b32.xlu0 %v526_v19, %s3023_s25  ;;  %406 = vrot.lane.b32.xlu1 %v399_v22, %s3023_s25  ;;  %v1176_v19 = vcombine.high %v1168_v10, %v1168_v10  ;;  %v1175_v22 = vrot.slane %v1161_v15, %v3397_v54  ;;  %v1568_v10 = vrot.slane %v1554_v63, %v3397_v54 }
0x14c8   : > { %v1189_v24 = vrot.slane %v1176_v19, %v3404_v61  ;;  %v1185_v26 = vrot.slane %v1175_v22, %v3404_v61 }
0x14ca   : > { %543 = vrot.lane.b32.xlu0 %v534_v25, %s3023_s25  ;;  %541 = vrot.lane.b32.xlu1 %v530_v27, %s3023_s25  ;;  %v1292_v25 = vcombine.high %v1291_v57, %v1291_v57  ;;  %v1177_v27 = vcombine.high %v1175_v22, %v1175_v22  ;;  %v1570_v57 = vcombine.high %v1568_v10, %v1568_v10 }
0x14cc   : > { %v1193_v28 = vrot.slane %v1177_v27, %v3404_v61 }
0x14ce   : > { %670 = vrot.lane.b32.xlu0 %v657_v32, %s3023_s25  ;;  %545 = vrot.lane.b32.xlu1 %v538_v35, %s3023_s25  ;;  %v1306_v32 = vrot.slane %v1292_v25, %v3397_v54 }
0x14d0   : > { %v1316_v35 = vrot.slane %v1306_v32, %v3404_v61  ;;  %v1308_v36 = vcombine.high %v1306_v32, %v1306_v32 }
0x14d2   : > { %674 = vrot.lane.b32.xlu0 %v665_v38, %s3023_s25  ;;  %672 = vrot.lane.b32.xlu1 %v661_v40, %s3023_s25  ;;  %v1324_v37 = vrot.slane %v1308_v36, %v3404_v61  ;;  %v2184_v38 = vmul.f32 %v3401_v56, %v3373_v8  ;;  %v1422_v8 = vrot.slane %v3319_v42, %v3397_v54 }
0x14d4   : > { %v1430_v12 = vrot.slane %v1422_v8, %v3397_v54  ;;  %v1423_v51 = vcombine.high %v1422_v8, %v1422_v8 }
0x14d6   : > { %801 = vrot.lane.b32.xlu0 %v788_v43, %s3023_s25  ;;  %676 = vrot.lane.b32.xlu1 %v669_v46, %s3023_s25  ;;  %v1438_v42 = vcombine.high %v1430_v12, %v1430_v12 }
0x14d8   : > { %v1451_v45 = vrot.slane %v1438_v42, %v3404_v61 }
0x14da   : > { %805 = vrot.lane.b32.xlu0 %v796_v49, %s3023_s25  ;;  %803 = vrot.lane.b32.xlu1 %v792_v52, %s3023_s25 }
0x14de   : > { %932 = vrot.lane.b32.xlu0 %v919_v3, %s3023_s25  ;;  %807 = vrot.lane.b32.xlu1 %v800_v55, %s3023_s25  ;;  %v1443_v3 = vrot.slane %v1430_v12, %v3404_v61  ;;  %v1437_v55 = vrot.slane %v1423_v51, %v3397_v54 }
0x14e0   : > { %v1447_v5 = vrot.slane %v1437_v55, %v3404_v61  ;;  %v1439_v14 = vcombine.high %v1437_v55, %v1437_v55 }
0x14e2   : > { %936 = vrot.lane.b32.xlu0 %v927_v62, %s3023_s25  ;;  %934 = vrot.lane.b32.xlu1 %v923_v4, %s3023_s25  ;;  %v1455_v15 = vrot.slane %v1439_v14, %v3404_v61 }
0x14e6   : > { %1063 = vrot.lane.b32.xlu0 %v1050_v47, %s3023_s25  ;;  %938 = vrot.lane.b32.xlu1 %v931_v7, %s3023_s25  ;;  %v1569_v47 = vcombine.high %v1561_v59, %v1561_v59  ;;  %v1684_v7 = vrot.slane %v3349_v30, %v3397_v54 }
0x14e8   : > { %v1582_v30 = vrot.slane %v1569_v47, %v3404_v61 }
0x14ea   : > { %1067 = vrot.lane.b32.xlu0 %v1058_v13, %s3023_s25  ;;  %1065 = vrot.lane.b32.xlu1 %v1054_v16, %s3023_s25  ;;  %v1692_v16 = vrot.slane %v1684_v7, %v3397_v54 }
0x14ec   : > { %v1700_v22 = vcombine.high %v1692_v16, %v1692_v16  ;;  %v1705_v23 = vrot.slane %v1692_v16, %v3404_v61 }
0x14ee   : > { %1194 = vrot.lane.b32.xlu0 %v1181_v18, %s3023_s25  ;;  %1069 = vrot.lane.b32.xlu1 %v1062_v21, %s3023_s25  ;;  %v1685_v18 = vcombine.high %v1684_v7, %v1684_v7  ;;  %v1578_v21 = vrot.slane %v1568_v10, %v3404_v61 }
0x14f2   : > { %1198 = vrot.lane.b32.xlu0 %v1189_v24, %s3023_s25  ;;  %1196 = vrot.lane.b32.xlu1 %v1185_v26, %s3023_s25  ;;  %v1815_v24 = vrot.slane %v3353_v34, %v3397_v54  ;;  %v1699_v26 = vrot.slane %v1685_v18, %v3397_v54  ;;  %v1713_v34 = vrot.slane %v1700_v22, %v3404_v61 }
0x14f4   : > { %v1823_v29 = vrot.slane %v1815_v24, %v3397_v54  ;;  %v1701_v32 = vcombine.high %v1699_v26, %v1699_v26  ;;  %v1709_v36 = vrot.slane %v1699_v26, %v3404_v61 }
0x14f6   : > { %1325 = vrot.lane.b32.xlu0 %v1312_v60, %s3023_s25  ;;  %1200 = vrot.lane.b32.xlu1 %v1193_v28, %s3023_s25  ;;  %v1586_v60 = vrot.slane %v1570_v57, %v3404_v61  ;;  %v1717_v8 = vrot.slane %v1701_v32, %v3404_v61 }
0x14fa   : > { %1329 = vrot.lane.b32.xlu0 %v1320_v33, %s3023_s25  ;;  %1327 = vrot.lane.b32.xlu1 %v1316_v35, %s3023_s25  ;;  %v1816_v33 = vcombine.high %v1815_v24, %v1815_v24 }
0x14fe   : > { %1331 = vrot.lane.b32.xlu1 %v1324_v37, %s3023_s25  ;;  %v1831_v37 = vcombine.high %v1823_v29, %v1823_v29 }
0x152c   : > { %v2192_v39 = vpop.permute.xlu0 %2191 }
0x152d   : > { %v3507_v40 = vadd.f32 %v2192_v39, %v2184_v38  ;;  %v1836_v38 = vrot.slane %v1823_v29, %v3404_v61  ;;  %v1946_v39 = vrot.slane %v3381_v17, %v3397_v54  ;;  %v1844_v17 = vrot.slane %v1831_v37, %v3404_v61 }
0x152f   : > { %2973 = vtanh.f32 %v3507_v40 }
0x1530   : > { %v401_v31 = vpop.permute.xlu0 %400  ;;  %v2322_v43 = vpop.permute.xlu1 %2321 }
0x1531   : > { %413 = vst.msk [vmem:[%s3124_s10] sm:$0x1] %vm412_vm3, %v401_v31  ;;  %v3514_v44 = vadd.f32 %v2322_v43, %v2314_v41  ;;  %v1830_v31 = vrot.slane %v1816_v33, %v3397_v54 }
0x1533   : > { %2975 = vtanh.f32 %v3514_v44  ;;  %v1832_v12 = vcombine.high %v1830_v31, %v1830_v31  ;;  %v1840_v51 = vrot.slane %v1830_v31, %v3404_v61 }
0x1534   : > { %v405_v46 = vpop.permute.xlu0 %404  ;;  %v403_v1 = vpop.permute.xlu1 %402 }
0x1535   : > { %415 = vst.msk [vmem:[%s3124_s10 + $0x10] sm:$0x1] %vm412_vm3, %v405_v46  ;;  %414 = vst.msk [vmem:[%s3124_s10 + $0x8] sm:$0x1] %vm412_vm3, %v403_v1  ;;  %v1954_v46 = vrot.slane %v1946_v39, %v3397_v54  ;;  %v1848_v55 = vrot.slane %v1832_v12, %v3404_v61 }
0x1537   : > { %v1967_v42 = vrot.slane %v1954_v46, %v3404_v61 }
0x1538   : > { %v540_v48 = vpop.permute.xlu0 %539  ;;  %v407_v52 = vpop.permute.xlu1 %406 }
0x1539   : > { %v2974_v49 = vpop.eup %2973  ;;  %551 = vst.msk [vmem:[%s3126_s11 + $0x7] sm:$0x1] %vm412_vm3, %v540_v48  ;;  %416 = vst.msk [vmem:[%s3124_s10 + $0x18] sm:$0x1] %vm412_vm3, %v407_v52  ;;  %v1947_v48 = vcombine.high %v1946_v39, %v1946_v39  ;;  %v1962_v52 = vcombine.high %v1954_v46, %v1954_v46 }
0x153a   : > { %2197 = vrot.lane.b32.xlu0 %v2974_v49, %s3022_s20 }
0x153b   : > { %v1975_v20 = vrot.slane %v1962_v52, %v3404_v61 }
0x153c   : > { %v544_v11 = vpop.permute.xlu0 %543  ;;  %v542_v2 = vpop.permute.xlu1 %541 }
0x153d   : > { %553 = vst.msk [vmem:[%s3126_s11 + $0x17] sm:$0x1] %vm412_vm3, %v544_v11  ;;  %v2976_v58 = vpop.eup %2975  ;;  %552 = vst.msk [vmem:[%s3126_s11 + $0xf] sm:$0x1] %vm412_vm3, %v542_v2 }
0x153e   : > { %1456 = vrot.lane.b32.xlu0 %v1443_v3, %s3023_s25  ;;  %2327 = vrot.lane.b32.xlu1 %v2976_v58, %s3022_s20  ;;  %v1961_v3 = vrot.slane %v1947_v48, %v3397_v54  ;;  %v2085_v58 = vrot.slane %v2077_v53, %v3397_v54 }
0x1540   : > { %v671_v62 = vpop.permute.xlu0 %670  ;;  %v546_v4 = vpop.permute.xlu1 %545  ;;  %v2098_v14 = vrot.slane %v2085_v58, %v3404_v61 }
0x1541   : > { %682 = vst.msk [vmem:[%s3124_s10 + $0x1] sm:$0x1] %vm412_vm3, %v671_v62  ;;  %554 = vst.msk [vmem:[%s3126_s11 + $0x1f] sm:$0x1] %vm412_vm3, %v546_v4  ;;  %v1963_v62 = vcombine.high %v1961_v3, %v1961_v3  ;;  %v1971_v4 = vrot.slane %v1961_v3, %v3404_v61 }
0x1542   : > { %1460 = vrot.lane.b32.xlu0 %v1451_v45, %s3023_s25  ;;  %1458 = vrot.lane.b32.xlu1 %v1447_v5, %s3023_s25  ;;  %v2078_v45 = vcombine.high %v2077_v53, %v2077_v53  ;;  %v2093_v5 = vcombine.high %v2085_v58, %v2085_v58 }
0x1544   : > { %v675_v9 = vpop.permute.xlu0 %674  ;;  %v673_v13 = vpop.permute.xlu1 %672 }
0x1545   : > { %684 = vst.msk [vmem:[%s3124_s10 + $0x11] sm:$0x1] %vm412_vm3, %v675_v9  ;;  %683 = vst.msk [vmem:[%s3124_s10 + $0x9] sm:$0x1] %vm412_vm3, %v673_v13  ;;  %v1979_v9 = vrot.slane %v1963_v62, %v3404_v61  ;;  %v2106_v13 = vrot.slane %v2093_v5, %v3404_v61 }
0x1546   : > { %1587 = vrot.lane.b32.xlu0 %v1574_v6, %s3023_s25  ;;  %1462 = vrot.lane.b32.xlu1 %v1455_v15, %s3023_s25  ;;  %v2092_v6 = vrot.slane %v2078_v45, %v3397_v54 }
0x1548   : > { %v802_v50 = vpop.permute.xlu0 %801  ;;  %v677_v19 = vpop.permute.xlu1 %676  ;;  %v2094_v15 = vcombine.high %v2092_v6, %v2092_v6 }
0x1549   : > { %813 = vst.msk [vmem:[%s3126_s11 + $0x6] sm:$0x1] %vm412_vm3, %v802_v50  ;;  %685 = vst.msk [vmem:[%s3124_s10 + $0x19] sm:$0x1] %vm412_vm3, %v677_v19  ;;  %v2102_v50 = vrot.slane %v2092_v6, %v3404_v61 }
0x154a   : > { %1591 = vrot.lane.b32.xlu0 %v1582_v30, %s3023_s25  ;;  %1589 = vrot.lane.b32.xlu1 %v1578_v21, %s3023_s25  ;;  %v2110_v18 = vrot.slane %v2094_v15, %v3404_v61 }
0x154c   : > { %v806_v25 = vpop.permute.xlu0 %805  ;;  %v804_v27 = vpop.permute.xlu1 %803 }
0x154d   : > { %815 = vst.msk [vmem:[%s3126_s11 + $0x16] sm:$0x1] %vm412_vm3, %v806_v25  ;;  %814 = vst.msk [vmem:[%s3126_s11 + $0xe] sm:$0x1] %vm412_vm3, %v804_v27 }
0x154e   : > { %1718 = vrot.lane.b32.xlu0 %v1705_v23, %s3023_s25  ;;  %1593 = vrot.lane.b32.xlu1 %v1586_v60, %s3023_s25 }
0x1550   : > { %v933_v28 = vpop.permute.xlu0 %932  ;;  %v808_v35 = vpop.permute.xlu1 %807 }
0x1551   : > { %944 = vst.msk [vmem:[%s3124_s10 + $0x2] sm:$0x1] %vm412_vm3, %v933_v28  ;;  %816 = vst.msk [vmem:[%s3126_s11 + $0x1e] sm:$0x1] %vm412_vm3, %v808_v35 }
0x1552   : > { %1722 = vrot.lane.b32.xlu0 %v1713_v34, %s3023_s25  ;;  %1720 = vrot.lane.b32.xlu1 %v1709_v36, %s3023_s25 }
0x1554   : > { %v937_v41 = vpop.permute.xlu0 %936  ;;  %v935_v43 = vpop.permute.xlu1 %934 }
0x1555   : > { %946 = vst.msk [vmem:[%s3124_s10 + $0x12] sm:$0x1] %vm412_vm3, %v937_v41  ;;  %945 = vst.msk [vmem:[%s3124_s10 + $0xa] sm:$0x1] %vm412_vm3, %v935_v43 }
0x1556   : > { %1849 = vrot.lane.b32.xlu0 %v1836_v38, %s3023_s25  ;;  %1724 = vrot.lane.b32.xlu1 %v1717_v8, %s3023_s25 }
0x1558   : > { %v1064_v1 = vpop.permute.xlu0 %1063  ;;  %v939_v49 = vpop.permute.xlu1 %938 }
0x1559   : > { %1075 = vst.msk [vmem:[%s3126_s11 + $0x5] sm:$0x1] %vm412_vm3, %v1064_v1  ;;  %947 = vst.msk [vmem:[%s3124_s10 + $0x1a] sm:$0x1] %vm412_vm3, %v939_v49 }
0x155a   : > { %1853 = vrot.lane.b32.xlu0 %v1844_v17, %s3023_s25  ;;  %1851 = vrot.lane.b32.xlu1 %v1840_v51, %s3023_s25 }
0x155c   : > { %v1068_v11 = vpop.permute.xlu0 %1067  ;;  %v1066_v2 = vpop.permute.xlu1 %1065 }
0x155d   : > { %1077 = vst.msk [vmem:[%s3126_s11 + $0x15] sm:$0x1] %vm412_vm3, %v1068_v11  ;;  %1076 = vst.msk [vmem:[%s3126_s11 + $0xd] sm:$0x1] %vm412_vm3, %v1066_v2 }
0x155e   : > { %1980 = vrot.lane.b32.xlu0 %v1967_v42, %s3023_s25  ;;  %1855 = vrot.lane.b32.xlu1 %v1848_v55, %s3023_s25 }
0x1560   : > { %v1195_v59 = vpop.permute.xlu0 %1194  ;;  %v1070_v63 = vpop.permute.xlu1 %1069 }
0x1561   : > { %1206 = vst.msk [vmem:[%s3124_s10 + $0x3] sm:$0x1] %vm412_vm3, %v1195_v59  ;;  %1078 = vst.msk [vmem:[%s3126_s11 + $0x1d] sm:$0x1] %vm412_vm3, %v1070_v63 }
0x1562   : > { %1984 = vrot.lane.b32.xlu0 %v1975_v20, %s3023_s25  ;;  %1982 = vrot.lane.b32.xlu1 %v1971_v4, %s3023_s25 }
0x1564   : > { %v1199_v47 = vpop.permute.xlu0 %1198  ;;  %v1197_v7 = vpop.permute.xlu1 %1196 }
0x1565   : > { %1208 = vst.msk [vmem:[%s3124_s10 + $0x13] sm:$0x1] %vm412_vm3, %v1199_v47  ;;  %1207 = vst.msk [vmem:[%s3124_s10 + $0xb] sm:$0x1] %vm412_vm3, %v1197_v7 }
0x1566   : > { %2111 = vrot.lane.b32.xlu0 %v2098_v14, %s3023_s25  ;;  %1986 = vrot.lane.b32.xlu1 %v1979_v9, %s3023_s25 }
0x1568   : > { %v1326_v10 = vpop.permute.xlu0 %1325  ;;  %v1201_v16 = vpop.permute.xlu1 %1200 }
0x1569   : > { %1337 = vst.msk [vmem:[%s3126_s11 + $0x4] sm:$0x1] %vm412_vm3, %v1326_v10  ;;  %1209 = vst.msk [vmem:[%s3124_s10 + $0x1b] sm:$0x1] %vm412_vm3, %v1201_v16 }
0x156a   : > { %2115 = vrot.lane.b32.xlu0 %v2106_v13, %s3023_s25  ;;  %2113 = vrot.lane.b32.xlu1 %v2102_v50, %s3023_s25 }
0x156c   : > { %v1330_v30 = vpop.permute.xlu0 %1329  ;;  %v1328_v57 = vpop.permute.xlu1 %1327 }
0x156d   : > { %1339 = vst.msk [vmem:[%s3126_s11 + $0x14] sm:$0x1] %vm412_vm3, %v1330_v30  ;;  %1338 = vst.msk [vmem:[%s3126_s11 + $0xc] sm:$0x1] %vm412_vm3, %v1328_v57 }
0x156e   : > { %2117 = vrot.lane.b32.xlu1 %v2110_v18, %s3023_s25 }
0x1570   : > { %v1332_v19 = vpop.permute.xlu1 %1331 }
0x1571   : > { %1340 = vst.msk [vmem:[%s3126_s11 + $0x1c] sm:$0x1] %vm412_vm3, %v1332_v19 }
0x1572   : > { %2394 = vrot.lane.b32.xlu1 %v3507_v40, %s3025_s26 }
0x15ac   : > { %v2198_v21 = vpop.permute.xlu0 %2197 }
0x15ad   : > { %v2200_v22 = vmul.f32 %v3401_v56, %v2198_v21 }
0x15af   : > { %v2208_v23 = vrot.slane %v2200_v22, %v3397_v54  ;;  %2388 = vrot.lane.b32.xlu0 %v2200_v22, %s3023_s25 }
0x15b0   : > { %v1457_v24 = vpop.permute.xlu0 %1456  ;;  %v2328_v27 = vpop.permute.xlu1 %2327 }
0x15b1   : > { %v2209_v25 = vcombine.high %v2208_v23, %v2208_v23  ;;  %v2216_v26 = vrot.slane %v2208_v23, %v3397_v54  ;;  %1468 = vst.msk [vmem:[%s3124_s10 + $0x4] sm:$0x1] %vm412_vm3, %v1457_v24  ;;  %v2330_v60 = vmul.f32 %v3408_v0, %v2328_v27 }
0x15b3   : > { %v2223_v40 = vrot.slane %v2209_v25, %v3397_v54  ;;  %v2229_v29 = vrot.slane %v2216_v26, %v3404_v61  ;;  %v2338_v56 = vrot.slane %v2330_v60, %v3397_v54  ;;  %v2224_v0 = vcombine.high %v2216_v26, %v2216_v26 }
0x15b4   : > { %v1461_v28 = vpop.permute.xlu0 %1460  ;;  %v1459_v34 = vpop.permute.xlu1 %1458 }
0x15b5   : > { %1470 = vst.msk [vmem:[%s3124_s10 + $0x14] sm:$0x1] %vm412_vm3, %v1461_v28  ;;  %2242 = vrot.lane.b32.xlu0 %v2229_v29, %s3023_s25  ;;  %v2233_v32 = vrot.slane %v2223_v40, %v3404_v61  ;;  %v2339_v33 = vcombine.high %v2338_v56, %v2338_v56  ;;  %v2346_v35 = vrot.slane %v2338_v56, %v3397_v54  ;;  %1469 = vst.msk [vmem:[%s3124_s10 + $0xc] sm:$0x1] %vm412_vm3, %v1459_v34 }
0x15b6   : > { %v2225_v41 = vcombine.high %v2223_v40, %v2223_v40  ;;  %v2237_v8 = vrot.slane %v2224_v0, %v3404_v61 }
0x15b7   : > { %2244 = vrot.lane.b32.xlu1 %v2233_v32, %s3023_s25  ;;  %v2353_v36 = vrot.slane %v2339_v33, %v3397_v54  ;;  %v2359_v37 = vrot.slane %v2346_v35, %v3404_v61  ;;  %v2354_v43 = vcombine.high %v2346_v35, %v2346_v35 }
0x15b8   : > { %v1588_v38 = vpop.permute.xlu0 %1587  ;;  %v1463_v39 = vpop.permute.xlu1 %1462  ;;  %v2241_v17 = vrot.slane %v2225_v41, %v3404_v61 }
0x15b9   : > { %1599 = vst.msk [vmem:[%s3126_s11 + $0x3] sm:$0x1] %vm412_vm3, %v1588_v38  ;;  %1471 = vst.msk [vmem:[%s3124_s10 + $0x1c] sm:$0x1] %vm412_vm3, %v1463_v39  ;;  %2372 = vrot.lane.b32.xlu0 %v2359_v37, %s3023_s25  ;;  %v2363_v31 = vrot.slane %v2353_v36, %v3404_v61  ;;  %v2355_v1 = vcombine.high %v2353_v36, %v2353_v36  ;;  %v2367_v48 = vrot.slane %v2354_v43, %v3404_v61 }
0x15bb   : > { %2374 = vrot.lane.b32.xlu1 %v2363_v31, %s3023_s25  ;;  %v2371_v51 = vrot.slane %v2355_v1, %v3404_v61 }
0x15bc   : > { %v1592_v54 = vpop.permute.xlu0 %1591  ;;  %v1590_v46 = vpop.permute.xlu1 %1589 }
0x15bd   : > { %1601 = vst.msk [vmem:[%s3126_s11 + $0x13] sm:$0x1] %vm412_vm3, %v1592_v54  ;;  %1600 = vst.msk [vmem:[%s3126_s11 + $0xb] sm:$0x1] %vm412_vm3, %v1590_v46  ;;  %2246 = vrot.lane.b32.xlu0 %v2237_v8, %s3023_s25 }
0x15bf   : > { %2248 = vrot.lane.b32.xlu1 %v2241_v17, %s3023_s25 }
0x15c0   : > { %v1719_v12 = vpop.permute.xlu0 %1718  ;;  %v1594_v49 = vpop.permute.xlu1 %1593 }
0x15c1   : > { %1730 = vst.msk [vmem:[%s3124_s10 + $0x5] sm:$0x1] %vm412_vm3, %v1719_v12  ;;  %1602 = vst.msk [vmem:[%s3126_s11 + $0x1b] sm:$0x1] %vm412_vm3, %v1594_v49  ;;  %2376 = vrot.lane.b32.xlu0 %v2367_v48, %s3023_s25 }
0x15c3   : > { %2378 = vrot.lane.b32.xlu1 %v2371_v51, %s3023_s25 }
0x15c4   : > { %v1723_v52 = vpop.permute.xlu0 %1722  ;;  %v1721_v42 = vpop.permute.xlu1 %1720 }
0x15c5   : > { %1732 = vst.msk [vmem:[%s3124_s10 + $0x15] sm:$0x1] %vm412_vm3, %v1723_v52  ;;  %1731 = vst.msk [vmem:[%s3124_s10 + $0xd] sm:$0x1] %vm412_vm3, %v1721_v42  ;;  %2398 = vrot.lane.b32.xlu0 %v2330_v60, %s3023_s25 }
0x15c7   : > { %2403 = vrot.lane.b32.xlu1 %v3514_v44, %s3025_s26 }
0x15c8   : > { %v1850_v53 = vpop.permute.xlu0 %1849  ;;  %v1725_v11 = vpop.permute.xlu1 %1724 }
0x15c9   : > { %1861 = vst.msk [vmem:[%s3126_s11 + $0x2] sm:$0x1] %vm412_vm3, %v1850_v53  ;;  %1733 = vst.msk [vmem:[%s3124_s10 + $0x1d] sm:$0x1] %vm412_vm3, %v1725_v11 }
0x15cc   : > { %v1854_v61 = vpop.permute.xlu0 %1853  ;;  %v1852_v3 = vpop.permute.xlu1 %1851 }
0x15cd   : > { %1863 = vst.msk [vmem:[%s3126_s11 + $0x12] sm:$0x1] %vm412_vm3, %v1854_v61  ;;  %1862 = vst.msk [vmem:[%s3126_s11 + $0xa] sm:$0x1] %vm412_vm3, %v1852_v3 }
0x15d0   : > { %v1981_v2 = vpop.permute.xlu0 %1980  ;;  %v1856_v55 = vpop.permute.xlu1 %1855 }
0x15d1   : > { %1992 = vst.msk [vmem:[%s3124_s10 + $0x6] sm:$0x1] %vm412_vm3, %v1981_v2  ;;  %1864 = vst.msk [vmem:[%s3126_s11 + $0x1a] sm:$0x1] %vm412_vm3, %v1856_v55 }
0x15d4   : > { %v1985_v44 = vpop.permute.xlu0 %1984  ;;  %v1983_v58 = vpop.permute.xlu1 %1982 }
0x15d5   : > { %1994 = vst.msk [vmem:[%s3124_s10 + $0x16] sm:$0x1] %vm412_vm3, %v1985_v44  ;;  %1993 = vst.msk [vmem:[%s3124_s10 + $0xe] sm:$0x1] %vm412_vm3, %v1983_v58 }
0x15d8   : > { %v2112_v59 = vpop.permute.xlu0 %2111  ;;  %v1987_v20 = vpop.permute.xlu1 %1986 }
0x15d9   : > { %2123 = vst.msk [vmem:[%s3126_s11 + $0x1] sm:$0x1] %vm412_vm3, %v2112_v59  ;;  %1995 = vst.msk [vmem:[%s3124_s10 + $0x1e] sm:$0x1] %vm412_vm3, %v1987_v20 }
0x15dc   : > { %v2116_v62 = vpop.permute.xlu0 %2115  ;;  %v2114_v45 = vpop.permute.xlu1 %2113 }
0x15dd   : > { %2125 = vst.msk [vmem:[%s3126_s11 + $0x11] sm:$0x1] %vm412_vm3, %v2116_v62  ;;  %2124 = vst.msk [vmem:[%s3126_s11 + $0x9] sm:$0x1] %vm412_vm3, %v2114_v45 }
0x15e0   : > { %v2118_v63 = vpop.permute.xlu1 %2117 }
0x15e1   : > { %2126 = vst.msk [vmem:[%s3126_s11 + $0x19] sm:$0x1] %vm412_vm3, %v2118_v63 }
0x15e4   : > { %v2395_v4 = vpop.permute.xlu1 %2394 }
0x15e5   : > { %2397 = vst.msk [vmem:[#allocation3] sm:$0xf] %vm2391_vm4, %v2395_v4 }
0x1621   : > { %v2389_v5 = vpop.permute.xlu0 %2388 }
0x1622   : > { %2392 = vst.msk [vmem:[#allocation2] sm:$0xf] %vm2391_vm4, %v2389_v5 }
0x1627   : > { %v2243_v14 = vpop.permute.xlu0 %2242 }
0x1628   : > { %2254 = vst.msk [vmem:[%s3124_s10 + $0x7] sm:$0x1] %vm412_vm3, %v2243_v14 }
0x1629   : > { %v2245_v47 = vpop.permute.xlu1 %2244 }
0x162a   : > { %2255 = vst.msk [vmem:[%s3124_s10 + $0xf] sm:$0x1] %vm412_vm3, %v2245_v47 }
0x162b   : > { %v2373_v6 = vpop.permute.xlu0 %2372 }
0x162c   : > { %2384 = vst.msk [vmem:[%s3126_s11] sm:$0x1] %vm412_vm3, %v2373_v6 }
0x162d   : > { %v2375_v7 = vpop.permute.xlu1 %2374 }
0x162e   : > { %2385 = vst.msk [vmem:[%s3126_s11 + $0x8] sm:$0x1] %vm412_vm3, %v2375_v7 }
0x162f   : > { %v2247_v9 = vpop.permute.xlu0 %2246  ;;  %v2453_v30 = vld [vmem:[%s3124_s10] sm:$0xff] (%p3088_p3) }
0x1630   : > { %2256 = vst.msk [vmem:[%s3124_s10 + $0x17] sm:$0x1] %vm412_vm3, %v2247_v9  ;;  %2454 = vst [vmem:[%s2419_s30] sm:$0xff] (%p3088_p3), %v2453_v30 }
0x1631   : > { %v2249_v10 = vpop.permute.xlu1 %2248  ;;  %v2455_v57 = vld [vmem:[%s3124_s10 + $0x8] sm:$0xff] (%p3088_p3) }
0x1632   : > { %2257 = vst.msk [vmem:[%s3124_s10 + $0x1f] sm:$0x1] %vm412_vm3, %v2249_v10  ;;  %2456 = vst [vmem:[%s2419_s30 + $0x10] sm:$0xff] (%p3088_p3), %v2455_v57 }
0x1633   : > { %v2377_v13 = vpop.permute.xlu0 %2376 }
0x1634   : > { %2386 = vst.msk [vmem:[%s3126_s11 + $0x10] sm:$0x1] %vm412_vm3, %v2377_v13  ;;  %2417 = sbr.rel (!%p3088_p3) target bundleno = 5691 (0x163b), region = 44 }
0x1635   : > { %v2379_v15 = vpop.permute.xlu1 %2378 }
0x1636   : > { %2387 = vst.msk [vmem:[%s3126_s11 + $0x18] sm:$0x1] %vm412_vm3, %v2379_v15 }
0x1637   : > { %v2399_v16 = vpop.permute.xlu0 %2398  ;;  %v2457_v18 = vld [vmem:[%s3124_s10 + $0x10] sm:$0xff] (%p3088_p3) }
0x1638   : > { %2401 = vst.msk [vmem:[#allocation4] sm:$0xf] %vm2391_vm4, %v2399_v16  ;;  %2458 = vst [vmem:[%s2419_s30 + $0x20] sm:$0xff] (%p3088_p3), %v2457_v18 }
0x1639   : > { %v2404_v50 = vpop.permute.xlu1 %2403  ;;  %v2459_v19 = vld [vmem:[%s3124_s10 + $0x18] sm:$0xff] (%p3088_p3) }
0x163a   : > { %2406 = vst.msk [vmem:[#allocation5] sm:$0xf] %vm2391_vm4, %v2404_v50  ;;  %2460 = vst [vmem:[%s2419_s30 + $0x30] sm:$0xff] (%p3088_p3), %v2459_v19 }
0x163b PF: > { %2466 = sbr.rel (!%p3099_p8) target bundleno = 5698 (0x1642), region = 82  ;;  %s2469_s14 = scalar_lea.vmem (%p3099_p8), %s3792_s5, %s3109_s16  ;;  %v2503_v21 = vld [vmem:[%s3126_s11] sm:$0xff] (%p3099_p8)  ;;  %v2505_v22 = vld [vmem:[%s3126_s11 + $0x8] sm:$0xff] (%p3099_p8)  ;;  %v2507_v23 = vld [vmem:[%s3126_s11 + $0x10] sm:$0xff] (%p3099_p8) }
0x163c   : > { %2504 = vst [vmem:[%s2469_s14] sm:$0xff] (%p3099_p8), %v2503_v21  ;;  %2506 = vst [vmem:[%s2469_s14 + $0x10] sm:$0xff] (%p3099_p8), %v2505_v22 }
0x163d   : > { %2508 = vst [vmem:[%s2469_s14 + $0x20] sm:$0xff] (%p3099_p8), %v2507_v23  ;;  %v2509_v24 = vld [vmem:[%s3126_s11 + $0x18] sm:$0xff] (%p3099_p8) }
0x163e   : > { %2510 = vst [vmem:[%s2469_s14 + $0x30] sm:$0xff] (%p3099_p8), %v2509_v24 }
0x1642 PF: > { %p13_p13 = scmp.ge.s32.totalorder %s3079_s24, 4   ;;  %s3795_s18 = smov %s3003_s19 }
0x1643   : > { %s3796_s19 = smov %s3097_s8  ;;  %s3797_s20 = smov %s3011_s21 }
0x1644   : > { %s3798_s21 = smov %s3086_s28  ;;  %s3799_s22 = smov %s3079_s24 }
0x1645   :  { %15 = sbr.rel (!%p13_p13) target bundleno = 3 (0x3), region = 175 }

</bundles_post_ra>
